<compile_context>
chip_gen: v6e
topology: v6e:2x2x1
jax: 0.10.0
libtpu: 0.0.40
codegen_flags: <defaults>
</compile_context>

<pallas_src>
import math
import functools

import jax
import jax.numpy as jnp
from jax.experimental import pallas as pl
from jax.experimental.pallas import tpu as pltpu


# ----------------------------------------------------------------------------
# helpers
# ----------------------------------------------------------------------------
def _layernorm(x, g, b, eps=1e-5):
    mu = jnp.mean(x, axis=-1, keepdims=True)
    var = jnp.mean(jnp.square(x - mu), axis=-1, keepdims=True)
    return (x - mu) * jax.lax.rsqrt(var + eps) * g + b


def generate_square_subsequent_mask(sz):
    # 0.0 on/below the diagonal, large-negative above (same effect as -inf
    # after the subtract-max softmax, without -inf - -inf NaN risk).
    i = jnp.arange(sz)[:, None]
    j = jnp.arange(sz)[None, :]
    return jnp.where(j <= i, 0.0, -1e30).astype(jnp.float32)


def _small_layout(iw, ow, d_model):
    """Row layout of the packed slab holding all tiny f32 MLP parameters."""
    mid = (iw + ow) // 2
    items = [
        ("enc_w1T", 5, d_model // 2),
        ("enc_b1", 1, d_model // 2),
        ("enc_w2T", d_model // 2, d_model),
        ("enc_b2", 1, d_model),
        ("lin_w1T", d_model, d_model // 2),
        ("lin_b1", 1, d_model // 2),
        ("lin_w2", 1, d_model // 2),      # head Linear(D/2, 1) stored as (1, D/2)
        ("lin_b2", 1, 1),
        ("lin2_w1T", iw, mid),
        ("lin2_b1", 1, mid),
        ("lin2_w2T", mid, ow),
        ("lin2_b2", 1, ow),
    ]
    offs, r, cols = {}, 0, 1
    for name, nr, nc in items:
        offs[name] = (r, nr, nc)
        r += nr
        cols = max(cols, nc)
    return offs, r, cols


# ----------------------------------------------------------------------------
# single fused kernel: whole batch, no grid
# ----------------------------------------------------------------------------
def fused_forward_kernel(
    src_ref, mask_ref, small_ref,
    wqo_ref, bqkv_ref, pvec_ref, w1_ref, b1_ref, w2_ref,
    o_ref,
    *, B, S, d_model, nhead, nlayers, offs,
):
    f32, bf16 = jnp.float32, jnp.bfloat16
    hd = d_model // nhead
    scale = 1.0 / math.sqrt(hd)
    BS = B * S

    def P(name):
        r, nr, nc = offs[name]
        return small_ref[r:r + nr, 0:nc]

    # ---- input encoder: Linear(5, D/2) -> ReLU -> Linear(D/2, D)  (f32) ----
    src = src_ref[...]                                                 # (B*S, 5)
    h = jnp.dot(src, P("enc_w1T"), preferred_element_type=f32) + P("enc_b1")
    h = jnp.maximum(h, 0.0)
    x = jnp.dot(h, P("enc_w2T"), preferred_element_type=f32) + P("enc_b2")  # (B*S, D)

    mask = mask_ref[...]                                               # (S, S) additive

    # ---- nlayers post-norm TransformerEncoderLayers (statically unrolled) ----
    for l in range(nlayers):
        w_l = wqo_ref[l]                                               # (D, 4D) bf16
        pv = pvec_ref[l]                                               # (6, D) f32
        bo, ln1g, ln1b = pv[0:1], pv[1:2], pv[2:3]
        b2, ln2g, ln2b = pv[3:4], pv[4:5], pv[5:6]

        xb = x.astype(bf16)
        # single fused QKV projection: (B*S, D) @ (D, 3D), bf16 / f32-acc
        qkv = jnp.dot(xb, w_l[:, 0:3 * d_model],
                      preferred_element_type=f32) + bqkv_ref[l]        # (B*S, 3D)

        # per-head attention, batch folded as the leading einsum batch dim
        ctx_heads = []
        for hix in range(nhead):
            q = qkv[:, hix * hd:(hix + 1) * hd].reshape(B, S, hd).astype(bf16)
            k = qkv[:, d_model + hix * hd:d_model + (hix + 1) * hd
                    ].reshape(B, S, hd).astype(bf16)
            v = qkv[:, 2 * d_model + hix * hd:2 * d_model + (hix + 1) * hd
                    ].reshape(B, S, hd).astype(bf16)
            s = jnp.einsum("bqe,bke->bqk", q, k,
                           preferred_element_type=f32) * scale + mask  # (B,S,S)
            s = s - jnp.max(s, axis=-1, keepdims=True)
            p = jnp.exp(s)
            p = p / jnp.sum(p, axis=-1, keepdims=True)                 # exact division
            c = jnp.einsum("bqk,bke->bqe", p.astype(bf16), v,
                           preferred_element_type=f32)                 # (B,S,hd)
            ctx_heads.append(c.reshape(BS, hd))
        ctx = jnp.concatenate(ctx_heads, axis=-1).astype(bf16)         # (B*S, D)

        # single fused output projection: (B*S, D) @ (D, D)
        attn_out = jnp.dot(ctx, w_l[:, 3 * d_model:],
                           preferred_element_type=f32) + bo            # (B*S, D)

        # residual + LayerNorm1
        y = _layernorm(x + attn_out, ln1g, ln1b)

        # FFN: Linear(D, 2048) -> ReLU -> Linear(2048, D), bf16 MXU / f32 acc
        ff = jnp.dot(y.astype(bf16), w1_ref[l],
                     preferred_element_type=f32) + b1_ref[l:l + 1, :]  # (B*S, FF)
        ff = jnp.maximum(ff, 0.0)
        down = jnp.dot(ff.astype(bf16),
                       w2_ref[:, l * d_model:(l + 1) * d_model],
                       preferred_element_type=f32) + b2                # (B*S, D)

        # residual + LayerNorm2
        x = _layernorm(y + down, ln2g, ln2b)

    # ---- self.linear: Linear(D, D/2) -> ReLU -> Linear(D/2, 1), [:, :, 0]
    #      then self.linear2 per batch row: Linear(iw, mid) -> ReLU -> Linear(mid, ow)
    t = jnp.dot(x, P("lin_w1T"), preferred_element_type=f32) + P("lin_b1")
    t = jnp.maximum(t, 0.0)                                            # (B*S, D/2)
    for b in range(B):
        t_b = t[b * S:(b + 1) * S]                                     # (S, D/2)
        # per-token scalars produced lane-dense as a (1, S) row
        row = jnp.einsum("oh,sh->os", P("lin_w2"), t_b,
                         preferred_element_type=f32) + P("lin_b2")     # (1, S)
        m = jnp.dot(row, P("lin2_w1T"), preferred_element_type=f32) + P("lin2_b1")
        m = jnp.maximum(m, 0.0)
        o_ref[b:b + 1, :] = (jnp.dot(m, P("lin2_w2T"),
                                     preferred_element_type=f32) + P("lin2_b2"))


# ----------------------------------------------------------------------------
# wrapper
# ----------------------------------------------------------------------------
def build_forward(iw, ow, d_model, nhead, nlayers):
    offs, _, _ = _small_layout(iw, ow, d_model)
    vmem = pl.BlockSpec(memory_space=pltpu.MemorySpace.VMEM)

    def forward(src, srcmask, params):
        """src: (B, iw, 5) f32, srcmask: (iw, iw) f32 -> (B, ow) f32."""
        B, S, F = src.shape
        kernel = functools.partial(
            fused_forward_kernel,
            B=B, S=S, d_model=d_model, nhead=nhead, nlayers=nlayers, offs=offs)
        return pl.pallas_call(
            kernel,
            out_shape=jax.ShapeDtypeStruct((B, ow), jnp.float32),
            in_specs=[vmem] * 9,
            out_specs=vmem,
        )(src.reshape(B * S, F), srcmask,
          params["small"], params["wqo"], params["bqkv"], params["pvec"],
          params["w1"], params["b1"], params["w2p"])

    return forward


# ----------------------------------------------------------------------------
# Parameter construction (deterministic, synthetic).  Transformer matmul
# weights are stored bf16 in lane-dense packed slabs; biases / LN params f32.
# ----------------------------------------------------------------------------
def init_params(key, iw, ow, d_model, nhead, nlayers, dim_ff=2048):
    f32, bf16 = jnp.float32, jnp.bfloat16
    offs, rows, cols = _small_layout(iw, ow, d_model)
    mid = (iw + ow) // 2

    def nrm(k, shape, scale=0.1):
        return scale * jax.random.normal(k, shape, dtype=f32)

    keys = iter(jax.random.split(key, 32))
    p = {}

    # --- small f32 slab: input encoder, per-token head, linear2 ---
    small = jnp.zeros((rows, cols), f32)

    def put(slab, name, arr):
        r, nr, nc = offs[name]
        return slab.at[r:r + nr, 0:nc].set(arr)

    small = put(small, "enc_w1T", nrm(next(keys), (5, d_model // 2)))
    small = put(small, "enc_b1", nrm(next(keys), (1, d_model // 2)))
    small = put(small, "enc_w2T", nrm(next(keys), (d_model // 2, d_model)))
    small = put(small, "enc_b2", nrm(next(keys), (1, d_model)))
    small = put(small, "lin_w1T", nrm(next(keys), (d_model, d_model // 2)))
    small = put(small, "lin_b1", nrm(next(keys), (1, d_model // 2)))
    small = put(small, "lin_w2", nrm(next(keys), (1, d_model // 2)))
    small = put(small, "lin_b2", nrm(next(keys), (1, 1)))
    small = put(small, "lin2_w1T", nrm(next(keys), (iw, mid)))
    small = put(small, "lin2_b1", nrm(next(keys), (1, mid)))
    small = put(small, "lin2_w2T", nrm(next(keys), (mid, ow)))
    small = put(small, "lin2_b2", nrm(next(keys), (1, ow)))
    p["small"] = small

    # --- transformer layers ---
    # PyTorch layout: in_proj_weight (3D, D), in_proj_bias (3D,), out_proj.weight (D, D).
    wqkvT = nrm(next(keys), (nlayers, d_model, 3 * d_model))   # = in_proj_weight.T
    woT = nrm(next(keys), (nlayers, d_model, d_model))         # = out_proj.weight.T
    # Packed lane-dense: lanes [0:3D] = QKV proj, [3D:4D] = out proj (4D == 128).
    p["wqo"] = jnp.concatenate([wqkvT, woT], axis=-1).astype(bf16)   # (L, D, 4D)
    p["bqkv"] = nrm(next(keys), (nlayers, 1, 3 * d_model))           # in_proj_bias

    bo = nrm(next(keys), (nlayers, 1, d_model))
    ln1g = jnp.ones((nlayers, 1, d_model), f32)
    ln1b = jnp.zeros((nlayers, 1, d_model), f32)
    b2 = nrm(next(keys), (nlayers, 1, d_model), scale=0.02)
    ln2g = jnp.ones((nlayers, 1, d_model), f32)
    ln2b = jnp.zeros((nlayers, 1, d_model), f32)
    # one stacked (L, 6, D) slab of all per-layer 1-row params
    p["pvec"] = jnp.concatenate([bo, ln1g, ln1b, b2, ln2g, ln2b], axis=1)

    p["w1"] = nrm(next(keys), (nlayers, d_model, dim_ff), scale=0.02).astype(bf16)
    p["b1"] = nrm(next(keys), (nlayers, dim_ff), scale=0.02)
    w2T = nrm(next(keys), (nlayers, dim_ff, d_model), scale=0.02)
    # down-proj weights packed along lanes: (dim_ff, nlayers*D), halves lane-pad DMA
    p["w2p"] = jnp.concatenate([w2T[l] for l in range(nlayers)],
                               axis=-1).astype(bf16)
    return p


if __name__ == "__main__":
    # Small deterministic config consistent with the module.
    iw, ow = 8, 4
    d_model, nhead, nlayers = 32, 4, 2
    batch = 2

    key = jax.random.PRNGKey(0)
    k_src, k_par = jax.random.split(key)

    src = jax.random.normal(k_src, (batch, iw, 5), dtype=jnp.float32)
    srcmask = generate_square_subsequent_mask(iw)
    params = init_params(k_par, iw, ow, d_model, nhead, nlayers)

    fwd = jax.jit(build_forward(iw, ow, d_model, nhead, nlayers))
    out = jax.block_until_ready(fwd(src, srcmask, params))

    assert out.shape == (batch, ow), out.shape
    assert bool(jnp.all(jnp.isfinite(out)))
    print("KERNEL_OK")
</pallas_src>

<mosaic_0001>
module attributes {stable_mosaic.version = 11 : i64} {
  func.func @fused_forward_kernel(%arg0: memref<16x5xf32, #tpu.memory_space<vmem>>, %arg1: memref<8x8xf32, #tpu.memory_space<vmem>>, %arg2: memref<74x32xf32, #tpu.memory_space<vmem>>, %arg3: memref<2x32x128xbf16, #tpu.memory_space<vmem>>, %arg4: memref<2x1x96xf32, #tpu.memory_space<vmem>>, %arg5: memref<2x6x32xf32, #tpu.memory_space<vmem>>, %arg6: memref<2x32x2048xbf16, #tpu.memory_space<vmem>>, %arg7: memref<2x2048xf32, #tpu.memory_space<vmem>>, %arg8: memref<2048x64xbf16, #tpu.memory_space<vmem>>, %arg9: memref<2x4xf32, #tpu.memory_space<vmem>>) attributes {dimension_semantics = [], scalar_prefetch = 0 : i64, scratch_operands = 0 : i64, tpu.core_type = #tpu.core_type<tc>} {
    %c0 = arith.constant 0 : index
    %c0_0 = arith.constant 0 : index
    %0 = vector.load %arg0[%c0, %c0_0] : memref<16x5xf32, #tpu.memory_space<vmem>>, vector<16x5xf32>
    %c0_1 = arith.constant 0 : index
    %c0_2 = arith.constant 0 : index
    %1 = vector.load %arg2[%c0_1, %c0_2] : memref<74x32xf32, #tpu.memory_space<vmem>>, vector<5x16xf32>
    %cst = arith.constant dense<0.000000e+00> : vector<16x16xf32>
    %2 = tpu.matmul %0, %1, %cst {dimension_numbers = #tpu.dot_dimension_numbers<[1], [0], [0], [1], [0, 0, 1, 1], [], []>} : vector<16x5xf32>, vector<5x16xf32>, vector<16x16xf32> -> vector<16x16xf32>
    %c5 = arith.constant 5 : index
    %c0_3 = arith.constant 0 : index
    %3 = vector.load %arg2[%c5, %c0_3] : memref<74x32xf32, #tpu.memory_space<vmem>>, vector<1x16xf32>
    %4 = vector.broadcast %3 : vector<1x16xf32> to vector<16x16xf32>
    %5 = arith.addf %2, %4 : vector<16x16xf32>
    %cst_4 = arith.constant 0.000000e+00 : f32
    %6 = vector.broadcast %cst_4 : f32 to vector<16x16xf32>
    %7 = arith.maximumf %5, %6 : vector<16x16xf32>
    %c6 = arith.constant 6 : index
    %c0_5 = arith.constant 0 : index
    %8 = vector.load %arg2[%c6, %c0_5] : memref<74x32xf32, #tpu.memory_space<vmem>>, vector<16x32xf32>
    %cst_6 = arith.constant dense<0.000000e+00> : vector<16x32xf32>
    %9 = tpu.matmul %7, %8, %cst_6 {dimension_numbers = #tpu.dot_dimension_numbers<[1], [0], [0], [1], [0, 0, 1, 1], [], []>} : vector<16x16xf32>, vector<16x32xf32>, vector<16x32xf32> -> vector<16x32xf32>
    %c22 = arith.constant 22 : index
    %c0_7 = arith.constant 0 : index
    %10 = vector.load %arg2[%c22, %c0_7] : memref<74x32xf32, #tpu.memory_space<vmem>>, vector<1x32xf32>
    %11 = vector.broadcast %10 : vector<1x32xf32> to vector<16x32xf32>
    %12 = arith.addf %9, %11 : vector<16x32xf32>
    %c0_8 = arith.constant 0 : index
    %c0_9 = arith.constant 0 : index
    %13 = vector.load %arg1[%c0_8, %c0_9] : memref<8x8xf32, #tpu.memory_space<vmem>>, vector<8x8xf32>
    %c0_10 = arith.constant 0 : index
    %c0_11 = arith.constant 0 : index
    %c0_12 = arith.constant 0 : index
    %14 = vector.load %arg3[%c0_10, %c0_11, %c0_12] : memref<2x32x128xbf16, #tpu.memory_space<vmem>>, vector<1x32x128xbf16>
    %15 = vector.shape_cast %14 : vector<1x32x128xbf16> to vector<32x128xbf16>
    %c0_13 = arith.constant 0 : index
    %c0_14 = arith.constant 0 : index
    %c0_15 = arith.constant 0 : index
    %16 = vector.load %arg5[%c0_13, %c0_14, %c0_15] : memref<2x6x32xf32, #tpu.memory_space<vmem>>, vector<1x6x32xf32>
    %17 = vector.shape_cast %16 : vector<1x6x32xf32> to vector<6x32xf32>
    %18 = vector.extract_strided_slice %17 {offsets = [0, 0], sizes = [1, 32], strides = [1, 1]} : vector<6x32xf32> to vector<1x32xf32>
    %19 = vector.extract_strided_slice %17 {offsets = [1, 0], sizes = [1, 32], strides = [1, 1]} : vector<6x32xf32> to vector<1x32xf32>
    %20 = vector.extract_strided_slice %17 {offsets = [2, 0], sizes = [1, 32], strides = [1, 1]} : vector<6x32xf32> to vector<1x32xf32>
    %21 = vector.extract_strided_slice %17 {offsets = [3, 0], sizes = [1, 32], strides = [1, 1]} : vector<6x32xf32> to vector<1x32xf32>
    %22 = vector.extract_strided_slice %17 {offsets = [4, 0], sizes = [1, 32], strides = [1, 1]} : vector<6x32xf32> to vector<1x32xf32>
    %23 = vector.extract_strided_slice %17 {offsets = [5, 0], sizes = [1, 32], strides = [1, 1]} : vector<6x32xf32> to vector<1x32xf32>
    %24 = arith.truncf %12 : vector<16x32xf32> to vector<16x32xbf16>
    %25 = vector.extract_strided_slice %15 {offsets = [0, 0], sizes = [32, 96], strides = [1, 1]} : vector<32x128xbf16> to vector<32x96xbf16>
    %cst_16 = arith.constant dense<0.000000e+00> : vector<16x96xf32>
    %26 = tpu.matmul %24, %25, %cst_16 {dimension_numbers = #tpu.dot_dimension_numbers<[1], [0], [0], [1], [0, 0, 1, 1], [], []>} : vector<16x32xbf16>, vector<32x96xbf16>, vector<16x96xf32> -> vector<16x96xf32>
    %c0_17 = arith.constant 0 : index
    %c0_18 = arith.constant 0 : index
    %c0_19 = arith.constant 0 : index
    %27 = vector.load %arg4[%c0_17, %c0_18, %c0_19] : memref<2x1x96xf32, #tpu.memory_space<vmem>>, vector<1x1x96xf32>
    %28 = vector.shape_cast %27 : vector<1x1x96xf32> to vector<1x96xf32>
    %29 = vector.broadcast %28 : vector<1x96xf32> to vector<16x96xf32>
    %30 = arith.addf %26, %29 : vector<16x96xf32>
    %31 = vector.extract_strided_slice %30 {offsets = [0, 0], sizes = [16, 8], strides = [1, 1]} : vector<16x96xf32> to vector<16x8xf32>
    %32 = vector.shape_cast %31 : vector<16x8xf32> to vector<2x8x8xf32>
    %33 = arith.truncf %32 : vector<2x8x8xf32> to vector<2x8x8xbf16>
    %34 = vector.extract_strided_slice %30 {offsets = [0, 32], sizes = [16, 8], strides = [1, 1]} : vector<16x96xf32> to vector<16x8xf32>
    %35 = vector.shape_cast %34 : vector<16x8xf32> to vector<2x8x8xf32>
    %36 = arith.truncf %35 : vector<2x8x8xf32> to vector<2x8x8xbf16>
    %37 = vector.extract_strided_slice %30 {offsets = [0, 64], sizes = [16, 8], strides = [1, 1]} : vector<16x96xf32> to vector<16x8xf32>
    %38 = vector.shape_cast %37 : vector<16x8xf32> to vector<2x8x8xf32>
    %39 = arith.truncf %38 : vector<2x8x8xf32> to vector<2x8x8xbf16>
    "tpu.trace_start"() <{level = 10 : i32, message = "bqe,bke->bqk"}> : () -> ()
    %cst_20 = arith.constant dense<0.000000e+00> : vector<2x8x8xf32>
    %40 = tpu.matmul %33, %36, %cst_20 {dimension_numbers = #tpu.dot_dimension_numbers<[2], [2], [1], [1], [0, 0, 0, 1, 1, 1], [0], [0]>} : vector<2x8x8xbf16>, vector<2x8x8xbf16>, vector<2x8x8xf32> -> vector<2x8x8xf32>
    "tpu.trace_stop"() : () -> ()
    %cst_21 = arith.constant 0.353553385 : f32
    %41 = vector.broadcast %cst_21 : f32 to vector<2x8x8xf32>
    %42 = arith.mulf %40, %41 : vector<2x8x8xf32>
    %43 = vector.shape_cast %13 : vector<8x8xf32> to vector<1x8x8xf32>
    %44 = vector.broadcast %43 : vector<1x8x8xf32> to vector<2x8x8xf32>
    %45 = arith.addf %42, %44 : vector<2x8x8xf32>
    %cst_22 = arith.constant dense<0xFF800000> : vector<2x8xf32>
    %46 = vector.multi_reduction <maximumf>, %45, %cst_22 [2] : vector<2x8x8xf32> to vector<2x8xf32>
    %47 = vector.shape_cast %46 : vector<2x8xf32> to vector<2x8x1xf32>
    %48 = vector.broadcast %47 : vector<2x8x1xf32> to vector<2x8x8xf32>
    %49 = arith.subf %45, %48 : vector<2x8x8xf32>
    %50 = math.exp %49 : vector<2x8x8xf32>
    %cst_23 = arith.constant dense<0.000000e+00> : vector<2x8xf32>
    %51 = vector.multi_reduction <add>, %50, %cst_23 [2] : vector<2x8x8xf32> to vector<2x8xf32>
    %52 = vector.shape_cast %51 : vector<2x8xf32> to vector<2x8x1xf32>
    %53 = vector.broadcast %52 : vector<2x8x1xf32> to vector<2x8x8xf32>
    %54 = arith.divf %50, %53 : vector<2x8x8xf32>
    %55 = arith.truncf %54 : vector<2x8x8xf32> to vector<2x8x8xbf16>
    "tpu.trace_start"() <{level = 10 : i32, message = "bqk,bke->bqe"}> : () -> ()
    %cst_24 = arith.constant dense<0.000000e+00> : vector<2x8x8xf32>
    %56 = tpu.matmul %55, %39, %cst_24 {dimension_numbers = #tpu.dot_dimension_numbers<[2], [1], [1], [2], [0, 0, 0, 1, 1, 2], [0], [0]>} : vector<2x8x8xbf16>, vector<2x8x8xbf16>, vector<2x8x8xf32> -> vector<2x8x8xf32>
    "tpu.trace_stop"() : () -> ()
    %57 = vector.shape_cast %56 : vector<2x8x8xf32> to vector<16x8xf32>
    %58 = vector.extract_strided_slice %30 {offsets = [0, 8], sizes = [16, 8], strides = [1, 1]} : vector<16x96xf32> to vector<16x8xf32>
    %59 = vector.shape_cast %58 : vector<16x8xf32> to vector<2x8x8xf32>
    %60 = arith.truncf %59 : vector<2x8x8xf32> to vector<2x8x8xbf16>
    %61 = vector.extract_strided_slice %30 {offsets = [0, 40], sizes = [16, 8], strides = [1, 1]} : vector<16x96xf32> to vector<16x8xf32>
    %62 = vector.shape_cast %61 : vector<16x8xf32> to vector<2x8x8xf32>
    %63 = arith.truncf %62 : vector<2x8x8xf32> to vector<2x8x8xbf16>
    %64 = vector.extract_strided_slice %30 {offsets = [0, 72], sizes = [16, 8], strides = [1, 1]} : vector<16x96xf32> to vector<16x8xf32>
    %65 = vector.shape_cast %64 : vector<16x8xf32> to vector<2x8x8xf32>
    %66 = arith.truncf %65 : vector<2x8x8xf32> to vector<2x8x8xbf16>
    "tpu.trace_start"() <{level = 10 : i32, message = "bqe,bke->bqk"}> : () -> ()
    %cst_25 = arith.constant dense<0.000000e+00> : vector<2x8x8xf32>
    %67 = tpu.matmul %60, %63, %cst_25 {dimension_numbers = #tpu.dot_dimension_numbers<[2], [2], [1], [1], [0, 0, 0, 1, 1, 1], [0], [0]>} : vector<2x8x8xbf16>, vector<2x8x8xbf16>, vector<2x8x8xf32> -> vector<2x8x8xf32>
    "tpu.trace_stop"() : () -> ()
    %cst_26 = arith.constant 0.353553385 : f32
    %68 = vector.broadcast %cst_26 : f32 to vector<2x8x8xf32>
    %69 = arith.mulf %67, %68 : vector<2x8x8xf32>
    %70 = vector.shape_cast %13 : vector<8x8xf32> to vector<1x8x8xf32>
    %71 = vector.broadcast %70 : vector<1x8x8xf32> to vector<2x8x8xf32>
    %72 = arith.addf %69, %71 : vector<2x8x8xf32>
    %cst_27 = arith.constant dense<0xFF800000> : vector<2x8xf32>
    %73 = vector.multi_reduction <maximumf>, %72, %cst_27 [2] : vector<2x8x8xf32> to vector<2x8xf32>
    %74 = vector.shape_cast %73 : vector<2x8xf32> to vector<2x8x1xf32>
    %75 = vector.broadcast %74 : vector<2x8x1xf32> to vector<2x8x8xf32>
    %76 = arith.subf %72, %75 : vector<2x8x8xf32>
    %77 = math.exp %76 : vector<2x8x8xf32>
    %cst_28 = arith.constant dense<0.000000e+00> : vector<2x8xf32>
    %78 = vector.multi_reduction <add>, %77, %cst_28 [2] : vector<2x8x8xf32> to vector<2x8xf32>
    %79 = vector.shape_cast %78 : vector<2x8xf32> to vector<2x8x1xf32>
    %80 = vector.broadcast %79 : vector<2x8x1xf32> to vector<2x8x8xf32>
    %81 = arith.divf %77, %80 : vector<2x8x8xf32>
    %82 = arith.truncf %81 : vector<2x8x8xf32> to vector<2x8x8xbf16>
    "tpu.trace_start"() <{level = 10 : i32, message = "bqk,bke->bqe"}> : () -> ()
    %cst_29 = arith.constant dense<0.000000e+00> : vector<2x8x8xf32>
    %83 = tpu.matmul %82, %66, %cst_29 {dimension_numbers = #tpu.dot_dimension_numbers<[2], [1], [1], [2], [0, 0, 0, 1, 1, 2], [0], [0]>} : vector<2x8x8xbf16>, vector<2x8x8xbf16>, vector<2x8x8xf32> -> vector<2x8x8xf32>
    "tpu.trace_stop"() : () -> ()
    %84 = vector.shape_cast %83 : vector<2x8x8xf32> to vector<16x8xf32>
    %85 = vector.extract_strided_slice %30 {offsets = [0, 16], sizes = [16, 8], strides = [1, 1]} : vector<16x96xf32> to vector<16x8xf32>
    %86 = vector.shape_cast %85 : vector<16x8xf32> to vector<2x8x8xf32>
    %87 = arith.truncf %86 : vector<2x8x8xf32> to vector<2x8x8xbf16>
    %88 = vector.extract_strided_slice %30 {offsets = [0, 48], sizes = [16, 8], strides = [1, 1]} : vector<16x96xf32> to vector<16x8xf32>
    %89 = vector.shape_cast %88 : vector<16x8xf32> to vector<2x8x8xf32>
    %90 = arith.truncf %89 : vector<2x8x8xf32> to vector<2x8x8xbf16>
    %91 = vector.extract_strided_slice %30 {offsets = [0, 80], sizes = [16, 8], strides = [1, 1]} : vector<16x96xf32> to vector<16x8xf32>
    %92 = vector.shape_cast %91 : vector<16x8xf32> to vector<2x8x8xf32>
    %93 = arith.truncf %92 : vector<2x8x8xf32> to vector<2x8x8xbf16>
    "tpu.trace_start"() <{level = 10 : i32, message = "bqe,bke->bqk"}> : () -> ()
    %cst_30 = arith.constant dense<0.000000e+00> : vector<2x8x8xf32>
    %94 = tpu.matmul %87, %90, %cst_30 {dimension_numbers = #tpu.dot_dimension_numbers<[2], [2], [1], [1], [0, 0, 0, 1, 1, 1], [0], [0]>} : vector<2x8x8xbf16>, vector<2x8x8xbf16>, vector<2x8x8xf32> -> vector<2x8x8xf32>
    "tpu.trace_stop"() : () -> ()
    %cst_31 = arith.constant 0.353553385 : f32
    %95 = vector.broadcast %cst_31 : f32 to vector<2x8x8xf32>
    %96 = arith.mulf %94, %95 : vector<2x8x8xf32>
    %97 = vector.shape_cast %13 : vector<8x8xf32> to vector<1x8x8xf32>
    %98 = vector.broadcast %97 : vector<1x8x8xf32> to vector<2x8x8xf32>
    %99 = arith.addf %96, %98 : vector<2x8x8xf32>
    %cst_32 = arith.constant dense<0xFF800000> : vector<2x8xf32>
    %100 = vector.multi_reduction <maximumf>, %99, %cst_32 [2] : vector<2x8x8xf32> to vector<2x8xf32>
    %101 = vector.shape_cast %100 : vector<2x8xf32> to vector<2x8x1xf32>
    %102 = vector.broadcast %101 : vector<2x8x1xf32> to vector<2x8x8xf32>
    %103 = arith.subf %99, %102 : vector<2x8x8xf32>
    %104 = math.exp %103 : vector<2x8x8xf32>
    %cst_33 = arith.constant dense<0.000000e+00> : vector<2x8xf32>
    %105 = vector.multi_reduction <add>, %104, %cst_33 [2] : vector<2x8x8xf32> to vector<2x8xf32>
    %106 = vector.shape_cast %105 : vector<2x8xf32> to vector<2x8x1xf32>
    %107 = vector.broadcast %106 : vector<2x8x1xf32> to vector<2x8x8xf32>
    %108 = arith.divf %104, %107 : vector<2x8x8xf32>
    %109 = arith.truncf %108 : vector<2x8x8xf32> to vector<2x8x8xbf16>
    "tpu.trace_start"() <{level = 10 : i32, message = "bqk,bke->bqe"}> : () -> ()
    %cst_34 = arith.constant dense<0.000000e+00> : vector<2x8x8xf32>
    %110 = tpu.matmul %109, %93, %cst_34 {dimension_numbers = #tpu.dot_dimension_numbers<[2], [1], [1], [2], [0, 0, 0, 1, 1, 2], [0], [0]>} : vector<2x8x8xbf16>, vector<2x8x8xbf16>, vector<2x8x8xf32> -> vector<2x8x8xf32>
    "tpu.trace_stop"() : () -> ()
    %111 = vector.shape_cast %110 : vector<2x8x8xf32> to vector<16x8xf32>
    %112 = vector.extract_strided_slice %30 {offsets = [0, 24], sizes = [16, 8], strides = [1, 1]} : vector<16x96xf32> to vector<16x8xf32>
    %113 = vector.shape_cast %112 : vector<16x8xf32> to vector<2x8x8xf32>
    %114 = arith.truncf %113 : vector<2x8x8xf32> to vector<2x8x8xbf16>
    %115 = vector.extract_strided_slice %30 {offsets = [0, 56], sizes = [16, 8], strides = [1, 1]} : vector<16x96xf32> to vector<16x8xf32>
    %116 = vector.shape_cast %115 : vector<16x8xf32> to vector<2x8x8xf32>
    %117 = arith.truncf %116 : vector<2x8x8xf32> to vector<2x8x8xbf16>
    %118 = vector.extract_strided_slice %30 {offsets = [0, 88], sizes = [16, 8], strides = [1, 1]} : vector<16x96xf32> to vector<16x8xf32>
    %119 = vector.shape_cast %118 : vector<16x8xf32> to vector<2x8x8xf32>
    %120 = arith.truncf %119 : vector<2x8x8xf32> to vector<2x8x8xbf16>
    "tpu.trace_start"() <{level = 10 : i32, message = "bqe,bke->bqk"}> : () -> ()
    %cst_35 = arith.constant dense<0.000000e+00> : vector<2x8x8xf32>
    %121 = tpu.matmul %114, %117, %cst_35 {dimension_numbers = #tpu.dot_dimension_numbers<[2], [2], [1], [1], [0, 0, 0, 1, 1, 1], [0], [0]>} : vector<2x8x8xbf16>, vector<2x8x8xbf16>, vector<2x8x8xf32> -> vector<2x8x8xf32>
    "tpu.trace_stop"() : () -> ()
    %cst_36 = arith.constant 0.353553385 : f32
    %122 = vector.broadcast %cst_36 : f32 to vector<2x8x8xf32>
    %123 = arith.mulf %121, %122 : vector<2x8x8xf32>
    %124 = vector.shape_cast %13 : vector<8x8xf32> to vector<1x8x8xf32>
    %125 = vector.broadcast %124 : vector<1x8x8xf32> to vector<2x8x8xf32>
    %126 = arith.addf %123, %125 : vector<2x8x8xf32>
    %cst_37 = arith.constant dense<0xFF800000> : vector<2x8xf32>
    %127 = vector.multi_reduction <maximumf>, %126, %cst_37 [2] : vector<2x8x8xf32> to vector<2x8xf32>
    %128 = vector.shape_cast %127 : vector<2x8xf32> to vector<2x8x1xf32>
    %129 = vector.broadcast %128 : vector<2x8x1xf32> to vector<2x8x8xf32>
    %130 = arith.subf %126, %129 : vector<2x8x8xf32>
    %131 = math.exp %130 : vector<2x8x8xf32>
    %cst_38 = arith.constant dense<0.000000e+00> : vector<2x8xf32>
    %132 = vector.multi_reduction <add>, %131, %cst_38 [2] : vector<2x8x8xf32> to vector<2x8xf32>
    %133 = vector.shape_cast %132 : vector<2x8xf32> to vector<2x8x1xf32>
    %134 = vector.broadcast %133 : vector<2x8x1xf32> to vector<2x8x8xf32>
    %135 = arith.divf %131, %134 : vector<2x8x8xf32>
    %136 = arith.truncf %135 : vector<2x8x8xf32> to vector<2x8x8xbf16>
    "tpu.trace_start"() <{level = 10 : i32, message = "bqk,bke->bqe"}> : () -> ()
    %cst_39 = arith.constant dense<0.000000e+00> : vector<2x8x8xf32>
    %137 = tpu.matmul %136, %120, %cst_39 {dimension_numbers = #tpu.dot_dimension_numbers<[2], [1], [1], [2], [0, 0, 0, 1, 1, 2], [0], [0]>} : vector<2x8x8xbf16>, vector<2x8x8xbf16>, vector<2x8x8xf32> -> vector<2x8x8xf32>
    "tpu.trace_stop"() : () -> ()
    %138 = vector.shape_cast %137 : vector<2x8x8xf32> to vector<16x8xf32>
    %139 = tpu.concatenate %57, %84, %111, %138 in 1 : vector<16x8xf32>, vector<16x8xf32>, vector<16x8xf32>, vector<16x8xf32> -> vector<16x32xf32>
    %140 = arith.truncf %139 : vector<16x32xf32> to vector<16x32xbf16>
    %141 = vector.extract_strided_slice %15 {offsets = [0, 96], sizes = [32, 32], strides = [1, 1]} : vector<32x128xbf16> to vector<32x32xbf16>
    %cst_40 = arith.constant dense<0.000000e+00> : vector<16x32xf32>
    %142 = tpu.matmul %140, %141, %cst_40 {dimension_numbers = #tpu.dot_dimension_numbers<[1], [0], [0], [1], [0, 0, 1, 1], [], []>} : vector<16x32xbf16>, vector<32x32xbf16>, vector<16x32xf32> -> vector<16x32xf32>
    %143 = vector.broadcast %18 : vector<1x32xf32> to vector<16x32xf32>
    %144 = arith.addf %142, %143 : vector<16x32xf32>
    %145 = arith.addf %12, %144 : vector<16x32xf32>
    %cst_41 = arith.constant dense<0.000000e+00> : vector<16xf32>
    %146 = vector.multi_reduction <add>, %145, %cst_41 [1] : vector<16x32xf32> to vector<16xf32>
    %147 = vector.shape_cast %146 : vector<16xf32> to vector<16x1xf32>
    %cst_42 = arith.constant 3.200000e+01 : f32
    %148 = vector.broadcast %cst_42 : f32 to vector<16x1xf32>
    %149 = arith.divf %147, %148 : vector<16x1xf32>
    %150 = vector.broadcast %149 : vector<16x1xf32> to vector<16x32xf32>
    %151 = arith.subf %145, %150 : vector<16x32xf32>
    %152 = arith.mulf %151, %151 : vector<16x32xf32>
    %cst_43 = arith.constant dense<0.000000e+00> : vector<16xf32>
    %153 = vector.multi_reduction <add>, %152, %cst_43 [1] : vector<16x32xf32> to vector<16xf32>
    %154 = vector.shape_cast %153 : vector<16xf32> to vector<16x1xf32>
    %cst_44 = arith.constant 3.200000e+01 : f32
    %155 = vector.broadcast %cst_44 : f32 to vector<16x1xf32>
    %156 = arith.divf %154, %155 : vector<16x1xf32>
    %157 = vector.broadcast %149 : vector<16x1xf32> to vector<16x32xf32>
    %158 = arith.subf %145, %157 : vector<16x32xf32>
    %cst_45 = arith.constant 9.99999974E-6 : f32
    %159 = vector.broadcast %cst_45 : f32 to vector<16x1xf32>
    %160 = arith.addf %156, %159 : vector<16x1xf32>
    %161 = math.rsqrt %160 : vector<16x1xf32>
    %162 = vector.broadcast %161 : vector<16x1xf32> to vector<16x32xf32>
    %163 = arith.mulf %158, %162 : vector<16x32xf32>
    %164 = vector.broadcast %19 : vector<1x32xf32> to vector<16x32xf32>
    %165 = arith.mulf %163, %164 : vector<16x32xf32>
    %166 = vector.broadcast %20 : vector<1x32xf32> to vector<16x32xf32>
    %167 = arith.addf %165, %166 : vector<16x32xf32>
    %168 = arith.truncf %167 : vector<16x32xf32> to vector<16x32xbf16>
    %c0_46 = arith.constant 0 : index
    %c0_47 = arith.constant 0 : index
    %c0_48 = arith.constant 0 : index
    %169 = vector.load %arg6[%c0_46, %c0_47, %c0_48] : memref<2x32x2048xbf16, #tpu.memory_space<vmem>>, vector<1x32x2048xbf16>
    %170 = vector.shape_cast %169 : vector<1x32x2048xbf16> to vector<32x2048xbf16>
    %cst_49 = arith.constant dense<0.000000e+00> : vector<16x2048xf32>
    %171 = tpu.matmul %168, %170, %cst_49 {dimension_numbers = #tpu.dot_dimension_numbers<[1], [0], [0], [1], [0, 0, 1, 1], [], []>} : vector<16x32xbf16>, vector<32x2048xbf16>, vector<16x2048xf32> -> vector<16x2048xf32>
    %c0_50 = arith.constant 0 : index
    %c0_51 = arith.constant 0 : index
    %172 = vector.load %arg7[%c0_50, %c0_51] : memref<2x2048xf32, #tpu.memory_space<vmem>>, vector<1x2048xf32>
    %173 = vector.broadcast %172 : vector<1x2048xf32> to vector<16x2048xf32>
    %174 = arith.addf %171, %173 : vector<16x2048xf32>
    %cst_52 = arith.constant 0.000000e+00 : f32
    %175 = vector.broadcast %cst_52 : f32 to vector<16x2048xf32>
    %176 = arith.maximumf %174, %175 : vector<16x2048xf32>
    %177 = arith.truncf %176 : vector<16x2048xf32> to vector<16x2048xbf16>
    %c0_53 = arith.constant 0 : index
    %c0_54 = arith.constant 0 : index
    %178 = vector.load %arg8[%c0_53, %c0_54] : memref<2048x64xbf16, #tpu.memory_space<vmem>>, vector<2048x32xbf16>
    %cst_55 = arith.constant dense<0.000000e+00> : vector<16x32xf32>
    %179 = tpu.matmul %177, %178, %cst_55 {dimension_numbers = #tpu.dot_dimension_numbers<[1], [0], [0], [1], [0, 0, 1, 1], [], []>} : vector<16x2048xbf16>, vector<2048x32xbf16>, vector<16x32xf32> -> vector<16x32xf32>
    %180 = vector.broadcast %21 : vector<1x32xf32> to vector<16x32xf32>
    %181 = arith.addf %179, %180 : vector<16x32xf32>
    %182 = arith.addf %167, %181 : vector<16x32xf32>
    %cst_56 = arith.constant dense<0.000000e+00> : vector<16xf32>
    %183 = vector.multi_reduction <add>, %182, %cst_56 [1] : vector<16x32xf32> to vector<16xf32>
    %184 = vector.shape_cast %183 : vector<16xf32> to vector<16x1xf32>
    %cst_57 = arith.constant 3.200000e+01 : f32
    %185 = vector.broadcast %cst_57 : f32 to vector<16x1xf32>
    %186 = arith.divf %184, %185 : vector<16x1xf32>
    %187 = vector.broadcast %186 : vector<16x1xf32> to vector<16x32xf32>
    %188 = arith.subf %182, %187 : vector<16x32xf32>
    %189 = arith.mulf %188, %188 : vector<16x32xf32>
    %cst_58 = arith.constant dense<0.000000e+00> : vector<16xf32>
    %190 = vector.multi_reduction <add>, %189, %cst_58 [1] : vector<16x32xf32> to vector<16xf32>
    %191 = vector.shape_cast %190 : vector<16xf32> to vector<16x1xf32>
    %cst_59 = arith.constant 3.200000e+01 : f32
    %192 = vector.broadcast %cst_59 : f32 to vector<16x1xf32>
    %193 = arith.divf %191, %192 : vector<16x1xf32>
    %194 = vector.broadcast %186 : vector<16x1xf32> to vector<16x32xf32>
    %195 = arith.subf %182, %194 : vector<16x32xf32>
    %cst_60 = arith.constant 9.99999974E-6 : f32
    %196 = vector.broadcast %cst_60 : f32 to vector<16x1xf32>
    %197 = arith.addf %193, %196 : vector<16x1xf32>
    %198 = math.rsqrt %197 : vector<16x1xf32>
    %199 = vector.broadcast %198 : vector<16x1xf32> to vector<16x32xf32>
    %200 = arith.mulf %195, %199 : vector<16x32xf32>
    %201 = vector.broadcast %22 : vector<1x32xf32> to vector<16x32xf32>
    %202 = arith.mulf %200, %201 : vector<16x32xf32>
    %203 = vector.broadcast %23 : vector<1x32xf32> to vector<16x32xf32>
    %204 = arith.addf %202, %203 : vector<16x32xf32>
    %c1 = arith.constant 1 : index
    %c0_61 = arith.constant 0 : index
    %c0_62 = arith.constant 0 : index
    %205 = vector.load %arg3[%c1, %c0_61, %c0_62] : memref<2x32x128xbf16, #tpu.memory_space<vmem>>, vector<1x32x128xbf16>
    %206 = vector.shape_cast %205 : vector<1x32x128xbf16> to vector<32x128xbf16>
    %c1_63 = arith.constant 1 : index
    %c0_64 = arith.constant 0 : index
    %c0_65 = arith.constant 0 : index
    %207 = vector.load %arg5[%c1_63, %c0_64, %c0_65] : memref<2x6x32xf32, #tpu.memory_space<vmem>>, vector<1x6x32xf32>
    %208 = vector.shape_cast %207 : vector<1x6x32xf32> to vector<6x32xf32>
    %209 = vector.extract_strided_slice %208 {offsets = [0, 0], sizes = [1, 32], strides = [1, 1]} : vector<6x32xf32> to vector<1x32xf32>
    %210 = vector.extract_strided_slice %208 {offsets = [1, 0], sizes = [1, 32], strides = [1, 1]} : vector<6x32xf32> to vector<1x32xf32>
    %211 = vector.extract_strided_slice %208 {offsets = [2, 0], sizes = [1, 32], strides = [1, 1]} : vector<6x32xf32> to vector<1x32xf32>
    %212 = vector.extract_strided_slice %208 {offsets = [3, 0], sizes = [1, 32], strides = [1, 1]} : vector<6x32xf32> to vector<1x32xf32>
    %213 = vector.extract_strided_slice %208 {offsets = [4, 0], sizes = [1, 32], strides = [1, 1]} : vector<6x32xf32> to vector<1x32xf32>
    %214 = vector.extract_strided_slice %208 {offsets = [5, 0], sizes = [1, 32], strides = [1, 1]} : vector<6x32xf32> to vector<1x32xf32>
    %215 = arith.truncf %204 : vector<16x32xf32> to vector<16x32xbf16>
    %216 = vector.extract_strided_slice %206 {offsets = [0, 0], sizes = [32, 96], strides = [1, 1]} : vector<32x128xbf16> to vector<32x96xbf16>
    %cst_66 = arith.constant dense<0.000000e+00> : vector<16x96xf32>
    %217 = tpu.matmul %215, %216, %cst_66 {dimension_numbers = #tpu.dot_dimension_numbers<[1], [0], [0], [1], [0, 0, 1, 1], [], []>} : vector<16x32xbf16>, vector<32x96xbf16>, vector<16x96xf32> -> vector<16x96xf32>
    %c1_67 = arith.constant 1 : index
    %c0_68 = arith.constant 0 : index
    %c0_69 = arith.constant 0 : index
    %218 = vector.load %arg4[%c1_67, %c0_68, %c0_69] : memref<2x1x96xf32, #tpu.memory_space<vmem>>, vector<1x1x96xf32>
    %219 = vector.shape_cast %218 : vector<1x1x96xf32> to vector<1x96xf32>
    %220 = vector.broadcast %219 : vector<1x96xf32> to vector<16x96xf32>
    %221 = arith.addf %217, %220 : vector<16x96xf32>
    %222 = vector.extract_strided_slice %221 {offsets = [0, 0], sizes = [16, 8], strides = [1, 1]} : vector<16x96xf32> to vector<16x8xf32>
    %223 = vector.shape_cast %222 : vector<16x8xf32> to vector<2x8x8xf32>
    %224 = arith.truncf %223 : vector<2x8x8xf32> to vector<2x8x8xbf16>
    %225 = vector.extract_strided_slice %221 {offsets = [0, 32], sizes = [16, 8], strides = [1, 1]} : vector<16x96xf32> to vector<16x8xf32>
    %226 = vector.shape_cast %225 : vector<16x8xf32> to vector<2x8x8xf32>
    %227 = arith.truncf %226 : vector<2x8x8xf32> to vector<2x8x8xbf16>
    %228 = vector.extract_strided_slice %221 {offsets = [0, 64], sizes = [16, 8], strides = [1, 1]} : vector<16x96xf32> to vector<16x8xf32>
    %229 = vector.shape_cast %228 : vector<16x8xf32> to vector<2x8x8xf32>
    %230 = arith.truncf %229 : vector<2x8x8xf32> to vector<2x8x8xbf16>
    "tpu.trace_start"() <{level = 10 : i32, message = "bqe,bke->bqk"}> : () -> ()
    %cst_70 = arith.constant dense<0.000000e+00> : vector<2x8x8xf32>
    %231 = tpu.matmul %224, %227, %cst_70 {dimension_numbers = #tpu.dot_dimension_numbers<[2], [2], [1], [1], [0, 0, 0, 1, 1, 1], [0], [0]>} : vector<2x8x8xbf16>, vector<2x8x8xbf16>, vector<2x8x8xf32> -> vector<2x8x8xf32>
    "tpu.trace_stop"() : () -> ()
    %cst_71 = arith.constant 0.353553385 : f32
    %232 = vector.broadcast %cst_71 : f32 to vector<2x8x8xf32>
    %233 = arith.mulf %231, %232 : vector<2x8x8xf32>
    %234 = vector.shape_cast %13 : vector<8x8xf32> to vector<1x8x8xf32>
    %235 = vector.broadcast %234 : vector<1x8x8xf32> to vector<2x8x8xf32>
    %236 = arith.addf %233, %235 : vector<2x8x8xf32>
    %cst_72 = arith.constant dense<0xFF800000> : vector<2x8xf32>
    %237 = vector.multi_reduction <maximumf>, %236, %cst_72 [2] : vector<2x8x8xf32> to vector<2x8xf32>
    %238 = vector.shape_cast %237 : vector<2x8xf32> to vector<2x8x1xf32>
    %239 = vector.broadcast %238 : vector<2x8x1xf32> to vector<2x8x8xf32>
    %240 = arith.subf %236, %239 : vector<2x8x8xf32>
    %241 = math.exp %240 : vector<2x8x8xf32>
    %cst_73 = arith.constant dense<0.000000e+00> : vector<2x8xf32>
    %242 = vector.multi_reduction <add>, %241, %cst_73 [2] : vector<2x8x8xf32> to vector<2x8xf32>
    %243 = vector.shape_cast %242 : vector<2x8xf32> to vector<2x8x1xf32>
    %244 = vector.broadcast %243 : vector<2x8x1xf32> to vector<2x8x8xf32>
    %245 = arith.divf %241, %244 : vector<2x8x8xf32>
    %246 = arith.truncf %245 : vector<2x8x8xf32> to vector<2x8x8xbf16>
    "tpu.trace_start"() <{level = 10 : i32, message = "bqk,bke->bqe"}> : () -> ()
    %cst_74 = arith.constant dense<0.000000e+00> : vector<2x8x8xf32>
    %247 = tpu.matmul %246, %230, %cst_74 {dimension_numbers = #tpu.dot_dimension_numbers<[2], [1], [1], [2], [0, 0, 0, 1, 1, 2], [0], [0]>} : vector<2x8x8xbf16>, vector<2x8x8xbf16>, vector<2x8x8xf32> -> vector<2x8x8xf32>
    "tpu.trace_stop"() : () -> ()
    %248 = vector.shape_cast %247 : vector<2x8x8xf32> to vector<16x8xf32>
    %249 = vector.extract_strided_slice %221 {offsets = [0, 8], sizes = [16, 8], strides = [1, 1]} : vector<16x96xf32> to vector<16x8xf32>
    %250 = vector.shape_cast %249 : vector<16x8xf32> to vector<2x8x8xf32>
    %251 = arith.truncf %250 : vector<2x8x8xf32> to vector<2x8x8xbf16>
    %252 = vector.extract_strided_slice %221 {offsets = [0, 40], sizes = [16, 8], strides = [1, 1]} : vector<16x96xf32> to vector<16x8xf32>
    %253 = vector.shape_cast %252 : vector<16x8xf32> to vector<2x8x8xf32>
    %254 = arith.truncf %253 : vector<2x8x8xf32> to vector<2x8x8xbf16>
    %255 = vector.extract_strided_slice %221 {offsets = [0, 72], sizes = [16, 8], strides = [1, 1]} : vector<16x96xf32> to vector<16x8xf32>
    %256 = vector.shape_cast %255 : vector<16x8xf32> to vector<2x8x8xf32>
    %257 = arith.truncf %256 : vector<2x8x8xf32> to vector<2x8x8xbf16>
    "tpu.trace_start"() <{level = 10 : i32, message = "bqe,bke->bqk"}> : () -> ()
    %cst_75 = arith.constant dense<0.000000e+00> : vector<2x8x8xf32>
    %258 = tpu.matmul %251, %254, %cst_75 {dimension_numbers = #tpu.dot_dimension_numbers<[2], [2], [1], [1], [0, 0, 0, 1, 1, 1], [0], [0]>} : vector<2x8x8xbf16>, vector<2x8x8xbf16>, vector<2x8x8xf32> -> vector<2x8x8xf32>
    "tpu.trace_stop"() : () -> ()
    %cst_76 = arith.constant 0.353553385 : f32
    %259 = vector.broadcast %cst_76 : f32 to vector<2x8x8xf32>
    %260 = arith.mulf %258, %259 : vector<2x8x8xf32>
    %261 = vector.shape_cast %13 : vector<8x8xf32> to vector<1x8x8xf32>
    %262 = vector.broadcast %261 : vector<1x8x8xf32> to vector<2x8x8xf32>
    %263 = arith.addf %260, %262 : vector<2x8x8xf32>
    %cst_77 = arith.constant dense<0xFF800000> : vector<2x8xf32>
    %264 = vector.multi_reduction <maximumf>, %263, %cst_77 [2] : vector<2x8x8xf32> to vector<2x8xf32>
    %265 = vector.shape_cast %264 : vector<2x8xf32> to vector<2x8x1xf32>
    %266 = vector.broadcast %265 : vector<2x8x1xf32> to vector<2x8x8xf32>
    %267 = arith.subf %263, %266 : vector<2x8x8xf32>
    %268 = math.exp %267 : vector<2x8x8xf32>
    %cst_78 = arith.constant dense<0.000000e+00> : vector<2x8xf32>
    %269 = vector.multi_reduction <add>, %268, %cst_78 [2] : vector<2x8x8xf32> to vector<2x8xf32>
    %270 = vector.shape_cast %269 : vector<2x8xf32> to vector<2x8x1xf32>
    %271 = vector.broadcast %270 : vector<2x8x1xf32> to vector<2x8x8xf32>
    %272 = arith.divf %268, %271 : vector<2x8x8xf32>
    %273 = arith.truncf %272 : vector<2x8x8xf32> to vector<2x8x8xbf16>
    "tpu.trace_start"() <{level = 10 : i32, message = "bqk,bke->bqe"}> : () -> ()
    %cst_79 = arith.constant dense<0.000000e+00> : vector<2x8x8xf32>
    %274 = tpu.matmul %273, %257, %cst_79 {dimension_numbers = #tpu.dot_dimension_numbers<[2], [1], [1], [2], [0, 0, 0, 1, 1, 2], [0], [0]>} : vector<2x8x8xbf16>, vector<2x8x8xbf16>, vector<2x8x8xf32> -> vector<2x8x8xf32>
    "tpu.trace_stop"() : () -> ()
    %275 = vector.shape_cast %274 : vector<2x8x8xf32> to vector<16x8xf32>
    %276 = vector.extract_strided_slice %221 {offsets = [0, 16], sizes = [16, 8], strides = [1, 1]} : vector<16x96xf32> to vector<16x8xf32>
    %277 = vector.shape_cast %276 : vector<16x8xf32> to vector<2x8x8xf32>
    %278 = arith.truncf %277 : vector<2x8x8xf32> to vector<2x8x8xbf16>
    %279 = vector.extract_strided_slice %221 {offsets = [0, 48], sizes = [16, 8], strides = [1, 1]} : vector<16x96xf32> to vector<16x8xf32>
    %280 = vector.shape_cast %279 : vector<16x8xf32> to vector<2x8x8xf32>
    %281 = arith.truncf %280 : vector<2x8x8xf32> to vector<2x8x8xbf16>
    %282 = vector.extract_strided_slice %221 {offsets = [0, 80], sizes = [16, 8], strides = [1, 1]} : vector<16x96xf32> to vector<16x8xf32>
    %283 = vector.shape_cast %282 : vector<16x8xf32> to vector<2x8x8xf32>
    %284 = arith.truncf %283 : vector<2x8x8xf32> to vector<2x8x8xbf16>
    "tpu.trace_start"() <{level = 10 : i32, message = "bqe,bke->bqk"}> : () -> ()
    %cst_80 = arith.constant dense<0.000000e+00> : vector<2x8x8xf32>
    %285 = tpu.matmul %278, %281, %cst_80 {dimension_numbers = #tpu.dot_dimension_numbers<[2], [2], [1], [1], [0, 0, 0, 1, 1, 1], [0], [0]>} : vector<2x8x8xbf16>, vector<2x8x8xbf16>, vector<2x8x8xf32> -> vector<2x8x8xf32>
    "tpu.trace_stop"() : () -> ()
    %cst_81 = arith.constant 0.353553385 : f32
    %286 = vector.broadcast %cst_81 : f32 to vector<2x8x8xf32>
    %287 = arith.mulf %285, %286 : vector<2x8x8xf32>
    %288 = vector.shape_cast %13 : vector<8x8xf32> to vector<1x8x8xf32>
    %289 = vector.broadcast %288 : vector<1x8x8xf32> to vector<2x8x8xf32>
    %290 = arith.addf %287, %289 : vector<2x8x8xf32>
    %cst_82 = arith.constant dense<0xFF800000> : vector<2x8xf32>
    %291 = vector.multi_reduction <maximumf>, %290, %cst_82 [2] : vector<2x8x8xf32> to vector<2x8xf32>
    %292 = vector.shape_cast %291 : vector<2x8xf32> to vector<2x8x1xf32>
    %293 = vector.broadcast %292 : vector<2x8x1xf32> to vector<2x8x8xf32>
    %294 = arith.subf %290, %293 : vector<2x8x8xf32>
    %295 = math.exp %294 : vector<2x8x8xf32>
    %cst_83 = arith.constant dense<0.000000e+00> : vector<2x8xf32>
    %296 = vector.multi_reduction <add>, %295, %cst_83 [2] : vector<2x8x8xf32> to vector<2x8xf32>
    %297 = vector.shape_cast %296 : vector<2x8xf32> to vector<2x8x1xf32>
    %298 = vector.broadcast %297 : vector<2x8x1xf32> to vector<2x8x8xf32>
    %299 = arith.divf %295, %298 : vector<2x8x8xf32>
    %300 = arith.truncf %299 : vector<2x8x8xf32> to vector<2x8x8xbf16>
    "tpu.trace_start"() <{level = 10 : i32, message = "bqk,bke->bqe"}> : () -> ()
    %cst_84 = arith.constant dense<0.000000e+00> : vector<2x8x8xf32>
    %301 = tpu.matmul %300, %284, %cst_84 {dimension_numbers = #tpu.dot_dimension_numbers<[2], [1], [1], [2], [0, 0, 0, 1, 1, 2], [0], [0]>} : vector<2x8x8xbf16>, vector<2x8x8xbf16>, vector<2x8x8xf32> -> vector<2x8x8xf32>
    "tpu.trace_stop"() : () -> ()
    %302 = vector.shape_cast %301 : vector<2x8x8xf32> to vector<16x8xf32>
    %303 = vector.extract_strided_slice %221 {offsets = [0, 24], sizes = [16, 8], strides = [1, 1]} : vector<16x96xf32> to vector<16x8xf32>
    %304 = vector.shape_cast %303 : vector<16x8xf32> to vector<2x8x8xf32>
    %305 = arith.truncf %304 : vector<2x8x8xf32> to vector<2x8x8xbf16>
    %306 = vector.extract_strided_slice %221 {offsets = [0, 56], sizes = [16, 8], strides = [1, 1]} : vector<16x96xf32> to vector<16x8xf32>
    %307 = vector.shape_cast %306 : vector<16x8xf32> to vector<2x8x8xf32>
    %308 = arith.truncf %307 : vector<2x8x8xf32> to vector<2x8x8xbf16>
    %309 = vector.extract_strided_slice %221 {offsets = [0, 88], sizes = [16, 8], strides = [1, 1]} : vector<16x96xf32> to vector<16x8xf32>
    %310 = vector.shape_cast %309 : vector<16x8xf32> to vector<2x8x8xf32>
    %311 = arith.truncf %310 : vector<2x8x8xf32> to vector<2x8x8xbf16>
    "tpu.trace_start"() <{level = 10 : i32, message = "bqe,bke->bqk"}> : () -> ()
    %cst_85 = arith.constant dense<0.000000e+00> : vector<2x8x8xf32>
    %312 = tpu.matmul %305, %308, %cst_85 {dimension_numbers = #tpu.dot_dimension_numbers<[2], [2], [1], [1], [0, 0, 0, 1, 1, 1], [0], [0]>} : vector<2x8x8xbf16>, vector<2x8x8xbf16>, vector<2x8x8xf32> -> vector<2x8x8xf32>
    "tpu.trace_stop"() : () -> ()
    %cst_86 = arith.constant 0.353553385 : f32
    %313 = vector.broadcast %cst_86 : f32 to vector<2x8x8xf32>
    %314 = arith.mulf %312, %313 : vector<2x8x8xf32>
    %315 = vector.shape_cast %13 : vector<8x8xf32> to vector<1x8x8xf32>
    %316 = vector.broadcast %315 : vector<1x8x8xf32> to vector<2x8x8xf32>
    %317 = arith.addf %314, %316 : vector<2x8x8xf32>
    %cst_87 = arith.constant dense<0xFF800000> : vector<2x8xf32>
    %318 = vector.multi_reduction <maximumf>, %317, %cst_87 [2] : vector<2x8x8xf32> to vector<2x8xf32>
    %319 = vector.shape_cast %318 : vector<2x8xf32> to vector<2x8x1xf32>
    %320 = vector.broadcast %319 : vector<2x8x1xf32> to vector<2x8x8xf32>
    %321 = arith.subf %317, %320 : vector<2x8x8xf32>
    %322 = math.exp %321 : vector<2x8x8xf32>
    %cst_88 = arith.constant dense<0.000000e+00> : vector<2x8xf32>
    %323 = vector.multi_reduction <add>, %322, %cst_88 [2] : vector<2x8x8xf32> to vector<2x8xf32>
    %324 = vector.shape_cast %323 : vector<2x8xf32> to vector<2x8x1xf32>
    %325 = vector.broadcast %324 : vector<2x8x1xf32> to vector<2x8x8xf32>
    %326 = arith.divf %322, %325 : vector<2x8x8xf32>
    %327 = arith.truncf %326 : vector<2x8x8xf32> to vector<2x8x8xbf16>
    "tpu.trace_start"() <{level = 10 : i32, message = "bqk,bke->bqe"}> : () -> ()
    %cst_89 = arith.constant dense<0.000000e+00> : vector<2x8x8xf32>
    %328 = tpu.matmul %327, %311, %cst_89 {dimension_numbers = #tpu.dot_dimension_numbers<[2], [1], [1], [2], [0, 0, 0, 1, 1, 2], [0], [0]>} : vector<2x8x8xbf16>, vector<2x8x8xbf16>, vector<2x8x8xf32> -> vector<2x8x8xf32>
    "tpu.trace_stop"() : () -> ()
    %329 = vector.shape_cast %328 : vector<2x8x8xf32> to vector<16x8xf32>
    %330 = tpu.concatenate %248, %275, %302, %329 in 1 : vector<16x8xf32>, vector<16x8xf32>, vector<16x8xf32>, vector<16x8xf32> -> vector<16x32xf32>
    %331 = arith.truncf %330 : vector<16x32xf32> to vector<16x32xbf16>
    %332 = vector.extract_strided_slice %206 {offsets = [0, 96], sizes = [32, 32], strides = [1, 1]} : vector<32x128xbf16> to vector<32x32xbf16>
    %cst_90 = arith.constant dense<0.000000e+00> : vector<16x32xf32>
    %333 = tpu.matmul %331, %332, %cst_90 {dimension_numbers = #tpu.dot_dimension_numbers<[1], [0], [0], [1], [0, 0, 1, 1], [], []>} : vector<16x32xbf16>, vector<32x32xbf16>, vector<16x32xf32> -> vector<16x32xf32>
    %334 = vector.broadcast %209 : vector<1x32xf32> to vector<16x32xf32>
    %335 = arith.addf %333, %334 : vector<16x32xf32>
    %336 = arith.addf %204, %335 : vector<16x32xf32>
    %cst_91 = arith.constant dense<0.000000e+00> : vector<16xf32>
    %337 = vector.multi_reduction <add>, %336, %cst_91 [1] : vector<16x32xf32> to vector<16xf32>
    %338 = vector.shape_cast %337 : vector<16xf32> to vector<16x1xf32>
    %cst_92 = arith.constant 3.200000e+01 : f32
    %339 = vector.broadcast %cst_92 : f32 to vector<16x1xf32>
    %340 = arith.divf %338, %339 : vector<16x1xf32>
    %341 = vector.broadcast %340 : vector<16x1xf32> to vector<16x32xf32>
    %342 = arith.subf %336, %341 : vector<16x32xf32>
    %343 = arith.mulf %342, %342 : vector<16x32xf32>
    %cst_93 = arith.constant dense<0.000000e+00> : vector<16xf32>
    %344 = vector.multi_reduction <add>, %343, %cst_93 [1] : vector<16x32xf32> to vector<16xf32>
    %345 = vector.shape_cast %344 : vector<16xf32> to vector<16x1xf32>
    %cst_94 = arith.constant 3.200000e+01 : f32
    %346 = vector.broadcast %cst_94 : f32 to vector<16x1xf32>
    %347 = arith.divf %345, %346 : vector<16x1xf32>
    %348 = vector.broadcast %340 : vector<16x1xf32> to vector<16x32xf32>
    %349 = arith.subf %336, %348 : vector<16x32xf32>
    %cst_95 = arith.constant 9.99999974E-6 : f32
    %350 = vector.broadcast %cst_95 : f32 to vector<16x1xf32>
    %351 = arith.addf %347, %350 : vector<16x1xf32>
    %352 = math.rsqrt %351 : vector<16x1xf32>
    %353 = vector.broadcast %352 : vector<16x1xf32> to vector<16x32xf32>
    %354 = arith.mulf %349, %353 : vector<16x32xf32>
    %355 = vector.broadcast %210 : vector<1x32xf32> to vector<16x32xf32>
    %356 = arith.mulf %354, %355 : vector<16x32xf32>
    %357 = vector.broadcast %211 : vector<1x32xf32> to vector<16x32xf32>
    %358 = arith.addf %356, %357 : vector<16x32xf32>
    %359 = arith.truncf %358 : vector<16x32xf32> to vector<16x32xbf16>
    %c1_96 = arith.constant 1 : index
    %c0_97 = arith.constant 0 : index
    %c0_98 = arith.constant 0 : index
    %360 = vector.load %arg6[%c1_96, %c0_97, %c0_98] : memref<2x32x2048xbf16, #tpu.memory_space<vmem>>, vector<1x32x2048xbf16>
    %361 = vector.shape_cast %360 : vector<1x32x2048xbf16> to vector<32x2048xbf16>
    %cst_99 = arith.constant dense<0.000000e+00> : vector<16x2048xf32>
    %362 = tpu.matmul %359, %361, %cst_99 {dimension_numbers = #tpu.dot_dimension_numbers<[1], [0], [0], [1], [0, 0, 1, 1], [], []>} : vector<16x32xbf16>, vector<32x2048xbf16>, vector<16x2048xf32> -> vector<16x2048xf32>
    %c1_100 = arith.constant 1 : index
    %c0_101 = arith.constant 0 : index
    %363 = vector.load %arg7[%c1_100, %c0_101] : memref<2x2048xf32, #tpu.memory_space<vmem>>, vector<1x2048xf32>
    %364 = vector.broadcast %363 : vector<1x2048xf32> to vector<16x2048xf32>
    %365 = arith.addf %362, %364 : vector<16x2048xf32>
    %cst_102 = arith.constant 0.000000e+00 : f32
    %366 = vector.broadcast %cst_102 : f32 to vector<16x2048xf32>
    %367 = arith.maximumf %365, %366 : vector<16x2048xf32>
    %368 = arith.truncf %367 : vector<16x2048xf32> to vector<16x2048xbf16>
    %c0_103 = arith.constant 0 : index
    %c32 = arith.constant 32 : index
    %369 = vector.load %arg8[%c0_103, %c32] : memref<2048x64xbf16, #tpu.memory_space<vmem>>, vector<2048x32xbf16>
    %cst_104 = arith.constant dense<0.000000e+00> : vector<16x32xf32>
    %370 = tpu.matmul %368, %369, %cst_104 {dimension_numbers = #tpu.dot_dimension_numbers<[1], [0], [0], [1], [0, 0, 1, 1], [], []>} : vector<16x2048xbf16>, vector<2048x32xbf16>, vector<16x32xf32> -> vector<16x32xf32>
    %371 = vector.broadcast %212 : vector<1x32xf32> to vector<16x32xf32>
    %372 = arith.addf %370, %371 : vector<16x32xf32>
    %373 = arith.addf %358, %372 : vector<16x32xf32>
    %cst_105 = arith.constant dense<0.000000e+00> : vector<16xf32>
    %374 = vector.multi_reduction <add>, %373, %cst_105 [1] : vector<16x32xf32> to vector<16xf32>
    %375 = vector.shape_cast %374 : vector<16xf32> to vector<16x1xf32>
    %cst_106 = arith.constant 3.200000e+01 : f32
    %376 = vector.broadcast %cst_106 : f32 to vector<16x1xf32>
    %377 = arith.divf %375, %376 : vector<16x1xf32>
    %378 = vector.broadcast %377 : vector<16x1xf32> to vector<16x32xf32>
    %379 = arith.subf %373, %378 : vector<16x32xf32>
    %380 = arith.mulf %379, %379 : vector<16x32xf32>
    %cst_107 = arith.constant dense<0.000000e+00> : vector<16xf32>
    %381 = vector.multi_reduction <add>, %380, %cst_107 [1] : vector<16x32xf32> to vector<16xf32>
    %382 = vector.shape_cast %381 : vector<16xf32> to vector<16x1xf32>
    %cst_108 = arith.constant 3.200000e+01 : f32
    %383 = vector.broadcast %cst_108 : f32 to vector<16x1xf32>
    %384 = arith.divf %382, %383 : vector<16x1xf32>
    %385 = vector.broadcast %377 : vector<16x1xf32> to vector<16x32xf32>
    %386 = arith.subf %373, %385 : vector<16x32xf32>
    %cst_109 = arith.constant 9.99999974E-6 : f32
    %387 = vector.broadcast %cst_109 : f32 to vector<16x1xf32>
    %388 = arith.addf %384, %387 : vector<16x1xf32>
    %389 = math.rsqrt %388 : vector<16x1xf32>
    %390 = vector.broadcast %389 : vector<16x1xf32> to vector<16x32xf32>
    %391 = arith.mulf %386, %390 : vector<16x32xf32>
    %392 = vector.broadcast %213 : vector<1x32xf32> to vector<16x32xf32>
    %393 = arith.mulf %391, %392 : vector<16x32xf32>
    %394 = vector.broadcast %214 : vector<1x32xf32> to vector<16x32xf32>
    %395 = arith.addf %393, %394 : vector<16x32xf32>
    %c23 = arith.constant 23 : index
    %c0_110 = arith.constant 0 : index
    %396 = vector.load %arg2[%c23, %c0_110] : memref<74x32xf32, #tpu.memory_space<vmem>>, vector<32x16xf32>
    %cst_111 = arith.constant dense<0.000000e+00> : vector<16x16xf32>
    %397 = tpu.matmul %395, %396, %cst_111 {dimension_numbers = #tpu.dot_dimension_numbers<[1], [0], [0], [1], [0, 0, 1, 1], [], []>} : vector<16x32xf32>, vector<32x16xf32>, vector<16x16xf32> -> vector<16x16xf32>
    %c55 = arith.constant 55 : index
    %c0_112 = arith.constant 0 : index
    %398 = vector.load %arg2[%c55, %c0_112] : memref<74x32xf32, #tpu.memory_space<vmem>>, vector<1x16xf32>
    %399 = vector.broadcast %398 : vector<1x16xf32> to vector<16x16xf32>
    %400 = arith.addf %397, %399 : vector<16x16xf32>
    %cst_113 = arith.constant 0.000000e+00 : f32
    %401 = vector.broadcast %cst_113 : f32 to vector<16x16xf32>
    %402 = arith.maximumf %400, %401 : vector<16x16xf32>
    %403 = vector.extract_strided_slice %402 {offsets = [0, 0], sizes = [8, 16], strides = [1, 1]} : vector<16x16xf32> to vector<8x16xf32>
    %c56 = arith.constant 56 : index
    %c0_114 = arith.constant 0 : index
    %404 = vector.load %arg2[%c56, %c0_114] : memref<74x32xf32, #tpu.memory_space<vmem>>, vector<1x16xf32>
    "tpu.trace_start"() <{level = 10 : i32, message = "oh,sh->os"}> : () -> ()
    %cst_115 = arith.constant dense<0.000000e+00> : vector<1x8xf32>
    %405 = tpu.matmul %404, %403, %cst_115 {dimension_numbers = #tpu.dot_dimension_numbers<[1], [1], [0], [0], [0, 0, 1, 0], [], []>} : vector<1x16xf32>, vector<8x16xf32>, vector<1x8xf32> -> vector<1x8xf32>
    "tpu.trace_stop"() : () -> ()
    %c57 = arith.constant 57 : index
    %c0_116 = arith.constant 0 : index
    %406 = vector.load %arg2[%c57, %c0_116] : memref<74x32xf32, #tpu.memory_space<vmem>>, vector<1x1xf32>
    %407 = vector.broadcast %406 : vector<1x1xf32> to vector<1x8xf32>
    %408 = arith.addf %405, %407 : vector<1x8xf32>
    %c58 = arith.constant 58 : index
    %c0_117 = arith.constant 0 : index
    %409 = vector.load %arg2[%c58, %c0_117] : memref<74x32xf32, #tpu.memory_space<vmem>>, vector<8x6xf32>
    %cst_118 = arith.constant dense<0.000000e+00> : vector<1x6xf32>
    %410 = tpu.matmul %408, %409, %cst_118 {dimension_numbers = #tpu.dot_dimension_numbers<[1], [0], [0], [1], [0, 0, 1, 1], [], []>} : vector<1x8xf32>, vector<8x6xf32>, vector<1x6xf32> -> vector<1x6xf32>
    %c66 = arith.constant 66 : index
    %c0_119 = arith.constant 0 : index
    %411 = vector.load %arg2[%c66, %c0_119] : memref<74x32xf32, #tpu.memory_space<vmem>>, vector<1x6xf32>
    %412 = arith.addf %410, %411 : vector<1x6xf32>
    %cst_120 = arith.constant 0.000000e+00 : f32
    %413 = vector.broadcast %cst_120 : f32 to vector<1x6xf32>
    %414 = arith.maximumf %412, %413 : vector<1x6xf32>
    %c67 = arith.constant 67 : index
    %c0_121 = arith.constant 0 : index
    %415 = vector.load %arg2[%c67, %c0_121] : memref<74x32xf32, #tpu.memory_space<vmem>>, vector<6x4xf32>
    %cst_122 = arith.constant dense<0.000000e+00> : vector<1x4xf32>
    %416 = tpu.matmul %414, %415, %cst_122 {dimension_numbers = #tpu.dot_dimension_numbers<[1], [0], [0], [1], [0, 0, 1, 1], [], []>} : vector<1x6xf32>, vector<6x4xf32>, vector<1x4xf32> -> vector<1x4xf32>
    %c73 = arith.constant 73 : index
    %c0_123 = arith.constant 0 : index
    %417 = vector.load %arg2[%c73, %c0_123] : memref<74x32xf32, #tpu.memory_space<vmem>>, vector<1x4xf32>
    %418 = arith.addf %416, %417 : vector<1x4xf32>
    %c0_124 = arith.constant 0 : index
    %c0_125 = arith.constant 0 : index
    %419 = vector.load %arg9[%c0_124, %c0_125] : memref<2x4xf32, #tpu.memory_space<vmem>>, vector<1x4xf32>
    tpu.vector_store %arg9[%c0_124, %c0_125], %418 {strides = array<i32>} : memref<2x4xf32, #tpu.memory_space<vmem>>, vector<1x4xf32>,
    %420 = vector.extract_strided_slice %402 {offsets = [8, 0], sizes = [8, 16], strides = [1, 1]} : vector<16x16xf32> to vector<8x16xf32>
    %c56_126 = arith.constant 56 : index
    %c0_127 = arith.constant 0 : index
    %421 = vector.load %arg2[%c56_126, %c0_127] : memref<74x32xf32, #tpu.memory_space<vmem>>, vector<1x16xf32>
    "tpu.trace_start"() <{level = 10 : i32, message = "oh,sh->os"}> : () -> ()
    %cst_128 = arith.constant dense<0.000000e+00> : vector<1x8xf32>
    %422 = tpu.matmul %421, %420, %cst_128 {dimension_numbers = #tpu.dot_dimension_numbers<[1], [1], [0], [0], [0, 0, 1, 0], [], []>} : vector<1x16xf32>, vector<8x16xf32>, vector<1x8xf32> -> vector<1x8xf32>
    "tpu.trace_stop"() : () -> ()
    %c57_129 = arith.constant 57 : index
    %c0_130 = arith.constant 0 : index
    %423 = vector.load %arg2[%c57_129, %c0_130] : memref<74x32xf32, #tpu.memory_space<vmem>>, vector<1x1xf32>
    %424 = vector.broadcast %423 : vector<1x1xf32> to vector<1x8xf32>
    %425 = arith.addf %422, %424 : vector<1x8xf32>
    %c58_131 = arith.constant 58 : index
    %c0_132 = arith.constant 0 : index
    %426 = vector.load %arg2[%c58_131, %c0_132] : memref<74x32xf32, #tpu.memory_space<vmem>>, vector<8x6xf32>
    %cst_133 = arith.constant dense<0.000000e+00> : vector<1x6xf32>
    %427 = tpu.matmul %425, %426, %cst_133 {dimension_numbers = #tpu.dot_dimension_numbers<[1], [0], [0], [1], [0, 0, 1, 1], [], []>} : vector<1x8xf32>, vector<8x6xf32>, vector<1x6xf32> -> vector<1x6xf32>
    %c66_134 = arith.constant 66 : index
    %c0_135 = arith.constant 0 : index
    %428 = vector.load %arg2[%c66_134, %c0_135] : memref<74x32xf32, #tpu.memory_space<vmem>>, vector<1x6xf32>
    %429 = arith.addf %427, %428 : vector<1x6xf32>
    %cst_136 = arith.constant 0.000000e+00 : f32
    %430 = vector.broadcast %cst_136 : f32 to vector<1x6xf32>
    %431 = arith.maximumf %429, %430 : vector<1x6xf32>
    %c67_137 = arith.constant 67 : index
    %c0_138 = arith.constant 0 : index
    %432 = vector.load %arg2[%c67_137, %c0_138] : memref<74x32xf32, #tpu.memory_space<vmem>>, vector<6x4xf32>
    %cst_139 = arith.constant dense<0.000000e+00> : vector<1x4xf32>
    %433 = tpu.matmul %431, %432, %cst_139 {dimension_numbers = #tpu.dot_dimension_numbers<[1], [0], [0], [1], [0, 0, 1, 1], [], []>} : vector<1x6xf32>, vector<6x4xf32>, vector<1x4xf32> -> vector<1x4xf32>
    %c73_140 = arith.constant 73 : index
    %c0_141 = arith.constant 0 : index
    %434 = vector.load %arg2[%c73_140, %c0_141] : memref<74x32xf32, #tpu.memory_space<vmem>>, vector<1x4xf32>
    %435 = arith.addf %433, %434 : vector<1x4xf32>
    %c1_142 = arith.constant 1 : index
    %c0_143 = arith.constant 0 : index
    %436 = vector.load %arg9[%c1_142, %c0_143] : memref<2x4xf32, #tpu.memory_space<vmem>>, vector<1x4xf32>
    tpu.vector_store %arg9[%c1_142, %c0_143], %435 {strides = array<i32>} : memref<2x4xf32, #tpu.memory_space<vmem>>, vector<1x4xf32>,
    return
  }
}

</mosaic_0001>

<bundles_post_ra>
// kernel: forward.1
= control target key start
LH: loop header
LB: loop body
LE: loop exit
PB: predicated region body
PF: predicated region fallthrough
CT: control target
= control target key end

     0   :  { %vm49_vm0 = vcmask 1044480   ;;  %vm42_vm1 = vcmask 39936   ;;  %v11355_v5 = vmov 0.0   ;;  %s11342_s0 = inlined_call_operand.vmem [shape: f32[16,5], index: 0, kind: input, shape index: {}]   ;;  %s11343_s1 = inlined_call_operand.vmem [shape: f32[8,8], index: 1, kind: input, shape index: {}]   ;;  %s11344_s2 = inlined_call_operand.vmem [shape: f32[74,32], index: 2, kind: input, shape index: {}]   ;;  %s11345_s3 = inlined_call_operand.vmem [shape: bf16[2,32,128], index: 3, kind: input, shape index: {}]   ;;  %s11346_s4 = inlined_call_operand.vmem [shape: f32[2,1,96], index: 4, kind: input, shape index: {}]   ;;  %s11347_s5 = inlined_call_operand.vmem [shape: f32[2,6,32], index: 5, kind: input, shape index: {}]   ;;  %s11348_s6 = inlined_call_operand.vmem [shape: bf16[2,32,2048], index: 6, kind: input, shape index: {}]   ;;  %s11349_s7 = inlined_call_operand.vmem [shape: f32[2,2048], index: 7, kind: input, shape index: {}]   ;;  %s11350_s8 = inlined_call_operand.vmem [shape: bf16[2048,64], index: 8, kind: input, shape index: {}]   ;;  %s11351_s9 = inlined_call_operand.hbm [shape: f32[2,4], index: 9, kind: output, shape index: {}]  }
   0x1   :  { %v36_v0 = vld [vmem:[%s11344_s2] sm:$0x1f]  ;;  %v35_v2 = vld [vmem:[%s11342_s0 + $0x8] sm:$0xff] }
   0x2   :  { %v34_v1 = vld [vmem:[%s11342_s0] sm:$0xff]  ;;  %8281 = vmatprep.subr.msk.mxu0 %vm49_vm0, %v36_v0  ;;  %v131_v3 = vld [vmem:[%s11344_s2 + $0xe] sm:$0xff] }
   0x3   :  { %8283 = vmatprep.mubr.msk.f32.mxu0 %vm42_vm1, %v34_v1  ;;  %8282 = vmatpush3.msk.msra.mxu0 %vm49_vm0, %v36_v0  ;;  %v130_v4 = vld [vmem:[%s11344_s2 + $0x6] sm:$0xff] }
   0x4   :  { %8284 = vmatmul.mubr.msk.f32.vlgmr.msra.gmra.mxu0 %vm42_vm1, %v35_v2  ;;  %8286 = vmatprep.subr.mxu1 %v131_v3 }
   0x5   :  { %8287 = vmatpush3.msra.mxu1 %v131_v3  ;;  %8293 = vmatprep.subr.bf16.mxu0 %v11355_v5 }
   0x6   :  { %8288 = vmatprep.subr.mxu1 %v130_v4 }
   0x7   :  { %8289 = vmatpush3.msra.mxu1 %v130_v4 }
   0x8   :  { %8301 = vmatprep.subr.bf16.mxu1 %v11355_v5 }
   0x9   :  { %14 = vsyncpa [#allocation3], 0  ;;  %v7389_v6 = vld [vmem:[%s11344_s2 + $0x5] ss:$0 sm:$0xff]  ;;  %vm137_vm2 = vcmask 130048   ;;  %v9068_v13 = vld [vmem:[%s11345_s3 + $0x8] sm:$0xff]  }
   0xa   :  { %8294 = vmatpush3.bf16.msra.mxu0 %v9068_v13  ;;  %v9075_v14 = vld [vmem:[%s11345_s3] sm:$0xff]   ;;  %vm8975_vm3 = vmmov 0   ;;  %v7393_v16 = vld [vmem:[%s11344_s2 + $0x16] ss:$0 sm:$0xff]  ;;  %vm245_vm4 = vcmask 261120   ;;  %s8976_s28 = smov 96  }
   0xb   :  { %8295 = vmatprep.subr.bf16.mxu0 %v11355_v5  ;;  %8297 = vmatprep.mubr.msk.bf16.mxu0 %vm8975_vm3, %v11355_v5  ;;  %v7396_v21 = vld [vmem:[%s11346_s4] ss:$0 sm:$0xff]  ;;  %vm295_vm5 = vcmask 64512   ;;  %s8977_s10 = smov 64   ;;  %s8978_s11 = smov 88   ;;  %vm424_vm6 = vcmask 1043456  }
   0xc   :  { %v9121_v35 = vld [vmem:[%s11343_s1] sm:$0xff]  ;;  %s8979_s12 = smov 120   ;;  %s8980_s13 = smov 56   ;;  %vm1216_vm7 = vcmask 195584   ;;  %vm7061_vm8 = vcmask 1045504   ;;  %vm7057_vm9 = vcmask 48128  }
   0xd   :  { %s8981_s14 = smov 80   ;;  %s8982_s15 = smov 112   ;;  %vm7135_vm10 = vcmask 24576  }
   0xe   :  { %8296 = vmatpush3.bf16.msra.mxu0 %v9075_v14  ;;  %s8983_s16 = smov 48   ;;  %s8984_s17 = smov 72  }
   0xf   :  { %8307 = vmatprep.subr.bf16.mxu0 %v11355_v5  ;;  %s8985_s18 = smov 104   ;;  %s8986_s0 = smov 40  }
  0x10   :  { %s8987_s19 = smov 32   ;;  %s11354_s20 = smov 8  }
  0x11   :  { %s11353_s21 = smov 16   ;;  %s11352_s22 = smov 24  }
  0xc4   :  { %v8285_v7 = vpop.f32.mrf.mxu0 }
  0xc5   :  { %v125_v8 = vadd.f32 %v8285_v7, %v7389_v6 }
  0xc6   :  { %v119_v9 = vpop.f32.mrf.mxu0 }
  0xc7   :  { %v120_v10 = vadd.f32 %v7389_v6, %v119_v9  ;;  %v129_v12 = vmax.f32 %v125_v8, 0.0 }
  0xc9   :  { %v128_v11 = vmax.f32 %v120_v10, 0.0 }
  0xcb   :  { %8290 = vmatprep.mubr.msk.f32.mxu1 %vm137_vm2, %v128_v11 }
  0xcc   :  { %8291 = vmatmul.mubr.msk.f32.vlgmr.msra.gmra.mxu1 %vm137_vm2, %v129_v12 }
  0xcd   :  { %8303 = vmatprep.mubr.msk.bf16.mxu1 %vm8975_vm3, %v11355_v5 }
 0x18c   :  { %v8292_v15 = vpop.f32.mrf.mxu1 }
 0x18d   :  { %v9086_v18 = vadd.f32 %v8292_v15, %v7393_v16 }
 0x18e   :  { %v210_v17 = vpop.f32.mrf.mxu1 }
 0x18f   :  { %v9088_v19 = vadd.f32 %v7393_v16, %v210_v17 }
 0x191   :  { %v225_v20 = vpack.c.bf16 %v9086_v18, %v9088_v19 }
 0x193   :  { %8298 = vmatmul.mubr.msk.bf16.vlgmr.msra.gmra.mxu0 %vm245_vm4, %v225_v20 }
 0x194   :  { %8309 = vmatprep.mubr.msk.bf16.mxu0 %vm8975_vm3, %v11355_v5 }
 0x253   :  { %v283_v22 = vpop.f32.mrf.mxu0 }
 0x254   :  { %v284_v23 = vadd.f32 %v7396_v21, %v283_v22 }
 0x255   :  { %v8299_v24 = vpop.f32.mrf.mxu0 }
 0x256   :  { %v9098_v25 = vpack.c.bf16 %v284_v23, %v284_v23 }
 0x257   :  { %v286_v26 = vpop.f32.mrf.mxu0 }
 0x258   :  { %v287_v27 = vadd.f32 %v7396_v21, %v286_v26  ;;  %293 = vrot.lane.b32.xlu0 %v9098_v25, %s8976_s28 }
 0x259   :  { %v8300_v28 = vpop.f32.mrf.mxu0 }
 0x25a   :  { %v9102_v29 = vpack.c.bf16 %v287_v27, %v287_v27 }
 0x25c   :  { %343 = vrot.lane.b32.xlu0 %v9102_v29, %s8976_s28 }
 0x2ca   :  { %v294_v30 = vpop.permute.xlu0 %293 }
 0x2cb   :  { %v300_v31 = vsel %vm295_vm5, %v294_v30, 0 }
 0x2cc   :  { %8302 = vmatpush3.bf16.xpose.msra.mxu1 %v300_v31 }
 0x2cd   :  { %8313 = vmatprep.subr.bf16.mxu1 %v11355_v5 }
 0x2ce   :  { %v344_v32 = vpop.permute.xlu0 %343 }
 0x2cf   :  { %v349_v33 = vsel %vm295_vm5, %v344_v32, 0 }
 0x2d0   :  { %8308 = vmatpush3.bf16.xpose.msra.mxu0 %v349_v33 }
 0x2d1   :  { %8319 = vmatprep.subr.bf16.mxu0 %v11355_v5 }
 0x2d3   :  { %8304 = vmatmul.mubr.msk.bf16.vlgmr.msra.gmra.mxu1 %vm295_vm5, %v9098_v25 }
 0x2d4   :  { %8315 = vmatprep.mubr.msk.bf16.mxu1 %vm8975_vm3, %v11355_v5 }
 0x2d7   :  { %8310 = vmatmul.mubr.msk.bf16.vlgmr.msra.gmra.mxu0 %vm295_vm5, %v9102_v29 }
 0x2d8   :  { %8321 = vmatprep.mubr.msk.bf16.mxu0 %vm8975_vm3, %v11355_v5 }
 0x393   :  { %v336_v34 = vpop.f32.mrf.mxu1 }
 0x394   :  { %v391_v36 = vmul.f32 0.35355338, %v336_v34 }
 0x395   :  { %v8305_v37 = vpop.f32.mrf.mxu1 }
 0x396   :  { %v393_v38 = vadd.f32 %v391_v36, %v9121_v35 }
 0x397   :  { %v339_v39 = vpop.f32.mrf.mxu1  ;;  %v385_v40 = vpop.f32.mrf.mxu0 }
 0x398   :  { %v392_v41 = vmul.f32 0.35355338, %v385_v40  ;;  %v395_v42 = vsel %vm295_vm5, %v393_v38, -inf }
 0x399   :  { %396 = vmax.xlane.f32.xlu1 %v395_v42  ;;  %v8306_v43 = vpop.f32.mrf.mxu1  ;;  %v8311_v44 = vpop.f32.mrf.mxu0 }
 0x39a   :  { %v394_v45 = vadd.f32 %v392_v41, %v9121_v35 }
 0x39b   :  { %v388_v46 = vpop.f32.mrf.mxu0 }
 0x39c   :  { %v398_v47 = vsel %vm295_vm5, %v394_v45, -inf }
 0x39d   :  { %399 = vmax.xlane.f32.xlu1 %v398_v47  ;;  %v8312_v48 = vpop.f32.mrf.mxu0 }
 0x3ae   :  { %419 = vrot.lane.b32.xlu1 %v9098_v25, %s8977_s10 }
 0x3b2   :  { %468 = vrot.lane.b32.xlu1 %v9102_v29, %s8977_s10 }
 0x3b6   :  { %518 = vrot.lane.b32.xlu1 %v9098_v25, %s8978_s11 }
 0x422   :  { %v397_v49 = vpop.xlane.xlu1 %396 }
 0x423   :  { %v401_v50 = vsub.f32 %v393_v38, %v397_v49 }
 0x425   :  { %v403_v51 = vmul.f32 1.442695, %v401_v50 }
 0x426   :  { %v400_v52 = vpop.xlane.xlu1 %399 }
 0x427   :  { %8869 = vpow2.f32 %v403_v51  ;;  %v402_v53 = vsub.f32 %v394_v45, %v400_v52 }
 0x429   :  { %v405_v54 = vmul.f32 1.442695, %v402_v53 }
 0x42a   :  { %v420_v55 = vpop.permute.xlu1 %419 }
 0x42b   :  { %8871 = vpow2.f32 %v405_v54  ;;  %v426_v56 = vsel %vm424_vm6, %v420_v55, 0 }
 0x42c   :  { %8314 = vmatpush3.bf16.msra.mxu1 %v426_v56 }
 0x42d   :  { %8325 = vmatprep.subr.bf16.mxu1 %v11355_v5 }
 0x42e   :  { %v469_v57 = vpop.permute.xlu1 %468 }
 0x42f   :  { %v474_v58 = vsel %vm424_vm6, %v469_v57, 0 }
 0x430   :  { %8320 = vmatpush3.bf16.msra.mxu0 %v474_v58 }
 0x431   :  { %8331 = vmatprep.subr.bf16.mxu0 %v11355_v5 }
 0x432   :  { %v519_v63 = vpop.permute.xlu1 %518 }
 0x433   :  { %v524_v7 = vsel %vm295_vm5, %v519_v63, 0 }
 0x434   :  { %v8870_v59 = vpop.eup %8869 }
 0x435   :  { %v407_v60 = vsel %vm295_vm5, %v8870_v59, 0.0 }
 0x436   :  { %408 = vadd.xlane.f32.xlu0 %v407_v60 }
 0x438   :  { %v8872_v61 = vpop.eup %8871 }
 0x439   :  { %v410_v62 = vsel %vm295_vm5, %v8872_v61, 0.0 }
 0x43a   :  { %411 = vadd.xlane.f32.xlu1 %v410_v62 }
 0x44b   :  { %568 = vrot.lane.b32.xlu1 %v9102_v29, %s8978_s11 }
 0x44c   :  { %516 = vrot.lane.b32.xlu0 %v9098_v25, %s8979_s12 }
 0x44f   :  { %566 = vrot.lane.b32.xlu1 %v9102_v29, %s8979_s12 }
 0x4bf   :  { %v409_v0 = vpop.xlane.xlu0 %408 }
 0x4c0   :  { %8873 = vrcp.f32 %v409_v0 }
 0x4c3   :  { %v412_v1 = vpop.xlane.xlu1 %411  ;;  %v517_v12 = vpop.permute.xlu0 %516 }
 0x4c4   :  { %8875 = vrcp.f32 %v412_v1 }
 0x4c7   :  { %v569_v9 = vpop.permute.xlu1 %568 }
 0x4c8   :  { %v574_v11 = vsel %vm295_vm5, %v569_v9, 0 }
 0x4cb   :  { %v567_v15 = vpop.permute.xlu1 %566 }
 0x4cd   :  { %v8874_v2 = vpop.eup %8873 }
 0x4ce   :  { %v414_v3 = vmul.f32 %v8874_v2, %v8870_v59 }
 0x4d0   :  { %v417_v4 = vpack.c.bf16 %v414_v3, %v414_v3 }
 0x4d1   :  { %v8876_v6 = vpop.eup %8875 }
 0x4d2   :  { %8316 = vmatmul.mubr.msk.bf16.vlgmr.msra.gmra.mxu1 %vm295_vm5, %v417_v4  ;;  %v416_v8 = vmul.f32 %v8876_v6, %v8872_v61 }
 0x4d3   :  { %8326 = vmatpush3.bf16.xpose.msra.mxu1 %v524_v7  ;;  %8327 = vmatprep.mubr.msk.bf16.mxu1 %vm8975_vm3, %v11355_v5 }
 0x4d4   :  { %v418_v10 = vpack.c.bf16 %v416_v8, %v416_v8  ;;  %8337 = vmatprep.subr.bf16.mxu1 %v11355_v5 }
 0x4d6   :  { %8322 = vmatmul.mubr.msk.bf16.vlgmr.msra.gmra.mxu0 %vm295_vm5, %v418_v10 }
 0x4d7   :  { %8332 = vmatpush3.bf16.xpose.msra.mxu0 %v574_v11  ;;  %8333 = vmatprep.mubr.msk.bf16.mxu0 %vm8975_vm3, %v11355_v5 }
 0x4d8   :  { %8343 = vmatprep.subr.bf16.mxu0 %v11355_v5 }
 0x4da   :  { %8328 = vmatmul.mubr.msk.bf16.vlgmr.msra.gmra.mxu1 %vm295_vm5, %v517_v12 }
 0x4db   :  { %8339 = vmatprep.mubr.msk.bf16.mxu1 %vm8975_vm3, %v11355_v5 }
 0x4de   :  { %8334 = vmatmul.mubr.msk.bf16.vlgmr.msra.gmra.mxu0 %vm295_vm5, %v567_v15 }
 0x4df   :  { %8345 = vmatprep.mubr.msk.bf16.mxu0 %vm8975_vm3, %v11355_v5 }
 0x592   :  { %v9161_v16 = vpop.f32.mrf.mxu1 }
 0x594   :  { %v8317_v17 = vpop.f32.mrf.mxu1 }
 0x596   :  { %v465_v20 = vpop.f32.mrf.mxu1  ;;  %v9163_v21 = vpop.f32.mrf.mxu0 }
 0x598   :  { %v8318_v22 = vpop.f32.mrf.mxu1  ;;  %v8323_v23 = vpop.f32.mrf.mxu0 }
 0x59a   :  { %v513_v24 = vpop.f32.mrf.mxu0  ;;  %v560_v26 = vpop.f32.mrf.mxu1 }
 0x59b   :  { %v616_v27 = vmul.f32 0.35355338, %v560_v26 }
 0x59c   :  { %v8324_v28 = vpop.f32.mrf.mxu0  ;;  %v8329_v30 = vpop.f32.mrf.mxu1 }
 0x59d   :  { %v618_v31 = vadd.f32 %v616_v27, %v9121_v35 }
 0x59e   :  { %v563_v32 = vpop.f32.mrf.mxu1  ;;  %v610_v33 = vpop.f32.mrf.mxu0 }
 0x59f   :  { %v617_v34 = vmul.f32 0.35355338, %v610_v33  ;;  %v620_v36 = vsel %vm295_vm5, %v618_v31, -inf }
 0x5a0   :  { %621 = vmax.xlane.f32.xlu1 %v620_v36  ;;  %v8330_v37 = vpop.f32.mrf.mxu1  ;;  %v8335_v38 = vpop.f32.mrf.mxu0 }
 0x5a1   :  { %v619_v39 = vadd.f32 %v617_v34, %v9121_v35 }
 0x5a2   :  { %v613_v40 = vpop.f32.mrf.mxu0 }
 0x5a3   :  { %v623_v41 = vsel %vm295_vm5, %v619_v39, -inf }
 0x5a4   :  { %624 = vmax.xlane.f32.xlu0 %v623_v41  ;;  %v8336_v42 = vpop.f32.mrf.mxu0 }
 0x5b1   :  { %644 = vrot.lane.b32.xlu1 %v9098_v25, %s8980_s13 }
 0x5b5   :  { %742 = vrot.lane.b32.xlu1 %v9098_v25, %s8981_s14 }
 0x5ba   :  { %692 = vrot.lane.b32.xlu0 %v9102_v29, %s8980_s13 }
 0x5be   :  { %740 = vrot.lane.b32.xlu0 %v9098_v25, %s8982_s15 }
 0x629   :  { %v622_v43 = vpop.xlane.xlu1 %621 }
 0x62a   :  { %v626_v44 = vsub.f32 %v618_v31, %v622_v43 }
 0x62c   :  { %v628_v45 = vmul.f32 1.442695, %v626_v44 }
 0x62d   :  { %v645_v46 = vpop.permute.xlu1 %644  ;;  %v625_v47 = vpop.xlane.xlu0 %624 }
 0x62e   :  { %8877 = vpow2.f32 %v628_v45  ;;  %v650_v48 = vsel %vm424_vm6, %v645_v46, 0  ;;  %v627_v49 = vsub.f32 %v619_v39, %v625_v47 }
 0x62f   :  { %8338 = vmatpush3.bf16.msra.mxu1 %v650_v48 }
 0x630   :  { %v630_v50 = vmul.f32 1.442695, %v627_v49  ;;  %8349 = vmatprep.subr.bf16.mxu1 %v11355_v5 }
 0x631   :  { %v693_v51 = vpop.permute.xlu0 %692  ;;  %v743_v57 = vpop.permute.xlu1 %742 }
 0x632   :  { %8879 = vpow2.f32 %v630_v50  ;;  %v698_v52 = vsel %vm424_vm6, %v693_v51, 0  ;;  %v748_v0 = vsel %vm295_vm5, %v743_v57, 0 }
 0x633   :  { %8344 = vmatpush3.bf16.msra.mxu0 %v698_v52 }
 0x634   :  { %8355 = vmatprep.subr.bf16.mxu0 %v11355_v5 }
 0x635   :  { %v741_v6 = vpop.permute.xlu0 %740 }
 0x63b   :  { %v8878_v53 = vpop.eup %8877 }
 0x63c   :  { %v632_v54 = vsel %vm295_vm5, %v8878_v53, 0.0 }
 0x63d   :  { %633 = vadd.xlane.f32.xlu1 %v632_v54 }
 0x63f   :  { %v8880_v55 = vpop.eup %8879 }
 0x640   :  { %v635_v56 = vsel %vm295_vm5, %v8880_v55, 0.0 }
 0x641   :  { %636 = vadd.xlane.f32.xlu1 %v635_v56 }
 0x652   :  { %792 = vrot.lane.b32.xlu1 %v9102_v29, %s8981_s14 }
 0x656   :  { %790 = vrot.lane.b32.xlu1 %v9102_v29, %s8982_s15 }
 0x6c6   :  { %v634_v58 = vpop.xlane.xlu1 %633 }
 0x6c7   :  { %8881 = vrcp.f32 %v634_v58 }
 0x6ca   :  { %v637_v59 = vpop.xlane.xlu1 %636 }
 0x6cb   :  { %8883 = vrcp.f32 %v637_v59 }
 0x6ce   :  { %v793_v2 = vpop.permute.xlu1 %792 }
 0x6cf   :  { %v798_v4 = vsel %vm295_vm5, %v793_v2, 0 }
 0x6d2   :  { %v791_v7 = vpop.permute.xlu1 %790 }
 0x6d4   :  { %v8882_v60 = vpop.eup %8881 }
 0x6d5   :  { %v639_v61 = vmul.f32 %v8882_v60, %v8878_v53 }
 0x6d7   :  { %v642_v62 = vpack.c.bf16 %v639_v61, %v639_v61 }
 0x6d8   :  { %v8884_v63 = vpop.eup %8883 }
 0x6d9   :  { %8340 = vmatmul.mubr.msk.bf16.vlgmr.msra.gmra.mxu1 %vm295_vm5, %v642_v62  ;;  %v641_v1 = vmul.f32 %v8884_v63, %v8880_v55 }
 0x6da   :  { %8350 = vmatpush3.bf16.xpose.msra.mxu1 %v748_v0  ;;  %8351 = vmatprep.mubr.msk.bf16.mxu1 %vm8975_vm3, %v11355_v5 }
 0x6db   :  { %v643_v3 = vpack.c.bf16 %v641_v1, %v641_v1  ;;  %8361 = vmatprep.subr.bf16.mxu1 %v11355_v5 }
 0x6dd   :  { %8346 = vmatmul.mubr.msk.bf16.vlgmr.msra.gmra.mxu0 %vm295_vm5, %v643_v3 }
 0x6de   :  { %8356 = vmatpush3.bf16.xpose.msra.mxu0 %v798_v4  ;;  %8357 = vmatprep.mubr.msk.bf16.mxu0 %vm8975_vm3, %v11355_v5 }
 0x6df   :  { %8367 = vmatprep.subr.bf16.mxu0 %v11355_v5 }
 0x6e1   :  { %8352 = vmatmul.mubr.msk.bf16.vlgmr.msra.gmra.mxu1 %vm295_vm5, %v741_v6 }
 0x6e2   :  { %8363 = vmatprep.mubr.msk.bf16.mxu1 %vm8975_vm3, %v11355_v5 }
 0x6e5   :  { %8358 = vmatmul.mubr.msk.bf16.vlgmr.msra.gmra.mxu0 %vm295_vm5, %v791_v7 }
 0x6e6   :  { %8369 = vmatprep.mubr.msk.bf16.mxu0 %vm8975_vm3, %v11355_v5 }
 0x799   :  { %v9203_v8 = vpop.f32.mrf.mxu1 }
 0x79b   :  { %v8341_v9 = vpop.f32.mrf.mxu1 }
 0x79d   :  { %v689_v10 = vpop.f32.mrf.mxu1  ;;  %v9205_v11 = vpop.f32.mrf.mxu0 }
 0x79e   :  { %v8577_v12 = vpack.i.bf16 %v9205_v11, %v9203_v8 }
 0x79f   :  { %v8342_v15 = vpop.f32.mrf.mxu1  ;;  %v8347_v17 = vpop.f32.mrf.mxu0 }
 0x7a1   :  { %v737_v20 = vpop.f32.mrf.mxu0  ;;  %v784_v22 = vpop.f32.mrf.mxu1 }
 0x7a2   :  { %v840_v23 = vmul.f32 0.35355338, %v784_v22 }
 0x7a3   :  { %v8348_v24 = vpop.f32.mrf.mxu0  ;;  %v8353_v26 = vpop.f32.mrf.mxu1 }
 0x7a4   :  { %v842_v27 = vadd.f32 %v840_v23, %v9121_v35 }
 0x7a5   :  { %v787_v28 = vpop.f32.mrf.mxu1  ;;  %v834_v30 = vpop.f32.mrf.mxu0 }
 0x7a6   :  { %v841_v31 = vmul.f32 0.35355338, %v834_v30  ;;  %v844_v32 = vsel %vm295_vm5, %v842_v27, -inf }
 0x7a7   :  { %845 = vmax.xlane.f32.xlu0 %v844_v32  ;;  %v8354_v33 = vpop.f32.mrf.mxu1  ;;  %v8359_v34 = vpop.f32.mrf.mxu0 }
 0x7a8   :  { %v843_v36 = vadd.f32 %v841_v31, %v9121_v35 }
 0x7a9   :  { %v837_v37 = vpop.f32.mrf.mxu0 }
 0x7aa   :  { %v847_v38 = vsel %vm295_vm5, %v843_v36, -inf }
 0x7ab   :  { %848 = vmax.xlane.f32.xlu1 %v847_v38  ;;  %v8360_v39 = vpop.f32.mrf.mxu0 }
 0x7bc   :  { %868 = vrot.lane.b32.xlu1 %v9098_v25, %s8983_s16 }
 0x7c0   :  { %966 = vrot.lane.b32.xlu1 %v9098_v25, %s8984_s17 }
 0x7c4   :  { %1016 = vrot.lane.b32.xlu1 %v9102_v29, %s8984_s17 }
 0x7c8   :  { %1014 = vrot.lane.b32.xlu1 %v9102_v29, %s8985_s18 }
 0x830   :  { %v846_v40 = vpop.xlane.xlu0 %845 }
 0x831   :  { %v850_v41 = vsub.f32 %v842_v27, %v846_v40 }
 0x833   :  { %v852_v42 = vmul.f32 1.442695, %v850_v41 }
 0x834   :  { %v849_v43 = vpop.xlane.xlu1 %848 }
 0x835   :  { %8885 = vpow2.f32 %v852_v42  ;;  %v851_v44 = vsub.f32 %v843_v36, %v849_v43 }
 0x837   :  { %v854_v45 = vmul.f32 1.442695, %v851_v44 }
 0x838   :  { %v869_v46 = vpop.permute.xlu1 %868 }
 0x839   :  { %8887 = vpow2.f32 %v854_v45  ;;  %v874_v47 = vsel %vm424_vm6, %v869_v46, 0 }
 0x83a   :  { %8362 = vmatpush3.bf16.msra.mxu1 %v874_v47 }
 0x83b   :  { %8373 = vmatprep.subr.bf16.mxu1 %v11355_v5 }
 0x83c   :  { %v967_v57 = vpop.permute.xlu1 %966 }
 0x83d   :  { %v972_v61 = vsel %vm295_vm5, %v967_v57, 0 }
 0x840   :  { %v1017_v63 = vpop.permute.xlu1 %1016 }
 0x841   :  { %v1022_v1 = vsel %vm295_vm5, %v1017_v63, 0 }
 0x842   :  { %v8886_v48 = vpop.eup %8885 }
 0x843   :  { %v856_v49 = vsel %vm295_vm5, %v8886_v48, 0.0 }
 0x844   :  { %857 = vadd.xlane.f32.xlu0 %v856_v49  ;;  %v1015_v3 = vpop.permute.xlu1 %1014 }
 0x846   :  { %v8888_v50 = vpop.eup %8887 }
 0x847   :  { %v859_v51 = vsel %vm295_vm5, %v8888_v50, 0.0 }
 0x848   :  { %860 = vadd.xlane.f32.xlu0 %v859_v51 }
 0x85e   :  { %916 = vrot.lane.b32.xlu0 %v9102_v29, %s8983_s16 }
 0x862   :  { %964 = vrot.lane.b32.xlu0 %v9098_v25, %s8985_s18 }
 0x8cd   :  { %v858_v52 = vpop.xlane.xlu0 %857 }
 0x8ce   :  { %8889 = vrcp.f32 %v858_v52 }
 0x8d1   :  { %v861_v53 = vpop.xlane.xlu0 %860 }
 0x8d2   :  { %8891 = vrcp.f32 %v861_v53 }
 0x8d5   :  { %v917_v54 = vpop.permute.xlu0 %916 }
 0x8d6   :  { %v922_v55 = vsel %vm424_vm6, %v917_v54, 0 }
 0x8d7   :  { %8368 = vmatpush3.bf16.msra.mxu0 %v922_v55 }
 0x8d8   :  { %8379 = vmatprep.subr.bf16.mxu0 %v11355_v5 }
 0x8d9   :  { %v965_v2 = vpop.permute.xlu0 %964 }
 0x8db   :  { %v8890_v56 = vpop.eup %8889 }
 0x8dc   :  { %v863_v58 = vmul.f32 %v8890_v56, %v8886_v48 }
 0x8de   :  { %v866_v59 = vpack.c.bf16 %v863_v58, %v863_v58 }
 0x8df   :  { %v8892_v60 = vpop.eup %8891 }
 0x8e0   :  { %8364 = vmatmul.mubr.msk.bf16.vlgmr.msra.gmra.mxu1 %vm295_vm5, %v866_v59  ;;  %v865_v62 = vmul.f32 %v8892_v60, %v8888_v50 }
 0x8e1   :  { %8374 = vmatpush3.bf16.xpose.msra.mxu1 %v972_v61  ;;  %8375 = vmatprep.mubr.msk.bf16.mxu1 %vm8975_vm3, %v11355_v5 }
 0x8e2   :  { %v867_v0 = vpack.c.bf16 %v865_v62, %v865_v62  ;;  %8385 = vmatprep.subr.bf16.mxu1 %v11355_v5 }
 0x8e4   :  { %8370 = vmatmul.mubr.msk.bf16.vlgmr.msra.gmra.mxu0 %vm295_vm5, %v867_v0 }
 0x8e5   :  { %8380 = vmatpush3.bf16.xpose.msra.mxu0 %v1022_v1  ;;  %8381 = vmatprep.mubr.msk.bf16.mxu0 %vm8975_vm3, %v11355_v5 }
 0x8e6   :  { %8391 = vmatprep.subr.bf16.mxu0 %v11355_v5 }
 0x8e8   :  { %8376 = vmatmul.mubr.msk.bf16.vlgmr.msra.gmra.mxu1 %vm295_vm5, %v965_v2 }
 0x8e9   :  { %8387 = vmatprep.mubr.msk.bf16.mxu1 %vm8975_vm3, %v11355_v5 }
 0x8ec   :  { %8382 = vmatmul.mubr.msk.bf16.vlgmr.msra.gmra.mxu0 %vm295_vm5, %v1015_v3 }
 0x8ed   :  { %8393 = vmatprep.mubr.msk.bf16.mxu0 %vm8975_vm3, %v11355_v5 }
 0x9a0   :  { %v910_v4 = vpop.f32.mrf.mxu1 }
 0x9a2   :  { %v8365_v6 = vpop.f32.mrf.mxu1 }
 0x9a4   :  { %v913_v7 = vpop.f32.mrf.mxu1  ;;  %v958_v9 = vpop.f32.mrf.mxu0 }
 0x9a5   :  { %v8582_v10 = vpack.i.bf16 %v958_v9, %v910_v4 }
 0x9a6   :  { %v8366_v15 = vpop.f32.mrf.mxu1  ;;  %v8371_v17 = vpop.f32.mrf.mxu0 }
 0x9a8   :  { %v961_v20 = vpop.f32.mrf.mxu0  ;;  %v1008_v22 = vpop.f32.mrf.mxu1 }
 0x9a9   :  { %v1064_v23 = vmul.f32 0.35355338, %v1008_v22 }
 0x9aa   :  { %v8372_v24 = vpop.f32.mrf.mxu0  ;;  %v8377_v26 = vpop.f32.mrf.mxu1 }
 0x9ab   :  { %v1066_v27 = vadd.f32 %v1064_v23, %v9121_v35 }
 0x9ac   :  { %v1011_v28 = vpop.f32.mrf.mxu1  ;;  %v1058_v30 = vpop.f32.mrf.mxu0 }
 0x9ad   :  { %v1065_v31 = vmul.f32 0.35355338, %v1058_v30  ;;  %v1068_v32 = vsel %vm295_vm5, %v1066_v27, -inf  ;;  %v1220_v28 = vlaneseq }
 0x9ae   :  { %1069 = vmax.xlane.f32.xlu0 %v1068_v32  ;;  %v8378_v33 = vpop.f32.mrf.mxu1  ;;  %v8383_v34 = vpop.f32.mrf.mxu0 }
 0x9af   :  { %v1067_v36 = vadd.f32 %v1065_v31, %v9121_v35  ;;  %v9284_v30 = vshrl.u32 %v1220_v28, 7 }
 0x9b0   :  { %v1061_v37 = vpop.f32.mrf.mxu0 }
 0x9b1   :  { %v1071_v38 = vsel %vm295_vm5, %v1067_v36, -inf }
 0x9b2   :  { %1072 = vmax.xlane.f32.xlu1 %v1071_v38  ;;  %v8384_v39 = vpop.f32.mrf.mxu0 }
 0x9c3   :  { %1092 = vrot.lane.b32.xlu1 %v9098_v25, %s8986_s0 }
 0x9c7   :  { %1226 = vrot.lane.b32.xlu1 %v9068_v13, %s8987_s19 }
 0x9cb   :  { %8578 = vrot.lane.b32.xlu1 %v8577_v12, %s11354_s20  ;;  %s8992_s20 = smov [#allocation2]  }
 0xa37   :  { %v1070_v35 = vpop.xlane.xlu0 %1069 }
 0xa38   :  { %v1074_v40 = vsub.f32 %v1066_v27, %v1070_v35 }
 0xa3a   :  { %v1076_v41 = vmul.f32 1.442695, %v1074_v40 }
 0xa3b   :  { %v1073_v42 = vpop.xlane.xlu1 %1072 }
 0xa3c   :  { %8893 = vpow2.f32 %v1076_v41  ;;  %v1075_v43 = vsub.f32 %v1067_v36, %v1073_v42 }
 0xa3e   :  { %v1078_v44 = vmul.f32 1.442695, %v1075_v43 }
 0xa3f   :  { %v1093_v45 = vpop.permute.xlu1 %1092 }
 0xa40   :  { %8895 = vpow2.f32 %v1078_v44  ;;  %v1098_v25 = vsel %vm424_vm6, %v1093_v45, 0 }
 0xa41   :  { %8386 = vmatpush3.bf16.msra.mxu1 %v1098_v25 }
 0xa42   :  { %8397 = vmatprep.subr.bf16.mxu1 %v11355_v5 }
 0xa43   :  { %v1227_v54 = vpop.permute.xlu1 %1226 }
 0xa47   :  { %v8579_v2 = vpop.permute.xlu1 %8578 }
 0xa48   :  { %v8581_v3 = vunpack.i.h.bf16 %v8579_v2  ;;  %v8580_v4 = vunpack.i.l.bf16 %v8579_v2 }
 0xa49   :  { %v8894_v13 = vpop.eup %8893 }
 0xa4a   :  { %v1080_v46 = vsel %vm295_vm5, %v8894_v13, 0.0  ;;  %v1212_v15 = vsel %vm295_vm5, %v9161_v16, %v8580_v4  ;;  %v9292_v16 = vld [vmem:[%s11347_s5] sm:$0x3f] }
 0xa4b   :  { %1081 = vadd.xlane.f32.xlu0 %v1080_v46 }
 0xa4d   :  { %v8896_v8 = vpop.eup %8895 }
 0xa4e   :  { %v1083_v11 = vsel %vm295_vm5, %v8896_v8, 0.0 }
 0xa4f   :  { %1084 = vadd.xlane.f32.xlu0 %v1083_v11 }
 0xa65   :  { %1140 = vrot.lane.b32.xlu0 %v9102_v29, %s8986_s0 }
 0xa69   :  { %8583 = vrot.lane.b32.xlu0 %v8582_v10, %s11353_s21  ;;  %v1213_v10 = vsel %vm295_vm5, %v9163_v21, %v8581_v3  ;;  %v9287_v21 = vsub.s32 0, %v9284_v30  ;;  %s7381_s21 = sshll.u32 %s8992_s20, 4  ;;  %s7382_s21 = int_to_ptr.vmem [resolvable:$true] %s7381_s21 }
 0xa6a   :  { %s8952_s30 = scalar_lea.vmem %s7382_s21, 32  ;;  %p8957_p1 = scmp.lt.s32.totalorder %s7382_s21, %s7382_s21 }
 0xa6b   :  { %11364 = vst [vmem:[#allocation5_spill] sm:$0xff] %v9287_v21  ;;  %v1223_v31 = vrot.slane %v9292_v16, %v9287_v21  ;;  %p8953_p0 = scmp.ne.s32.totalorder %s7382_s21, %s8952_s30  ;;  %p8958_p2 = scmp.lt.s32.totalorder %s8952_s30, %s8952_s30 }
 0xa6d   :  { %1224 = vrot.lane.b32.xlu0 %v9075_v14, %s8987_s19  ;;  %p8959_p3 = por %p8958_p2, %p8957_p1 }
 0xa6f   :  { %p8960_p4 = pnand %p8959_p3, %p8953_p0 }
 0xad4   :  { %v1082_v12 = vpop.xlane.xlu0 %1081 }
 0xad5   :  { %8897 = vrcp.f32 %v1082_v12  ;;  %v1340_v12 = vld [vmem:[%s11348_s6 + $0xc0] sm:$0xff] }
 0xad8   :  { %v1085_v47 = vpop.xlane.xlu0 %1084 }
 0xad9   :  { %8899 = vrcp.f32 %v1085_v47  ;;  %v1333_v47 = vld [vmem:[%s11348_s6 + $0x88] sm:$0xff] }
 0xadc   :  { %v1141_v48 = vpop.permute.xlu0 %1140 }
 0xadd   :  { %v1146_v49 = vsel %vm424_vm6, %v1141_v48, 0 }
 0xade   :  { %8392 = vmatpush3.bf16.msra.mxu0 %v1146_v49  ;;  %v1341_v49 = vld [vmem:[%s11348_s6 + $0xc8] sm:$0xff] }
 0xae0   :  { %v8584_v55 = vpop.permute.xlu0 %8583 }
 0xae1   :  { %v8586_v6 = vunpack.i.h.bf16 %v8584_v55  ;;  %v8585_v7 = vunpack.i.l.bf16 %v8584_v55  ;;  %v1325_v55 = vld [vmem:[%s11348_s6 + $0x48] sm:$0xff] }
 0xae2   :  { %v8898_v50 = vpop.eup %8897 }
 0xae3   :  { %v1087_v51 = vmul.f32 %v8898_v50, %v8894_v13  ;;  %v1214_v22 = vsel %vm137_vm2, %v1212_v15, %v8585_v7  ;;  %v1215_v23 = vsel %vm137_vm2, %v1213_v10, %v8586_v6 }
 0xae4   :  { %v1225_v56 = vpop.permute.xlu0 %1224 }
 0xae5   :  { %v1090_v52 = vpack.c.bf16 %v1087_v51, %v1087_v51  ;;  %v7436_v51 = vcombine.low %v1333_v47, %v1341_v49 }
 0xae6   :  { %v8900_v53 = vpop.eup %8899 }
 0xae7   :  { %8388 = vmatmul.mubr.msk.bf16.vlgmr.msra.gmra.mxu1 %vm295_vm5, %v1090_v52  ;;  %v1089_v29 = vmul.f32 %v8900_v53, %v8896_v8  ;;  %v7437_v52 = vcombine.high %v1333_v47, %v1341_v49  ;;  %v1316_v53 = vld [vmem:[%s11348_s6] sm:$0xff] }
 0xae8   :  { %8398 = vmatpush3.bf16.msra.mxu1 %v1227_v54  ;;  %8401 = vmatprep.mubr.msk.bf16.mxu1 %vm8975_vm3, %v11355_v5  ;;  %v1324_v54 = vld [vmem:[%s11348_s6 + $0x40] sm:$0xff] }
 0xae9   :  { %v1091_v14 = vpack.c.bf16 %v1089_v29, %v1089_v29  ;;  %8399 = vmatprep.subr.bf16.mxu1 %v11355_v5  ;;  %v1317_v29 = vld [vmem:[%s11348_s6 + $0x8] sm:$0xff] }
 0xaeb   :  { %8394 = vmatmul.mubr.msk.bf16.vlgmr.msra.gmra.mxu0 %vm295_vm5, %v1091_v14  ;;  %v7419_v14 = vcombine.high %v1316_v53, %v1324_v54 }
 0xaec   :  { %8400 = vmatpush3.bf16.msra.mxu1 %v1225_v56  ;;  %v7418_v56 = vcombine.low %v1316_v53, %v1324_v54  ;;  %v1347_v53 = vld [vmem:[%s11348_s6 + $0xf8] sm:$0xff] }
 0xaed   :  { %1651 = vmatprep.subr.bf16.mxu1 %v7437_v52  ;;  %v1339_v52 = vld [vmem:[%s11348_s6 + $0xb8] sm:$0xff] }
 0xba7   :  { %v1134_v57 = vpop.f32.mrf.mxu1 }
 0xba9   :  { %v8389_v58 = vpop.f32.mrf.mxu1 }
 0xbaa   :  { %v7421_v58 = vcombine.high %v1317_v29, %v1325_v55 }
 0xbab   :  { %v1137_v59 = vpop.f32.mrf.mxu1  ;;  %v1182_v60 = vpop.f32.mrf.mxu0 }
 0xbac   :  { %v8587_v61 = vpack.i.bf16 %v1182_v60, %v1134_v57  ;;  %v7420_v57 = vcombine.low %v1317_v29, %v1325_v55  ;;  %v1334_v59 = vld [vmem:[%s11348_s6 + $0x90] sm:$0xff]  ;;  %v7449_v55 = vcombine.high %v1339_v52, %v1347_v53 }
 0xbad   :  { %v8390_v62 = vpop.f32.mrf.mxu1  ;;  %v8395_v63 = vpop.f32.mrf.mxu0  ;;  %v1342_v60 = vld [vmem:[%s11348_s6 + $0xd0] sm:$0xff] }
 0xbae   :  { %8588 = vrot.lane.b32.xlu1 %v8587_v61, %s11352_s22  ;;  %v1335_v61 = vld [vmem:[%s11348_s6 + $0x98] sm:$0xff]  ;;  %v8991_v62 = vmov 0   ;;  %v7439_v63 = vcombine.high %v1334_v59, %v1342_v60 }
 0xbaf   :  { %v1185_v0 = vpop.f32.mrf.mxu0  ;;  %1628 = vmatprep.mubr.bf16.mxu0 %v8991_v62  ;;  %8607 = vset.pattern.permute.xlu1 %v8991_v62 }
 0xbb0   :  { %v1343_v0 = vld [vmem:[%s11348_s6 + $0xd8] sm:$0xff]  ;;  %8608 = vset.pattern.permute.xlu0 %v8991_v62 }
 0xbb1   :  { %v8396_v1 = vpop.f32.mrf.mxu0  ;;  %v7440_v2 = vcombine.low %v1335_v61, %v1343_v0  ;;  %v7441_v3 = vcombine.high %v1335_v61, %v1343_v0  ;;  %v7448_v61 = vcombine.low %v1339_v52, %v1347_v53 }
 0xbb2   :  { %v7438_v1 = vcombine.low %v1334_v59, %v1342_v60  ;;  %v1331_v59 = vld [vmem:[%s11348_s6 + $0x78] sm:$0xff] }
 0xc20   :  { %v8589_v9 = vpop.permute.xlu1 %8588 }
 0xc21   :  { %v8591_v17 = vunpack.i.h.bf16 %v8589_v9  ;;  %v8590_v20 = vunpack.i.l.bf16 %v8589_v9 }
 0xc23   :  { %v1218_v24 = vsel %vm1216_vm7, %v1215_v23, %v8591_v17  ;;  %v1217_v26 = vsel %vm1216_vm7, %v1214_v22, %v8590_v20  ;;  %v9343_v17 = vsub.s32 1, %v9284_v30  ;;  %v9348_v23 = vsub.s32 2, %v9284_v30 }
 0xc24   :  { %v1219_v27 = vpack.c.bf16 %v1218_v24, %v1217_v26 }
 0xc25   :  { %v1306_v22 = vrot.slane %v9292_v16, %v9343_v17  ;;  %11365 = vst [vmem:[#allocation6_spill] sm:$0xff] %v9348_v23 }
 0xc26   :  { %8402 = vmatmul.mubr.msk.bf16.vlgmr.msra.gmra.mxu1 %vm245_vm4, %v1219_v27  ;;  %v1312_v27 = vrot.slane %v9292_v16, %v9348_v23 }
 0xc27   :  { %1652 = vmatpush1.bf16.msra.mxu1 %v7436_v51  ;;  %1671 = vmatprep.mubr.bf16.mxu1 %v8991_v62  ;;  %v1346_v51 = vld [vmem:[%s11348_s6 + $0xf0] sm:$0xff] }
 0xc28   :  { %1653 = vmatprep.subr.bf16.mxu1 %v7421_v58  ;;  %v1323_v58 = vld [vmem:[%s11348_s6 + $0x38] sm:$0xff] }
 0xc29   :  { %v7433_v0 = vcombine.high %v1323_v58, %v1331_v59 }
 0xc2b   :  { %1654 = vmatpush1.bf16.msra.mxu1 %v7420_v57  ;;  %v1330_v57 = vld [vmem:[%s11348_s6 + $0x70] sm:$0xff] }
 0xc2c   :  { %1737 = vmatprep.subr.bf16.mxu1 %v7441_v3  ;;  %v8611_v3 = vld [vmem:[%s11350_s8 + $0x78] sm:$0xff]  }
 0xce6   :  { %v1267_v32 = vpop.f32.mrf.mxu1 }
 0xce7   :  { %v1268_v33 = vadd.f32 %v1267_v32, %v1223_v31 }
 0xce8   :  { %v8403_v34 = vpop.f32.mrf.mxu1 }
 0xce9   :  { %v1274_v36 = vadd.f32 %v1268_v33, %v9088_v19  ;;  %v1318_v33 = vld [vmem:[%s11348_s6 + $0x10] sm:$0xff] }
 0xcea   :  { %v1270_v37 = vpop.f32.mrf.mxu1  ;;  %v1326_v34 = vld [vmem:[%s11348_s6 + $0x50] sm:$0xff] }
 0xceb   :  { %v1271_v38 = vadd.f32 %v1270_v37, %v1223_v31  ;;  %v1276_v39 = vsel %vm245_vm4, %v1274_v36, 0.0  ;;  %v1327_v37 = vld [vmem:[%s11348_s6 + $0x58] sm:$0xff] }
 0xcec   :  { %1277 = vadd.xlane.f32.xlu1 %v1276_v39  ;;  %v8404_v35 = vpop.f32.mrf.mxu1 }
 0xced   :  { %v1275_v40 = vadd.f32 %v1271_v38, %v9086_v18  ;;  %v1332_v18 = vld [vmem:[%s11348_s6 + $0x80] sm:$0xff]  ;;  %v7423_v35 = vcombine.high %v1318_v33, %v1326_v34 }
 0xcee   :  { %v7435_v48 = vcombine.high %v1332_v18, %v1340_v12  ;;  %v7434_v50 = vcombine.low %v1332_v18, %v1340_v12  ;;  %v1329_v18 = vld [vmem:[%s11348_s6 + $0x68] sm:$0xff] }
 0xcef   :  { %v1279_v41 = vsel %vm245_vm4, %v1275_v40, 0.0 }
 0xcf0   :  { %1280 = vadd.xlane.f32.xlu0 %v1279_v41  ;;  %1608 = vmatprep.subr.bf16.mxu0 %v7435_v48  ;;  %v1336_v41 = vld [vmem:[%s11348_s6 + $0xa0] sm:$0xff] }
 0xcf1   :  { %1609 = vmatpush1.bf16.msra.mxu0 %v7434_v50  ;;  %v1338_v50 = vld [vmem:[%s11348_s6 + $0xb0] sm:$0xff] }
 0xcf2   :  { %1610 = vmatprep.subr.bf16.mxu0 %v7419_v14  ;;  %v7447_v14 = vcombine.high %v1338_v50, %v1346_v51  ;;  %v7446_v60 = vcombine.low %v1338_v50, %v1346_v51 }
 0xcf5   :  { %1611 = vmatpush1.bf16.msra.mxu0 %v7418_v56  ;;  %v1322_v56 = vld [vmem:[%s11348_s6 + $0x30] sm:$0xff] }
 0xcf6   :  { %1694 = vmatprep.subr.bf16.mxu0 %v7439_v63  ;;  %v7431_v63 = vcombine.high %v1322_v56, %v1330_v57 }
 0xd75   :  { %v1278_v42 = vpop.xlane.xlu1 %1277 }
 0xd76   :  { %v1283_v43 = vmul.f32 0.03125, %v1278_v42  ;;  %v1344_v42 = vld [vmem:[%s11348_s6 + $0xe0] sm:$0xff] }
 0xd77   :  { %v7442_v12 = vcombine.low %v1336_v41, %v1344_v42 }
 0xd78   :  { %v1285_v44 = vsub.f32 %v1274_v36, %v1283_v43  ;;  %v1319_v36 = vld [vmem:[%s11348_s6 + $0x18] sm:$0xff]  ;;  %v1337_v43 = vld [vmem:[%s11348_s6 + $0xa8] sm:$0xff] }
 0xd79   :  { %v1281_v45 = vpop.xlane.xlu0 %1280 }
 0xd7a   :  { %v1284_v25 = vmul.f32 0.03125, %v1281_v45  ;;  %v1287_v13 = vmul.f32 %v1285_v44, %v1285_v44  ;;  %v7422_v45 = vcombine.low %v1318_v33, %v1326_v34  ;;  %v8626_v33 = vld [vmem:[%s11350_s8 + $0xa0] sm:$0xff]   ;;  %v8627_v34 = vld [vmem:[%s11350_s8 + $0x58] sm:$0xff]  }
 0xd7c   :  { %v1286_v46 = vsub.f32 %v1275_v40, %v1284_v25  ;;  %v1289_v19 = vsel %vm245_vm4, %v1287_v13, 0.0  ;;  %v7425_v40 = vcombine.high %v1319_v36, %v1327_v37  ;;  %v7424_v25 = vcombine.low %v1319_v36, %v1327_v37  ;;  %v8628_v36 = vld [vmem:[%s11350_s8 + $0xd8] sm:$0xff]  }
 0xd7d   :  { %1290 = vadd.xlane.f32.xlu0 %v1289_v19  ;;  %v7443_v13 = vcombine.high %v1336_v41, %v1344_v42  ;;  %v1320_v19 = vld [vmem:[%s11348_s6 + $0x20] sm:$0xff]  ;;  %v8629_v37 = vld [vmem:[%s11350_s8 + $0x18] sm:$0xff]   ;;  %v8633_v41 = vld [vmem:[%s11350_s8 + $0x10] sm:$0xff]  }
 0xd7e   :  { %v1288_v8 = vmul.f32 %v1286_v46, %v1286_v46  ;;  %v8634_v42 = vld [vmem:[%s11350_s8 + $0x90] sm:$0xff]  }
 0xd80   :  { %v1292_v11 = vsel %vm245_vm4, %v1288_v8, 0.0  ;;  %v1328_v8 = vld [vmem:[%s11348_s6 + $0x60] sm:$0xff] }
 0xd81   :  { %1293 = vadd.xlane.f32.xlu1 %v1292_v11  ;;  %v1321_v11 = vld [vmem:[%s11348_s6 + $0x28] sm:$0xff]  ;;  %v7427_v48 = vcombine.high %v1320_v19, %v1328_v8  ;;  %v7426_v54 = vcombine.low %v1320_v19, %v1328_v8  ;;  %v8641_v19 = vld [vmem:[%s11350_s8] sm:$0xff]  }
 0xd82   :  { %v7429_v49 = vcombine.high %v1321_v11, %v1329_v18  ;;  %v7428_v29 = vcombine.low %v1321_v11, %v1329_v18  ;;  %v8642_v8 = vld [vmem:[%s11350_s8 + $0x80] sm:$0xff]   ;;  %v8643_v11 = vld [vmem:[%s11350_s8 + $0x178] sm:$0xff]  }
 0xd83   :  { %v8644_v18 = vld [vmem:[%s11350_s8 + $0x1f8] sm:$0xff]  }
 0xe06   :  { %v1291_v4 = vpop.xlane.xlu0 %1290 }
 0xe07   :  { %v1295_v6 = vmul.f32 0.03125, %v1291_v4  ;;  %v8612_v4 = vld [vmem:[%s11350_s8 + $0xf8] sm:$0xff]  }
 0xe09   :  { %v1297_v7 = vadd.f32 1e-05, %v1295_v6  ;;  %v8613_v6 = vld [vmem:[%s11350_s8 + $0x38] sm:$0xff]  }
 0xe0a   :  { %v1294_v9 = vpop.xlane.xlu1 %1293 }
 0xe0b   :  { %8901 = vrsqrt.f32 %v1297_v7  ;;  %v1296_v10 = vmul.f32 0.03125, %v1294_v9  ;;  %v8614_v7 = vld [vmem:[%s11350_s8 + $0xb8] sm:$0xff]   ;;  %v8615_v9 = vld [vmem:[%s11350_s8 + $0x70] sm:$0xff]  }
 0xe0d   :  { %v1298_v15 = vadd.f32 1e-05, %v1296_v10  ;;  %v8616_v10 = vld [vmem:[%s11350_s8 + $0xf0] sm:$0xff]  }
 0xe0f   :  { %8903 = vrsqrt.f32 %v1298_v15  ;;  %v8617_v15 = vld [vmem:[%s11350_s8 + $0x30] sm:$0xff]  }
 0xe18   :  { %v8902_v20 = vpop.eup %8901 }
 0xe19   :  { %v1301_v24 = vmul.f32 %v8902_v20, %v1285_v44  ;;  %v1345_v44 = vld [vmem:[%s11348_s6 + $0xe8] sm:$0xff]  ;;  %v8618_v20 = vld [vmem:[%s11350_s8 + $0xb0] sm:$0xff]  }
 0xe1a   :  { %v7444_v47 = vcombine.low %v1337_v43, %v1345_v44 }
 0xe1b   :  { %v1307_v28 = vmul.f32 %v1306_v22, %v1301_v24  ;;  %v8620_v24 = vld [vmem:[%s11350_s8 + $0xe8] sm:$0xff]  }
 0xe1c   :  { %v8904_v26 = vpop.eup %8903 }
 0xe1d   :  { %v1302_v31 = vmul.f32 %v8904_v26, %v1286_v46  ;;  %v9364_v16 = vadd.f32 %v1312_v27, %v1307_v28  ;;  %v7445_v46 = vcombine.high %v1337_v43, %v1345_v44  ;;  %v8621_v26 = vld [vmem:[%s11350_s8 + $0x28] sm:$0xff]   ;;  %v8623_v28 = vld [vmem:[%s11350_s8 + $0x60] sm:$0xff]  }
 0xe1e   :  { %v8635_v43 = vld [vmem:[%s11350_s8 + $0x48] sm:$0xff]  }
 0xe1f   :  { %v1308_v32 = vmul.f32 %v1306_v22, %v1302_v31  ;;  %v8619_v22 = vld [vmem:[%s11350_s8 + $0x68] sm:$0xff]   ;;  %v8624_v31 = vld [vmem:[%s11350_s8 + $0xe0] sm:$0xff]  }
 0xe20   :  { %v8636_v44 = vld [vmem:[%s11350_s8 + $0xc8] sm:$0xff]  }
 0xe21   :  { %v9366_v38 = vadd.f32 %v1312_v27, %v1308_v32  ;;  %v8622_v27 = vld [vmem:[%s11350_s8 + $0xa8] sm:$0xff]   ;;  %v8625_v32 = vld [vmem:[%s11350_s8 + $0x20] sm:$0xff]  }
 0xe23   :  { %v9370_v39 = vpack.c.bf16 %v9366_v38, %v9364_v16 }
 0xe25   :  { %7450 = vmatmul.mubr.msk.bf16.vlgmr.msra.gmra.mxu0 %vm245_vm4, %v9370_v39  ;;  %7451 = vmatmul.mubr.msk.bf16.vlgmr.msra.gmra.mxu1 %vm245_vm4, %v9370_v39 }
 0xe26   :  { %1695 = vmatpush1.bf16.msra.mxu0 %v7438_v1  ;;  %1738 = vmatpush1.bf16.msra.mxu1 %v7440_v2  ;;  %v7430_v1 = vcombine.low %v1322_v56, %v1330_v57  ;;  %v7432_v2 = vcombine.low %v1323_v58, %v1331_v59  ;;  %v9561_v56 = vsub.s32 5, %v9284_v30  ;;  %v9564_v57 = vsub.s32 7, %v9284_v30 }
 0xe27   :  { %1696 = vmatprep.subr.bf16.mxu0 %v7423_v35  ;;  %1739 = vmatprep.subr.bf16.mxu1 %v7425_v40  ;;  %v8631_v35 = vld [vmem:[%s11350_s8 + $0x50] sm:$0xff]  }
 0xe28   :  { %1714 = vmatprep.mubr.bf16.mxu0 %v8991_v62  ;;  %1757 = vmatprep.mubr.bf16.mxu1 %v8991_v62  ;;  %v8632_v40 = vld [vmem:[%s11350_s8 + $0xd0] sm:$0xff]   ;;  %11366 = vst [vmem:[#allocation7_spill] sm:$0xff] %v9561_v56  ;;  %11367 = vst [vmem:[#allocation8_spill] sm:$0xff] %v9564_v57 }
 0xe2a   :  { %1697 = vmatpush1.bf16.msra.mxu0 %v7422_v45  ;;  %1740 = vmatpush1.bf16.msra.mxu1 %v7424_v25  ;;  %v8637_v45 = vld [vmem:[%s11350_s8 + $0x8] sm:$0xff]  }
 0xe2b   :  { %1780 = vmatprep.subr.bf16.mxu0 %v7443_v13  ;;  %1823 = vmatprep.subr.bf16.mxu1 %v7445_v46  ;;  %v8638_v25 = vld [vmem:[%s11350_s8 + $0x88] sm:$0xff]   ;;  %v8639_v13 = vld [vmem:[%s11350_s8 + $0x40] sm:$0xff]  }
 0xe2c   :  { %v8640_v46 = vld [vmem:[%s11350_s8 + $0xc0] sm:$0xff]  }
 0xe2d   :  { %7452 = vmatmul.mubr.msk.bf16.vlgmr.msra.gmra.mxu0 %vm245_vm4, %v9370_v39  ;;  %7453 = vmatmul.mubr.msk.bf16.vlgmr.msra.gmra.mxu1 %vm245_vm4, %v9370_v39 }
 0xe2e   :  { %1781 = vmatpush1.bf16.msra.mxu0 %v7442_v12  ;;  %1824 = vmatpush1.bf16.msra.mxu1 %v7444_v47  ;;  %v9545_v12 = vsub.s32 3, %v9284_v30  ;;  %v9550_v47 = vld [vmem:[%s11349_s7] ss:$2 sm:$0xff] }
 0xe2f   :  { %1782 = vmatprep.subr.bf16.mxu0 %v7427_v48  ;;  %1825 = vmatprep.subr.bf16.mxu1 %v7429_v49  ;;  %v1360_v50 = vrot.slane %v9550_v47, %v9343_v17  ;;  %v1356_v52 = vrot.slane %v9550_v47, %v9287_v21  ;;  %v1364_v53 = vrot.slane %v9550_v47, %v9348_v23 }
 0xe30   :  { %1800 = vmatprep.mubr.bf16.mxu0 %v8991_v62  ;;  %1843 = vmatprep.mubr.bf16.mxu1 %v8991_v62  ;;  %v1368_v51 = vrot.slane %v9550_v47, %v9545_v12 }
 0xe32   :  { %1783 = vmatpush1.bf16.msra.mxu0 %v7426_v54  ;;  %1826 = vmatpush1.bf16.msra.mxu1 %v7428_v29 }
 0xe33   :  { %1866 = vmatprep.subr.bf16.mxu0 %v7447_v14  ;;  %1909 = vmatprep.subr.bf16.mxu1 %v7449_v55 }
 0xe35   :  { %7454 = vmatmul.mubr.msk.bf16.vlgmr.msra.gmra.mxu0 %vm245_vm4, %v9370_v39  ;;  %7455 = vmatmul.mubr.msk.bf16.vlgmr.msra.gmra.mxu1 %vm245_vm4, %v9370_v39 }
 0xe36   :  { %1867 = vmatpush1.bf16.msra.mxu0 %v7446_v60  ;;  %1910 = vmatpush1.bf16.msra.mxu1 %v7448_v61 }
 0xe37   :  { %1868 = vmatprep.subr.bf16.mxu0 %v7431_v63  ;;  %1911 = vmatprep.subr.bf16.mxu1 %v7433_v0 }
 0xe38   :  { %1886 = vmatprep.mubr.bf16.mxu0 %v8991_v62  ;;  %1929 = vmatprep.mubr.bf16.mxu1 %v8991_v62 }
 0xe3a   :  { %1869 = vmatpush1.bf16.msra.mxu0 %v7430_v1  ;;  %1912 = vmatpush1.bf16.msra.mxu1 %v7432_v2 }
 0xe3b   :  { %7873 = vmatprep.subr.bf16.mxu0 %v8611_v3  ;;  %7895 = vmatprep.subr.bf16.mxu1 %v8612_v4 }
 0xe3d   :  { %7456 = vmatmul.mubr.msk.bf16.vlgmr.msra.gmra.mxu0 %vm245_vm4, %v9370_v39  ;;  %7457 = vmatmul.mubr.msk.bf16.vlgmr.msra.gmra.mxu1 %vm245_vm4, %v9370_v39  ;;  %v8630_v39 = vld [vmem:[%s11350_s8 + $0x98] sm:$0xff]  }
 0xe3e   :  { %7874 = vmatpush3.bf16.msra.mxu0 %v8613_v6  ;;  %7896 = vmatpush3.bf16.msra.mxu1 %v8614_v7 }
 0xe3f   :  { %7875 = vmatprep.subr.bf16.mxu0 %v8615_v9  ;;  %7897 = vmatprep.subr.bf16.mxu1 %v8616_v10 }
 0xe42   :  { %7876 = vmatpush3.bf16.msra.mxu0 %v8617_v15  ;;  %7898 = vmatpush3.bf16.msra.mxu1 %v8618_v20  ;;  %v1376_v15 = vrot.slane %v9550_v47, %v9561_v56  ;;  %v1384_v20 = vrot.slane %v9550_v47, %v9564_v57 }
 0xe43   :  { %7877 = vmatprep.subr.bf16.mxu0 %v8619_v22  ;;  %7899 = vmatprep.subr.bf16.mxu1 %v8620_v24 }
 0xe46   :  { %7878 = vmatpush3.bf16.msra.mxu0 %v8621_v26  ;;  %7900 = vmatpush3.bf16.msra.mxu1 %v8622_v27 }
 0xe47   :  { %7879 = vmatprep.subr.bf16.mxu0 %v8623_v28  ;;  %7901 = vmatprep.subr.bf16.mxu1 %v8624_v31 }
 0xe4a   :  { %7880 = vmatpush3.bf16.msra.mxu0 %v8625_v32  ;;  %7902 = vmatpush3.bf16.msra.mxu1 %v8626_v33 }
 0xe4b   :  { %7881 = vmatprep.subr.bf16.mxu0 %v8627_v34  ;;  %7903 = vmatprep.subr.bf16.mxu1 %v8628_v36 }
 0xe4e   :  { %7882 = vmatpush3.bf16.msra.mxu0 %v8629_v37  ;;  %7904 = vmatpush3.bf16.msra.mxu1 %v8630_v39  ;;  %v8645_v37 = vld [vmem:[%s11350_s8 + $0x138] sm:$0xff]  }
 0xe4f   :  { %7883 = vmatprep.subr.bf16.mxu0 %v8631_v35  ;;  %7905 = vmatprep.subr.bf16.mxu1 %v8632_v40  ;;  %v8646_v39 = vld [vmem:[%s11350_s8 + $0x1b8] sm:$0xff]  }
 0xe52   :  { %7884 = vmatpush3.bf16.msra.mxu0 %v8633_v41  ;;  %7906 = vmatpush3.bf16.msra.mxu1 %v8634_v42 }
 0xe53   :  { %7885 = vmatprep.subr.bf16.mxu0 %v8635_v43  ;;  %7907 = vmatprep.subr.bf16.mxu1 %v8636_v44  ;;  %v8647_v43 = vld [vmem:[%s11350_s8 + $0x170] sm:$0xff]  }
 0xe54   :  { %v8648_v44 = vld [vmem:[%s11350_s8 + $0x1f0] sm:$0xff]  }
 0xe56   :  { %7886 = vmatpush3.bf16.msra.mxu0 %v8637_v45  ;;  %7908 = vmatpush3.bf16.msra.mxu1 %v8638_v25 }
 0xe57   :  { %7887 = vmatprep.subr.bf16.mxu0 %v8639_v13  ;;  %7909 = vmatprep.subr.bf16.mxu1 %v8640_v46 }
 0xe5a   :  { %7888 = vmatpush3.bf16.msra.mxu0 %v8641_v19  ;;  %7910 = vmatpush3.bf16.msra.mxu1 %v8642_v8 }
 0xe5b   :  { %7917 = vmatprep.subr.bf16.mxu0 %v8643_v11  ;;  %7939 = vmatprep.subr.bf16.mxu1 %v8644_v18  ;;  %v8649_v11 = vld [vmem:[%s11350_s8 + $0x130] sm:$0xff]  }
 0xe5c   :  { %v8650_v18 = vld [vmem:[%s11350_s8 + $0x1b0] sm:$0xff]  }
 0xee5   :  { %v1630_v48 = vpop.f32.mrf.mxu0  ;;  %v1673_v49 = vpop.f32.mrf.mxu1 }
 0xee6   :  { %v1631_v63 = vadd.f32 %v1630_v48, %v1356_v52  ;;  %v1674_v0 = vadd.f32 %v1673_v49, %v1364_v53  ;;  %v8651_v48 = vld [vmem:[%s11350_s8 + $0x168] sm:$0xff]  }
 0xee7   :  { %v1632_v54 = vpop.f32.mrf.mxu0  ;;  %v1675_v29 = vpop.f32.mrf.mxu1 }
 0xee8   :  { %v1633_v58 = vadd.f32 %v1632_v54, %v1360_v50  ;;  %v1676_v59 = vadd.f32 %v1675_v29, %v1368_v51  ;;  %v1940_v28 = vmax.f32 %v1631_v63, 0.0  ;;  %v1942_v31 = vmax.f32 %v1674_v0, 0.0  ;;  %v8658_v0 = vld [vmem:[%s11350_s8 + $0x1a0] sm:$0xff]  }
 0xee9   :  { %v1634_v14 = vpop.f32.mrf.mxu0  ;;  %v1677_v55 = vpop.f32.mrf.mxu1 }
 0xeea   :  { %v1635_v60 = vadd.f32 %v1634_v14, %v1356_v52  ;;  %v1678_v61 = vadd.f32 %v1677_v55, %v1364_v53  ;;  %v1941_v22 = vmax.f32 %v1633_v58, 0.0  ;;  %v1943_v24 = vmax.f32 %v1676_v59, 0.0  ;;  %v8652_v53 = vld [vmem:[%s11350_s8 + $0x1e8] sm:$0xff]   ;;  %v8655_v58 = vld [vmem:[%s11350_s8 + $0x160] sm:$0xff]  }
 0xeeb   :  { %v1636_v1 = vpop.f32.mrf.mxu0  ;;  %v1679_v2 = vpop.f32.mrf.mxu1  ;;  %v8653_v14 = vld [vmem:[%s11350_s8 + $0x128] sm:$0xff]   ;;  %v8656_v59 = vld [vmem:[%s11350_s8 + $0x1e0] sm:$0xff]  }
 0xeec   :  { %v1637_v3 = vadd.f32 %v1636_v1, %v1360_v50  ;;  %v1680_v4 = vadd.f32 %v1679_v2, %v1368_v51  ;;  %v1956_v6 = vmax.f32 %v1635_v60, 0.0  ;;  %v1958_v7 = vmax.f32 %v1678_v61, 0.0  ;;  %v8654_v55 = vld [vmem:[%s11350_s8 + $0x1a8] sm:$0xff]   ;;  %v8657_v61 = vld [vmem:[%s11350_s8 + $0x120] sm:$0xff]   ;;  %v8659_v1 = vld [vmem:[%s11350_s8 + $0x158] sm:$0xff]  }
 0xeed   :  { %v9566_v9 = vpop.f32.mrf.mxu0  ;;  %v9568_v10 = vpop.f32.mrf.mxu1  ;;  %v8660_v2 = vld [vmem:[%s11350_s8 + $0x1d8] sm:$0xff]  }
 0xeee   :  { %v1957_v26 = vmax.f32 %v1637_v3, 0.0  ;;  %v1959_v27 = vmax.f32 %v1680_v4, 0.0  ;;  %v1972_v35 = vpack.c.bf16 %v1956_v6, %v1940_v28  ;;  %v1974_v40 = vpack.c.bf16 %v1958_v7, %v1942_v31  ;;  %v8661_v4 = vld [vmem:[%s11350_s8 + $0x118] sm:$0xff]   ;;  %v8666_v31 = vld [vmem:[%s11350_s8 + $0x190] sm:$0xff]  }
 0xeef   :  { %v1718_v32 = vpop.f32.mrf.mxu0  ;;  %v1761_v33 = vpop.f32.mrf.mxu1  ;;  %v8662_v7 = vld [vmem:[%s11350_s8 + $0x198] sm:$0xff]  }
 0xef0   :  { %v1973_v34 = vpack.c.bf16 %v1957_v26, %v1941_v22  ;;  %v1975_v36 = vpack.c.bf16 %v1959_v27, %v1943_v24  ;;  %v1719_v45 = vadd.f32 %v1718_v32, %v1376_v15  ;;  %v1762_v25 = vadd.f32 %v1761_v33, %v1384_v20  ;;  %v8665_v27 = vld [vmem:[%s11350_s8 + $0x110] sm:$0xff]   ;;  %v8668_v32 = vld [vmem:[%s11350_s8 + $0x1c8] sm:$0xff]  }
 0xef1   :  { %v9580_v41 = vpop.f32.mrf.mxu0  ;;  %v9582_v42 = vpop.f32.mrf.mxu1  ;;  %v9643_v22 = vsub.s32 4, %v9284_v30  ;;  %v9646_v24 = vsub.s32 6, %v9284_v30  ;;  %v8667_v30 = vld [vmem:[%s11350_s8 + $0x148] sm:$0xff]  }
 0xef2   :  { %3048 = vmatprep.mubr.bf16.mxu0 %v1973_v34  ;;  %3089 = vmatprep.mubr.bf16.mxu1 %v1975_v36  ;;  %v1945_v49 = vmax.f32 %v1719_v45, 0.0  ;;  %v1947_v50 = vmax.f32 %v1762_v25, 0.0  ;;  %v9671_v36 = vld [vmem:[%s11349_s7 + $0x10] ss:$2 sm:$0xff] }
 0xef3   :  { %v1722_v13 = vpop.f32.mrf.mxu0  ;;  %v1765_v46 = vpop.f32.mrf.mxu1  ;;  %3049 = vmatmul.mubr.bf16.vlgmr.msra.gmra.mxu0 %v1972_v35  ;;  %3090 = vmatmul.mubr.bf16.vlgmr.msra.gmra.mxu1 %v1974_v40  ;;  %v1372_v33 = vrot.slane %v9550_v47, %v9643_v22  ;;  %v1380_v34 = vrot.slane %v9550_v47, %v9646_v24  ;;  %v1392_v40 = vrot.slane %v9671_v36, %v9343_v17  ;;  %v8670_v47 = vld [vmem:[%s11350_s8 + $0x188] sm:$0xff]  }
 0xef4   :  { %v1723_v19 = vadd.f32 %v1722_v13, %v1376_v15  ;;  %v1766_v8 = vadd.f32 %v1765_v46, %v1384_v20  ;;  %7918 = vmatpush3.bf16.msra.mxu0 %v8645_v37  ;;  %7940 = vmatpush3.bf16.msra.mxu1 %v8646_v39  ;;  %v8663_v15 = vld [vmem:[%s11350_s8 + $0x150] sm:$0xff]   ;;  %v8669_v39 = vld [vmem:[%s11350_s8 + $0x108] sm:$0xff]   ;;  %v1400_v25 = vrot.slane %v9671_v36, %v9545_v12 }
 0xef5   :  { %7919 = vmatprep.subr.bf16.mxu0 %v8647_v43  ;;  %7941 = vmatprep.subr.bf16.mxu1 %v8648_v44  ;;  %v9614_v60 = vpop.f32.mrf.mxu0  ;;  %v9619_v63 = vpop.f32.mrf.mxu1  ;;  %v8664_v20 = vld [vmem:[%s11350_s8 + $0x1d0] sm:$0xff]   ;;  %v1721_v35 = vadd.f32 %v9580_v41, %v1372_v33  ;;  %v8671_v44 = vld [vmem:[%s11350_s8 + $0x140] sm:$0xff]   ;;  %v1764_v45 = vadd.f32 %v9582_v42, %v1380_v34  ;;  %v1717_v13 = vadd.f32 %v9566_v9, %v1372_v33  ;;  %v8675_v9 = vld [vmem:[%s11350_s8 + $0x278] sm:$0xff]  }
 0xef6   :  { %v1961_v51 = vmax.f32 %v1723_v19, 0.0  ;;  %v1963_v52 = vmax.f32 %v1766_v8, 0.0  ;;  %v8672_v41 = vld [vmem:[%s11350_s8 + $0x1c0] sm:$0xff]   ;;  %v1760_v19 = vadd.f32 %v9568_v10, %v1380_v34 }
 0xef7   :  { %v1804_v3 = vpop.f32.mrf.mxu0  ;;  %v1847_v6 = vpop.f32.mrf.mxu1  ;;  %v1960_v42 = vmax.f32 %v1721_v35, 0.0  ;;  %v8689_v33 = vld [vmem:[%s11350_s8 + $0x220] sm:$0xff]   ;;  %v8692_v35 = vld [vmem:[%s11350_s8 + $0x2d8] sm:$0xff]  }
 0xef8   :  { %v1977_v54 = vpack.c.bf16 %v1961_v51, %v1945_v49  ;;  %v1979_v29 = vpack.c.bf16 %v1963_v52, %v1947_v50  ;;  %7920 = vmatpush3.bf16.msra.mxu0 %v8649_v11  ;;  %7942 = vmatpush3.bf16.msra.mxu1 %v8650_v18  ;;  %v8673_v11 = vld [vmem:[%s11350_s8 + $0x100] sm:$0xff]   ;;  %v1805_v18 = vadd.f32 %v1804_v3, %v1392_v40  ;;  %v1962_v49 = vmax.f32 %v1764_v45, 0.0  ;;  %v8676_v50 = vld [vmem:[%s11350_s8 + $0x2f8] sm:$0xff]   ;;  %v8695_v45 = vld [vmem:[%s11350_s8 + $0x250] sm:$0xff]  }
 0xef9   :  { %7921 = vmatprep.subr.bf16.mxu0 %v8651_v48  ;;  %7943 = vmatprep.subr.bf16.mxu1 %v8652_v53  ;;  %v9648_v26 = vpop.f32.mrf.mxu0  ;;  %v9653_v28 = vpop.f32.mrf.mxu1  ;;  %v8674_v48 = vld [vmem:[%s11350_s8 + $0x180] sm:$0xff]   ;;  %v1848_v10 = vadd.f32 %v1847_v6, %v1400_v25  ;;  %v1944_v51 = vmax.f32 %v1717_v13, 0.0  ;;  %v1946_v53 = vmax.f32 %v1760_v19, 0.0  ;;  %v8682_v6 = vld [vmem:[%s11350_s8 + $0x2b0] sm:$0xff]  }
 0xefa   :  { %3130 = vmatprep.mubr.bf16.mxu0 %v1977_v54  ;;  %3171 = vmatprep.mubr.bf16.mxu1 %v1979_v29  ;;  %v8677_v29 = vld [vmem:[%s11350_s8 + $0x238] sm:$0xff]   ;;  %v8697_v13 = vld [vmem:[%s11350_s8 + $0x210] sm:$0xff]  }
 0xefb   :  { %v1808_v37 = vpop.f32.mrf.mxu0  ;;  %v1851_v43 = vpop.f32.mrf.mxu1  ;;  %v8698_v19 = vld [vmem:[%s11350_s8 + $0x290] sm:$0xff]  }
 0xefc   :  { %7922 = vmatpush3.bf16.msra.mxu0 %v8653_v14  ;;  %7944 = vmatpush3.bf16.msra.mxu1 %v8654_v55  ;;  %v1809_v46 = vadd.f32 %v1808_v37, %v1392_v40  ;;  %v1852_v8 = vadd.f32 %v1851_v43, %v1400_v25  ;;  %v1976_v14 = vpack.c.bf16 %v1960_v42, %v1944_v51  ;;  %v1949_v55 = vmax.f32 %v1805_v18, 0.0  ;;  %v8690_v37 = vld [vmem:[%s11350_s8 + $0x2a0] sm:$0xff]   ;;  %v8693_v43 = vld [vmem:[%s11350_s8 + $0x218] sm:$0xff]   ;;  %v8696_v25 = vld [vmem:[%s11350_s8 + $0x2d0] sm:$0xff]  }
 0xefd   :  { %7923 = vmatprep.subr.bf16.mxu0 %v8655_v58  ;;  %7945 = vmatprep.subr.bf16.mxu1 %v8656_v59  ;;  %v8678_v58 = vld [vmem:[%s11350_s8 + $0x2b8] sm:$0xff]   ;;  %v1978_v59 = vpack.c.bf16 %v1962_v49, %v1946_v53  ;;  %v9746_v34 = vpop.f32.mrf.mxu1  ;;  %v1388_v42 = vrot.slane %v9671_v36, %v9287_v21  ;;  %v1396_v18 = vrot.slane %v9671_v36, %v9348_v23  ;;  %v8702_v51 = vld [vmem:[%s11350_s8 + $0x288] sm:$0xff]  }
 0xefe   :  { %v1965_v52 = vmax.f32 %v1809_v46, 0.0  ;;  %v1967_v54 = vmax.f32 %v1852_v8, 0.0  ;;  %v8699_v8 = vld [vmem:[%s11350_s8 + $0x248] sm:$0xff]  }
 0xeff   :  { %v1807_v49 = vadd.f32 %v9648_v26, %v1388_v42  ;;  %v1850_v53 = vadd.f32 %v9653_v28, %v1396_v18  ;;  %v8704_v26 = vld [vmem:[%s11350_s8 + $0x2c0] sm:$0xff]  }
 0xf00   :  { %7924 = vmatpush3.bf16.msra.mxu0 %v8657_v61  ;;  %7946 = vmatpush3.bf16.msra.mxu1 %v8658_v0  ;;  %v1951_v61 = vmax.f32 %v1848_v10, 0.0  ;;  %v8679_v0 = vld [vmem:[%s11350_s8 + $0x270] sm:$0xff]   ;;  %v1408_v10 = vrot.slane %v9671_v36, %v9561_v56 }
 0xf01   :  { %7925 = vmatprep.subr.bf16.mxu0 %v8659_v1  ;;  %7947 = vmatprep.subr.bf16.mxu1 %v8660_v2  ;;  %v1981_v1 = vpack.c.bf16 %v1965_v52, %v1949_v55  ;;  %v8680_v2 = vld [vmem:[%s11350_s8 + $0x2f0] sm:$0xff]   ;;  %v8703_v52 = vld [vmem:[%s11350_s8 + $0x240] sm:$0xff]   ;;  %v1846_v55 = vadd.f32 %v9619_v63, %v1396_v18  ;;  %v1964_v28 = vmax.f32 %v1807_v49, 0.0  ;;  %v8723_v18 = vld [vmem:[%s11350_s8 + $0x358] sm:$0xff]  }
 0xf02   :  { %v1983_v3 = vpack.c.bf16 %v1967_v54, %v1951_v61  ;;  %v1416_v54 = vrot.slane %v9671_v36, %v9564_v57  ;;  %v8726_v49 = vld [vmem:[%s11350_s8 + $0x398] sm:$0xff]  }
 0xf04   :  { %7926 = vmatpush3.bf16.msra.mxu0 %v8661_v4  ;;  %7948 = vmatpush3.bf16.msra.mxu1 %v8662_v7  ;;  %v8681_v4 = vld [vmem:[%s11350_s8 + $0x230] sm:$0xff]   ;;  %v8683_v7 = vld [vmem:[%s11350_s8 + $0x268] sm:$0xff]  }
 0xf05   :  { %7927 = vmatprep.subr.bf16.mxu0 %v8663_v15  ;;  %7949 = vmatprep.subr.bf16.mxu1 %v8664_v20  ;;  %v8684_v15 = vld [vmem:[%s11350_s8 + $0x2e8] sm:$0xff]  }
 0xf06   :  { %v8685_v20 = vld [vmem:[%s11350_s8 + $0x228] sm:$0xff]  }
 0xf08   :  { %7928 = vmatpush3.bf16.msra.mxu0 %v8665_v27  ;;  %7950 = vmatpush3.bf16.msra.mxu1 %v8666_v31  ;;  %v8686_v27 = vld [vmem:[%s11350_s8 + $0x2a8] sm:$0xff]   ;;  %v8687_v31 = vld [vmem:[%s11350_s8 + $0x260] sm:$0xff]  }
 0xf09   :  { %7929 = vmatprep.subr.bf16.mxu0 %v8667_v30  ;;  %7951 = vmatprep.subr.bf16.mxu1 %v8668_v32  ;;  %v8688_v30 = vld [vmem:[%s11350_s8 + $0x2e0] sm:$0xff]   ;;  %v9741_v32 = vpop.f32.mrf.mxu0 }
 0xf0b   :  { %v1890_v40 = vpop.f32.mrf.mxu0 }
 0xf0c   :  { %7930 = vmatpush3.bf16.msra.mxu0 %v8669_v39  ;;  %7952 = vmatpush3.bf16.msra.mxu1 %v8670_v47  ;;  %v8691_v39 = vld [vmem:[%s11350_s8 + $0x258] sm:$0xff]   ;;  %v1933_v47 = vpop.f32.mrf.mxu1  ;;  %v1891_v61 = vadd.f32 %v1890_v40, %v1408_v10 }
 0xf0d   :  { %7931 = vmatprep.subr.bf16.mxu0 %v8671_v44  ;;  %7953 = vmatprep.subr.bf16.mxu1 %v8672_v41  ;;  %v8694_v44 = vld [vmem:[%s11350_s8 + $0x298] sm:$0xff]   ;;  %v9769_v41 = vpop.f32.mrf.mxu0  ;;  %v1934_v63 = vadd.f32 %v1933_v47, %v1416_v54  ;;  %v8714_v47 = vld [vmem:[%s11350_s8 + $0x3b0] sm:$0xff]  }
 0xf0e   :  { %v9774_v46 = vpop.f32.mrf.mxu1 }
 0xf10   :  { %7932 = vmatpush3.bf16.msra.mxu0 %v8673_v11  ;;  %7954 = vmatpush3.bf16.msra.mxu1 %v8674_v48  ;;  %v8700_v11 = vld [vmem:[%s11350_s8 + $0x2c8] sm:$0xff]   ;;  %v1894_v48 = vpop.f32.mrf.mxu0 }
 0xf11   :  { %7961 = vmatprep.subr.bf16.mxu0 %v8675_v9  ;;  %7983 = vmatprep.subr.bf16.mxu1 %v8676_v50  ;;  %v8701_v9 = vld [vmem:[%s11350_s8 + $0x208] sm:$0xff]   ;;  %v1937_v50 = vpop.f32.mrf.mxu1 }
 0xf13   :  { %3131 = vmatmul.mubr.bf16.vlgmr.msra.gmra.mxu0 %v1976_v14  ;;  %3172 = vmatmul.mubr.bf16.vlgmr.msra.gmra.mxu1 %v1978_v59  ;;  %v1895_v14 = vadd.f32 %v1894_v48, %v1408_v10  ;;  %v8705_v59 = vld [vmem:[%s11350_s8 + $0x200] sm:$0xff]   ;;  %v8724_v48 = vld [vmem:[%s11350_s8 + $0x3d8] sm:$0xff]   ;;  %v8727_v10 = vld [vmem:[%s11350_s8 + $0x350] sm:$0xff]  }
 0xf14   :  { %7962 = vmatpush3.bf16.msra.mxu0 %v8677_v29  ;;  %3212 = vmatprep.mubr.bf16.mxu0 %v1981_v1  ;;  %v1803_v29 = vadd.f32 %v9614_v60, %v1388_v42  ;;  %v8707_v60 = vld [vmem:[%s11350_s8 + $0x378] sm:$0xff]   ;;  %v1966_v1 = vmax.f32 %v1850_v53, 0.0  ;;  %v8722_v42 = vld [vmem:[%s11350_s8 + $0x3a0] sm:$0xff]   ;;  %v8731_v53 = vld [vmem:[%s11350_s8 + $0x348] sm:$0xff]  }
 0xf15   :  { %7984 = vmatpush3.bf16.msra.mxu1 %v8678_v58  ;;  %3253 = vmatprep.mubr.bf16.mxu1 %v1983_v3  ;;  %v1938_v58 = vadd.f32 %v1937_v50, %v1416_v54  ;;  %v8728_v50 = vld [vmem:[%s11350_s8 + $0x3d0] sm:$0xff]   ;;  %v8732_v54 = vld [vmem:[%s11350_s8 + $0x3c8] sm:$0xff]  }
 0xf16   :  { %7963 = vmatprep.subr.bf16.mxu0 %v8679_v0  ;;  %7985 = vmatprep.subr.bf16.mxu1 %v8680_v2  ;;  %v8706_v0 = vld [vmem:[%s11350_s8 + $0x280] sm:$0xff]   ;;  %v8708_v2 = vld [vmem:[%s11350_s8 + $0x3f8] sm:$0xff]   ;;  %v1948_v3 = vmax.f32 %v1803_v29, 0.0  ;;  %v1412_v29 = vrot.slane %v9671_v36, %v9646_v24 }
 0xf18   :  { %7964 = vmatpush3.bf16.msra.mxu0 %v8681_v4  ;;  %v1969_v4 = vmax.f32 %v1895_v14, 0.0  ;;  %v8733_v14 = vld [vmem:[%s11350_s8 + $0x308] sm:$0xff]  }
 0xf19   :  { %7986 = vmatpush3.bf16.msra.mxu1 %v8682_v6  ;;  %7965 = vmatprep.subr.bf16.mxu0 %v8683_v7  ;;  %v1950_v6 = vmax.f32 %v1846_v55, 0.0  ;;  %v1971_v7 = vmax.f32 %v1938_v58, 0.0  ;;  %v8734_v58 = vld [vmem:[%s11350_s8 + $0x388] sm:$0xff]  }
 0xf1a   :  { %7987 = vmatprep.subr.bf16.mxu1 %v8684_v15  ;;  %v8709_v15 = vld [vmem:[%s11350_s8 + $0x338] sm:$0xff]  }
 0xf1c   :  { %7966 = vmatpush3.bf16.msra.mxu0 %v8685_v20  ;;  %v1980_v20 = vpack.c.bf16 %v1964_v28, %v1948_v3  ;;  %v1936_v28 = vadd.f32 %v9774_v46, %v1412_v29  ;;  %v8738_v46 = vld [vmem:[%s11350_s8 + $0x380] sm:$0xff]  }
 0xf1d   :  { %7988 = vmatpush3.bf16.msra.mxu1 %v8686_v27  ;;  %7967 = vmatprep.subr.bf16.mxu0 %v8687_v31  ;;  %v1953_v27 = vmax.f32 %v1891_v61, 0.0  ;;  %v8710_v31 = vld [vmem:[%s11350_s8 + $0x3b8] sm:$0xff]  }
 0xf1e   :  { %7989 = vmatprep.subr.bf16.mxu1 %v8688_v30  ;;  %v1982_v30 = vpack.c.bf16 %v1966_v1, %v1950_v6  ;;  %v1970_v1 = vmax.f32 %v1936_v28, 0.0 }
 0xf20   :  { %7968 = vmatpush3.bf16.msra.mxu0 %v8689_v33  ;;  %v1955_v33 = vmax.f32 %v1934_v63, 0.0 }
 0xf21   :  { %7990 = vmatpush3.bf16.msra.mxu1 %v8690_v37  ;;  %7969 = vmatprep.subr.bf16.mxu0 %v8691_v39  ;;  %v8711_v37 = vld [vmem:[%s11350_s8 + $0x370] sm:$0xff]   ;;  %v1985_v39 = vpack.c.bf16 %v1969_v4, %v1953_v27 }
 0xf22   :  { %7991 = vmatprep.subr.bf16.mxu1 %v8692_v35  ;;  %v8712_v35 = vld [vmem:[%s11350_s8 + $0x3f0] sm:$0xff]   ;;  %v1987_v40 = vpack.c.bf16 %v1971_v7, %v1955_v33 }
 0xf24   :  { %7970 = vmatpush3.bf16.msra.mxu0 %v8693_v43  ;;  %v8713_v43 = vld [vmem:[%s11350_s8 + $0x330] sm:$0xff]  }
 0xf25   :  { %7992 = vmatpush3.bf16.msra.mxu1 %v8694_v44  ;;  %7971 = vmatprep.subr.bf16.mxu0 %v8695_v45  ;;  %v8715_v44 = vld [vmem:[%s11350_s8 + $0x368] sm:$0xff]  }
 0xf26   :  { %7993 = vmatprep.subr.bf16.mxu1 %v8696_v25  ;;  %v8716_v45 = vld [vmem:[%s11350_s8 + $0x3e8] sm:$0xff]  }
 0xf27   :  { %v8717_v25 = vld [vmem:[%s11350_s8 + $0x328] sm:$0xff]  }
 0xf28   :  { %7972 = vmatpush3.bf16.msra.mxu0 %v8697_v13  ;;  %v8718_v13 = vld [vmem:[%s11350_s8 + $0x3a8] sm:$0xff]  }
 0xf29   :  { %7994 = vmatpush3.bf16.msra.mxu1 %v8698_v19  ;;  %7973 = vmatprep.subr.bf16.mxu0 %v8699_v8  ;;  %v8719_v19 = vld [vmem:[%s11350_s8 + $0x360] sm:$0xff]  }
 0xf2a   :  { %7995 = vmatprep.subr.bf16.mxu1 %v8700_v11  ;;  %v8720_v8 = vld [vmem:[%s11350_s8 + $0x3e0] sm:$0xff]  }
 0xf2b   :  { %v8721_v11 = vld [vmem:[%s11350_s8 + $0x320] sm:$0xff]  }
 0xf2c   :  { %7974 = vmatpush3.bf16.msra.mxu0 %v8701_v9  ;;  %v8725_v9 = vld [vmem:[%s11350_s8 + $0x318] sm:$0xff]  }
 0xf2d   :  { %7996 = vmatpush3.bf16.msra.mxu1 %v8702_v51  ;;  %7975 = vmatprep.subr.bf16.mxu0 %v8703_v52  ;;  %v8729_v51 = vld [vmem:[%s11350_s8 + $0x310] sm:$0xff]  }
 0xf2e   :  { %7997 = vmatprep.subr.bf16.mxu1 %v8704_v26  ;;  %v8730_v52 = vld [vmem:[%s11350_s8 + $0x390] sm:$0xff]   ;;  %v1404_v26 = vrot.slane %v9671_v36, %v9643_v22  ;;  %v8736_v36 = vld [vmem:[%s11350_s8 + $0x3c0] sm:$0xff]  }
 0xf30   :  { %7976 = vmatpush3.bf16.msra.mxu0 %v8705_v59  ;;  %v1893_v55 = vadd.f32 %v9769_v41, %v1404_v26  ;;  %v8735_v59 = vld [vmem:[%s11350_s8 + $0x340] sm:$0xff]   ;;  %v1889_v61 = vadd.f32 %v9741_v32, %v1404_v26  ;;  %v1932_v41 = vadd.f32 %v9746_v34, %v1412_v29 }
 0xf31   :  { %7998 = vmatpush3.bf16.msra.mxu1 %v8706_v0  ;;  %8005 = vmatprep.subr.bf16.mxu0 %v8707_v60  ;;  %v8737_v0 = vld [vmem:[%s11350_s8 + $0x300] sm:$0xff]  }
 0xf32   :  { %8027 = vmatprep.subr.bf16.mxu1 %v8708_v2  ;;  %v1968_v60 = vmax.f32 %v1893_v55, 0.0  ;;  %v1952_v63 = vmax.f32 %v1889_v61, 0.0  ;;  %v1954_v2 = vmax.f32 %v1932_v41, 0.0 }
 0xf33   :  { %3213 = vmatmul.mubr.bf16.vlgmr.msra.gmra.mxu0 %v1980_v20 }
 0xf34   :  { %3254 = vmatmul.mubr.bf16.vlgmr.msra.gmra.mxu1 %v1982_v30  ;;  %8006 = vmatpush3.bf16.msra.mxu0 %v8709_v15  ;;  %v1984_v32 = vpack.c.bf16 %v1968_v60, %v1952_v63  ;;  %v1986_v34 = vpack.c.bf16 %v1970_v1, %v1954_v2 }
 0xf35   :  { %3294 = vmatprep.mubr.bf16.mxu0 %v1985_v39  ;;  %8028 = vmatpush3.bf16.msra.mxu1 %v8710_v31 }
 0xf36   :  { %3335 = vmatprep.mubr.bf16.mxu1 %v1987_v40  ;;  %8007 = vmatprep.subr.bf16.mxu0 %v8711_v37 }
 0xf37   :  { %8029 = vmatprep.subr.bf16.mxu1 %v8712_v35 }
 0xf38   :  { %8008 = vmatpush3.bf16.msra.mxu0 %v8713_v43 }
 0xf39   :  { %8030 = vmatpush3.bf16.msra.mxu1 %v8714_v47  ;;  %8009 = vmatprep.subr.bf16.mxu0 %v8715_v44  ;;  %v9928_v47 = vld [vmem:[%s11347_s5] sm:$0x3f] }
 0xf3a   :  { %8031 = vmatprep.subr.bf16.mxu1 %v8716_v45  ;;  %v2247_v44 = vrot.slane %v9928_v47, %v9545_v12 }
 0xf3c   :  { %8010 = vmatpush3.bf16.msra.mxu0 %v8717_v25 }
 0xf3d   :  { %8032 = vmatpush3.bf16.msra.mxu1 %v8718_v13  ;;  %8011 = vmatprep.subr.bf16.mxu0 %v8719_v19 }
 0xf3e   :  { %8033 = vmatprep.subr.bf16.mxu1 %v8720_v8 }
 0xf40   :  { %8012 = vmatpush3.bf16.msra.mxu0 %v8721_v11 }
 0xf41   :  { %8034 = vmatpush3.bf16.msra.mxu1 %v8722_v42  ;;  %8013 = vmatprep.subr.bf16.mxu0 %v8723_v18 }
 0xf42   :  { %8035 = vmatprep.subr.bf16.mxu1 %v8724_v48 }
 0xf44   :  { %8014 = vmatpush3.bf16.msra.mxu0 %v8725_v9 }
 0xf45   :  { %8036 = vmatpush3.bf16.msra.mxu1 %v8726_v49  ;;  %8015 = vmatprep.subr.bf16.mxu0 %v8727_v10 }
 0xf46   :  { %8037 = vmatprep.subr.bf16.mxu1 %v8728_v50 }
 0xf48   :  { %8016 = vmatpush3.bf16.msra.mxu0 %v8729_v51 }
 0xf49   :  { %8038 = vmatpush3.bf16.msra.mxu1 %v8730_v52  ;;  %8017 = vmatprep.subr.bf16.mxu0 %v8731_v53 }
 0xf4a   :  { %8039 = vmatprep.subr.bf16.mxu1 %v8732_v54 }
 0xf4c   :  { %8018 = vmatpush3.bf16.msra.mxu0 %v8733_v14 }
 0xf4d   :  { %8040 = vmatpush3.bf16.msra.mxu1 %v8734_v58  ;;  %8019 = vmatprep.subr.bf16.mxu0 %v8735_v59 }
 0xf4e   :  { %8041 = vmatprep.subr.bf16.mxu1 %v8736_v36 }
 0xf50   :  { %8020 = vmatpush3.bf16.msra.mxu0 %v8737_v0 }
 0xf51   :  { %8042 = vmatpush3.bf16.msra.mxu1 %v8738_v46  ;;  %8405 = vmatprep.subr.bf16.mxu0 %v11355_v5 }
 0xf52   :  { %8413 = vmatprep.subr.bf16.mxu1 %v11355_v5 }
 0xf53   :  { %3295 = vmatmul.mubr.bf16.vlgmr.msra.gmra.mxu0 %v1984_v32 }
 0xf54   :  { %3336 = vmatmul.mubr.bf16.vlgmr.msra.gmra.mxu1 %v1986_v34  ;;  %8409 = vmatprep.mubr.msk.bf16.mxu0 %vm8975_vm3, %v11355_v5 }
 0xf55   :  { %8415 = vmatprep.mubr.msk.bf16.mxu1 %vm8975_vm3, %v11355_v5 }
 0xfb3   :  { %v7889_v3 = vpop.f32.mrf.mxu0  ;;  %v7911_v4 = vpop.f32.mrf.mxu1 }
 0xfb5   :  { %v7890_v6 = vpop.f32.mrf.mxu0  ;;  %v7912_v7 = vpop.f32.mrf.mxu1 }
 0xfb6   :  { %v7891_v45 = vadd.f32 %v7890_v6, %v7889_v3  ;;  %v7913_v18 = vadd.f32 %v7912_v7, %v7911_v4 }
 0xfb7   :  { %v7892_v15 = vpop.f32.mrf.mxu0  ;;  %v7914_v20 = vpop.f32.mrf.mxu1 }
 0xfb8   :  { %v3051_v19 = vadd.f32 %v7891_v45, %v2247_v44 }
 0xfb9   :  { %v7893_v27 = vpop.f32.mrf.mxu0  ;;  %v7915_v30 = vpop.f32.mrf.mxu1 }
 0xfba   :  { %v7894_v8 = vadd.f32 %v7893_v27, %v7892_v15  ;;  %v3092_v9 = vadd.f32 %v7913_v18, %v3051_v19  ;;  %v7916_v51 = vadd.f32 %v7915_v30, %v7914_v20 }
 0xfbc   :  { %v3054_v49 = vadd.f32 %v7894_v8, %v2247_v44 }
 0xfbe   :  { %v3095_v54 = vadd.f32 %v7916_v51, %v3054_v49 }
 0xfd3   :  { %v7933_v31 = vpop.f32.mrf.mxu0  ;;  %v7955_v33 = vpop.f32.mrf.mxu1 }
 0xfd5   :  { %v7934_v37 = vpop.f32.mrf.mxu0  ;;  %v7956_v39 = vpop.f32.mrf.mxu1 }
 0xfd6   :  { %v7935_v48 = vadd.f32 %v7934_v37, %v7933_v31  ;;  %v7957_v26 = vadd.f32 %v7956_v39, %v7955_v33 }
 0xfd7   :  { %v7936_v35 = vpop.f32.mrf.mxu0  ;;  %v7958_v40 = vpop.f32.mrf.mxu1 }
 0xfd8   :  { %v3133_v52 = vadd.f32 %v7935_v48, %v3092_v9 }
 0xfd9   :  { %v7937_v43 = vpop.f32.mrf.mxu0  ;;  %v7959_v13 = vpop.f32.mrf.mxu1 }
 0xfda   :  { %v7938_v53 = vadd.f32 %v7937_v43, %v7936_v35  ;;  %v3174_v58 = vadd.f32 %v7957_v26, %v3133_v52  ;;  %v7960_v28 = vadd.f32 %v7959_v13, %v7958_v40 }
 0xfdc   :  { %v3136_v59 = vadd.f32 %v7938_v53, %v3095_v54 }
 0xfde   :  { %v3177_v60 = vadd.f32 %v7960_v28, %v3136_v59 }
 0xff3   :  { %v7977_v25 = vpop.f32.mrf.mxu0 }
 0xff4   :  { %v7999_v11 = vpop.f32.mrf.mxu1 }
 0xff5   :  { %v7978_v42 = vpop.f32.mrf.mxu0 }
 0xff6   :  { %v8000_v10 = vpop.f32.mrf.mxu1  ;;  %v7979_v29 = vadd.f32 %v7978_v42, %v7977_v25 }
 0xff7   :  { %v7980_v50 = vpop.f32.mrf.mxu0  ;;  %v8001_v46 = vadd.f32 %v8000_v10, %v7999_v11  ;;  %v9947_v10 = vld [vmem:[%s11345_s3 + $0x10] sm:$0xff]  }
 0xff8   :  { %v8002_v14 = vpop.f32.mrf.mxu1  ;;  %v3215_v36 = vadd.f32 %v7979_v29, %v3174_v58 }
 0xff9   :  { %v7981_v55 = vpop.f32.mrf.mxu0 }
 0xffa   :  { %v7982_v61 = vadd.f32 %v7981_v55, %v7980_v50  ;;  %v8003_v41 = vpop.f32.mrf.mxu1  ;;  %v3256_v2 = vadd.f32 %v8001_v46, %v3215_v36  ;;  %v3375_v55 = vrot.slane %v9928_v47, %v9643_v22  ;;  %v3381_v36 = vrot.slane %v9928_v47, %v9561_v56  ;;  %v7592_v46 = vld [vmem:[%s11346_s4 + $0x1] ss:$0 sm:$0xff] }
 0xffb   :  { %v8004_v6 = vadd.f32 %v8003_v41, %v8002_v14 }
 0xffc   :  { %v3218_v32 = vadd.f32 %v7982_v61, %v3177_v60 }
 0xffe   :  { %v3259_v31 = vadd.f32 %v8004_v6, %v3218_v32 }
0x1013   :  { %v8021_v0 = vpop.f32.mrf.mxu0 }
0x1014   :  { %v8043_v1 = vpop.f32.mrf.mxu1 }
0x1015   :  { %v8022_v63 = vpop.f32.mrf.mxu0 }
0x1016   :  { %v8023_v34 = vadd.f32 %v8022_v63, %v8021_v0  ;;  %v8044_v3 = vpop.f32.mrf.mxu1 }
0x1017   :  { %v8024_v4 = vpop.f32.mrf.mxu0  ;;  %v8045_v15 = vadd.f32 %v8044_v3, %v8043_v1 }
0x1018   :  { %v3297_v7 = vadd.f32 %v8023_v34, %v3256_v2  ;;  %v8046_v20 = vpop.f32.mrf.mxu1 }
0x1019   :  { %v8025_v27 = vpop.f32.mrf.mxu0 }
0x101a   :  { %v3338_v30 = vadd.f32 %v8045_v15, %v3297_v7  ;;  %v8026_v33 = vadd.f32 %v8025_v27, %v8024_v4  ;;  %v8047_v37 = vpop.f32.mrf.mxu1 }
0x101b   :  { %v8048_v35 = vadd.f32 %v8047_v37, %v8046_v20 }
0x101c   :  { %v3300_v39 = vadd.f32 %v8026_v33, %v3259_v31  ;;  %v3344_v40 = vadd.f32 %v3338_v30, %v9364_v16  ;;  %v9991_v33 = vld [vmem:[%s11343_s1] sm:$0xff]  ;;  %s11368_s1 = smov 8  }
0x101e   :  { %v3341_v43 = vadd.f32 %v8048_v35, %v3300_v39  ;;  %v3346_v44 = vsel %vm245_vm4, %v3344_v40, 0.0 }
0x101f   :  { %3347 = vadd.xlane.f32.xlu0 %v3346_v44 }
0x1020   :  { %v3345_v45 = vadd.f32 %v3341_v43, %v9366_v38  ;;  %v9941_v38 = vld [vmem:[%s11345_s3 + $0x18] sm:$0xff]  }
0x1021   :  { %8406 = vmatpush3.bf16.msra.mxu0 %v9941_v38 }
0x1022   :  { %v3349_v25 = vsel %vm245_vm4, %v3345_v45, 0.0  ;;  %8407 = vmatprep.subr.bf16.mxu0 %v11355_v5 }
0x1023   :  { %3350 = vadd.xlane.f32.xlu1 %v3349_v25 }
0x1025   :  { %8408 = vmatpush3.bf16.msra.mxu0 %v9947_v10 }
0x1026   :  { %8419 = vmatprep.subr.bf16.mxu0 %v11355_v5 }
0x10a8   :  { %v3348_v13 = vpop.xlane.xlu0 %3347 }
0x10a9   :  { %v3352_v19 = vmul.f32 0.03125, %v3348_v13 }
0x10ab   :  { %v3354_v8 = vsub.f32 %v3344_v40, %v3352_v19 }
0x10ac   :  { %v3351_v11 = vpop.xlane.xlu1 %3350 }
0x10ad   :  { %v3353_v42 = vmul.f32 0.03125, %v3351_v11  ;;  %v3356_v18 = vmul.f32 %v3354_v8, %v3354_v8 }
0x10af   :  { %v3355_v48 = vsub.f32 %v3345_v45, %v3353_v42  ;;  %v3358_v9 = vsel %vm245_vm4, %v3356_v18, 0.0 }
0x10b0   :  { %3359 = vadd.xlane.f32.xlu0 %v3358_v9 }
0x10b1   :  { %v3357_v16 = vmul.f32 %v3355_v48, %v3355_v48 }
0x10b3   :  { %v3361_v49 = vsel %vm245_vm4, %v3357_v16, 0.0 }
0x10b4   :  { %3362 = vadd.xlane.f32.xlu1 %v3361_v49 }
0x1139   :  { %v3360_v50 = vpop.xlane.xlu0 %3359 }
0x113a   :  { %v3364_v51 = vmul.f32 0.03125, %v3360_v50 }
0x113c   :  { %v3366_v52 = vadd.f32 1e-05, %v3364_v51 }
0x113d   :  { %v3363_v53 = vpop.xlane.xlu1 %3362 }
0x113e   :  { %8905 = vrsqrt.f32 %v3366_v52  ;;  %v3365_v54 = vmul.f32 0.03125, %v3363_v53 }
0x1140   :  { %v3367_v26 = vadd.f32 1e-05, %v3365_v54 }
0x1142   :  { %8907 = vrsqrt.f32 %v3367_v26 }
0x114b   :  { %v8906_v29 = vpop.eup %8905 }
0x114c   :  { %v3370_v14 = vmul.f32 %v8906_v29, %v3354_v8 }
0x114e   :  { %v3376_v28 = vmul.f32 %v3375_v55, %v3370_v14 }
0x114f   :  { %v8908_v58 = vpop.eup %8907 }
0x1150   :  { %v3371_v59 = vmul.f32 %v8908_v58, %v3355_v48  ;;  %v9956_v41 = vadd.f32 %v3381_v36, %v3376_v28 }
0x1152   :  { %v3377_v61 = vmul.f32 %v3375_v55, %v3371_v59 }
0x1154   :  { %v9958_v0 = vadd.f32 %v3381_v36, %v3377_v61 }
0x1156   :  { %v3391_v60 = vpack.c.bf16 %v9958_v0, %v9956_v41 }
0x1158   :  { %8410 = vmatmul.mubr.msk.bf16.vlgmr.msra.gmra.mxu0 %vm245_vm4, %v3391_v60 }
0x1159   :  { %8421 = vmatprep.mubr.msk.bf16.mxu0 %vm8975_vm3, %v11355_v5 }
0x1218   :  { %v3449_v1 = vpop.f32.mrf.mxu0 }
0x1219   :  { %v3450_v63 = vadd.f32 %v7592_v46, %v3449_v1 }
0x121a   :  { %v8411_v47 = vpop.f32.mrf.mxu0 }
0x121b   :  { %v9968_v2 = vpack.c.bf16 %v3450_v63, %v3450_v63 }
0x121c   :  { %v3452_v32 = vpop.f32.mrf.mxu0 }
0x121d   :  { %v3453_v34 = vadd.f32 %v7592_v46, %v3452_v32  ;;  %3459 = vrot.lane.b32.xlu0 %v9968_v2, %s8976_s28 }
0x121e   :  { %v8412_v3 = vpop.f32.mrf.mxu0 }
0x121f   :  { %v9972_v4 = vpack.c.bf16 %v3453_v34, %v3453_v34 }
0x1221   :  { %3508 = vrot.lane.b32.xlu1 %v9972_v4, %s8976_s28 }
0x128f   :  { %v3460_v6 = vpop.permute.xlu0 %3459 }
0x1290   :  { %v3465_v7 = vsel %vm295_vm5, %v3460_v6, 0 }
0x1291   :  { %8414 = vmatpush3.bf16.xpose.msra.mxu1 %v3465_v7 }
0x1292   :  { %8425 = vmatprep.subr.bf16.mxu1 %v11355_v5 }
0x1293   :  { %v3509_v15 = vpop.permute.xlu1 %3508 }
0x1294   :  { %v3514_v20 = vsel %vm295_vm5, %v3509_v15, 0 }
0x1295   :  { %8420 = vmatpush3.bf16.xpose.msra.mxu0 %v3514_v20 }
0x1296   :  { %8431 = vmatprep.subr.bf16.mxu0 %v11355_v5 }
0x1298   :  { %8416 = vmatmul.mubr.msk.bf16.vlgmr.msra.gmra.mxu1 %vm295_vm5, %v9968_v2 }
0x1299   :  { %8427 = vmatprep.mubr.msk.bf16.mxu1 %vm8975_vm3, %v11355_v5 }
0x129c   :  { %8422 = vmatmul.mubr.msk.bf16.vlgmr.msra.gmra.mxu0 %vm295_vm5, %v9972_v4 }
0x129d   :  { %8433 = vmatprep.mubr.msk.bf16.mxu0 %vm8975_vm3, %v11355_v5 }
0x1358   :  { %v3501_v27 = vpop.f32.mrf.mxu1 }
0x1359   :  { %v3556_v31 = vmul.f32 0.35355338, %v3501_v27 }
0x135a   :  { %v8417_v30 = vpop.f32.mrf.mxu1 }
0x135b   :  { %v3558_v37 = vadd.f32 %v9991_v33, %v3556_v31 }
0x135c   :  { %v3504_v39 = vpop.f32.mrf.mxu1  ;;  %v3550_v35 = vpop.f32.mrf.mxu0 }
0x135d   :  { %v3557_v40 = vmul.f32 0.35355338, %v3550_v35  ;;  %v3560_v43 = vsel %vm295_vm5, %v3558_v37, -inf }
0x135e   :  { %v8418_v44 = vpop.f32.mrf.mxu1  ;;  %3561 = vmax.xlane.f32.xlu1 %v3560_v43  ;;  %v8423_v45 = vpop.f32.mrf.mxu0 }
0x135f   :  { %v3559_v25 = vadd.f32 %v9991_v33, %v3557_v40 }
0x1360   :  { %v3553_v13 = vpop.f32.mrf.mxu0 }
0x1361   :  { %v3563_v19 = vsel %vm295_vm5, %v3559_v25, -inf }
0x1362   :  { %3564 = vmax.xlane.f32.xlu0 %v3563_v19  ;;  %v8424_v8 = vpop.f32.mrf.mxu0 }
0x136f   :  { %3632 = vrot.lane.b32.xlu1 %v9972_v4, %s8977_s10 }
0x1378   :  { %3584 = vrot.lane.b32.xlu0 %v9968_v2, %s8977_s10  ;;  %s11369_s10 = smov 16  }
0x13e7   :  { %v3562_v11 = vpop.xlane.xlu1 %3561 }
0x13e8   :  { %v3566_v42 = vsub.f32 %v3558_v37, %v3562_v11 }
0x13ea   :  { %v3568_v18 = vmul.f32 1.442695, %v3566_v42 }
0x13eb   :  { %v3633_v48 = vpop.permute.xlu1 %3632  ;;  %v3565_v9 = vpop.xlane.xlu0 %3564 }
0x13ec   :  { %8909 = vpow2.f32 %v3568_v18  ;;  %v3638_v16 = vsel %vm424_vm6, %v3633_v48, 0  ;;  %v3567_v49 = vsub.f32 %v3559_v25, %v3565_v9 }
0x13ed   :  { %8432 = vmatpush3.bf16.msra.mxu0 %v3638_v16 }
0x13ee   :  { %v3570_v50 = vmul.f32 1.442695, %v3567_v49  ;;  %8443 = vmatprep.subr.bf16.mxu0 %v11355_v5 }
0x13ef   :  { %v3585_v51 = vpop.permute.xlu0 %3584 }
0x13f0   :  { %8911 = vpow2.f32 %v3570_v50  ;;  %v3590_v52 = vsel %vm424_vm6, %v3585_v51, 0 }
0x13f1   :  { %8426 = vmatpush3.bf16.msra.mxu1 %v3590_v52 }
0x13f2   :  { %8437 = vmatprep.subr.bf16.mxu1 %v11355_v5 }
0x13f9   :  { %v8910_v53 = vpop.eup %8909 }
0x13fa   :  { %v3572_v54 = vsel %vm295_vm5, %v8910_v53, 0.0 }
0x13fb   :  { %3573 = vadd.xlane.f32.xlu0 %v3572_v54 }
0x13fd   :  { %v8912_v26 = vpop.eup %8911 }
0x13fe   :  { %v3575_v29 = vsel %vm295_vm5, %v8912_v26, 0.0 }
0x13ff   :  { %3576 = vadd.xlane.f32.xlu1 %v3575_v29 }
0x1410   :  { %3682 = vrot.lane.b32.xlu1 %v9968_v2, %s8978_s11 }
0x1411   :  { %3732 = vrot.lane.b32.xlu0 %v9972_v4, %s8978_s11  ;;  %s11370_s11 = smov 24  }
0x1414   :  { %3680 = vrot.lane.b32.xlu1 %v9968_v2, %s8979_s12 }
0x1415   :  { %3730 = vrot.lane.b32.xlu0 %v9972_v4, %s8979_s12 }
0x1484   :  { %v3574_v14 = vpop.xlane.xlu0 %3573 }
0x1485   :  { %8913 = vrcp.f32 %v3574_v14 }
0x1488   :  { %v3577_v55 = vpop.xlane.xlu1 %3576  ;;  %v3733_v1 = vpop.permute.xlu0 %3732 }
0x1489   :  { %8915 = vrcp.f32 %v3577_v55  ;;  %v3738_v47 = vsel %vm295_vm5, %v3733_v1, 0 }
0x148c   :  { %v3683_v28 = vpop.permute.xlu1 %3682  ;;  %v3731_v34 = vpop.permute.xlu0 %3730 }
0x148d   :  { %v3688_v60 = vsel %vm295_vm5, %v3683_v28, 0 }
0x1490   :  { %v3681_v32 = vpop.permute.xlu1 %3680 }
0x1492   :  { %v8914_v58 = vpop.eup %8913 }
0x1493   :  { %v3579_v59 = vmul.f32 %v8914_v58, %v8910_v53 }
0x1495   :  { %v3582_v36 = vpack.c.bf16 %v3579_v59, %v3579_v59 }
0x1496   :  { %v8916_v61 = vpop.eup %8915 }
0x1497   :  { %8428 = vmatmul.mubr.msk.bf16.vlgmr.msra.gmra.mxu1 %vm295_vm5, %v3582_v36  ;;  %v3581_v46 = vmul.f32 %v8916_v61, %v8912_v26 }
0x1498   :  { %8438 = vmatpush3.bf16.xpose.msra.mxu1 %v3688_v60  ;;  %8439 = vmatprep.mubr.msk.bf16.mxu1 %vm8975_vm3, %v11355_v5 }
0x1499   :  { %v3583_v63 = vpack.c.bf16 %v3581_v46, %v3581_v46  ;;  %8449 = vmatprep.subr.bf16.mxu1 %v11355_v5 }
0x149b   :  { %8434 = vmatmul.mubr.msk.bf16.vlgmr.msra.gmra.mxu0 %vm295_vm5, %v3583_v63 }
0x149c   :  { %8444 = vmatpush3.bf16.xpose.msra.mxu0 %v3738_v47  ;;  %8445 = vmatprep.mubr.msk.bf16.mxu0 %vm8975_vm3, %v11355_v5 }
0x149d   :  { %8455 = vmatprep.subr.bf16.mxu0 %v11355_v5 }
0x149f   :  { %8440 = vmatmul.mubr.msk.bf16.vlgmr.msra.gmra.mxu1 %vm295_vm5, %v3681_v32 }
0x14a0   :  { %8451 = vmatprep.mubr.msk.bf16.mxu1 %vm8975_vm3, %v11355_v5 }
0x14a3   :  { %8446 = vmatmul.mubr.msk.bf16.vlgmr.msra.gmra.mxu0 %vm295_vm5, %v3731_v34 }
0x14a4   :  { %8457 = vmatprep.mubr.msk.bf16.mxu0 %vm8975_vm3, %v11355_v5 }
0x1557   :  { %v10031_v3 = vpop.f32.mrf.mxu1 }
0x1559   :  { %v8429_v6 = vpop.f32.mrf.mxu1 }
0x155b   :  { %v3629_v7 = vpop.f32.mrf.mxu1  ;;  %v10033_v15 = vpop.f32.mrf.mxu0 }
0x155d   :  { %v8430_v20 = vpop.f32.mrf.mxu1  ;;  %v8435_v27 = vpop.f32.mrf.mxu0 }
0x155f   :  { %v3677_v31 = vpop.f32.mrf.mxu0  ;;  %v3724_v30 = vpop.f32.mrf.mxu1 }
0x1560   :  { %v3780_v37 = vmul.f32 0.35355338, %v3724_v30 }
0x1561   :  { %v8436_v39 = vpop.f32.mrf.mxu0  ;;  %v8441_v35 = vpop.f32.mrf.mxu1 }
0x1562   :  { %v3782_v40 = vadd.f32 %v9991_v33, %v3780_v37 }
0x1563   :  { %v3727_v43 = vpop.f32.mrf.mxu1  ;;  %v3774_v44 = vpop.f32.mrf.mxu0 }
0x1564   :  { %v3781_v45 = vmul.f32 0.35355338, %v3774_v44  ;;  %v3784_v25 = vsel %vm295_vm5, %v3782_v40, -inf }
0x1565   :  { %3785 = vmax.xlane.f32.xlu1 %v3784_v25  ;;  %v8442_v13 = vpop.f32.mrf.mxu1  ;;  %v8447_v19 = vpop.f32.mrf.mxu0 }
0x1566   :  { %v3783_v8 = vadd.f32 %v9991_v33, %v3781_v45 }
0x1567   :  { %v3777_v11 = vpop.f32.mrf.mxu0 }
0x1568   :  { %v3787_v42 = vsel %vm295_vm5, %v3783_v8, -inf }
0x1569   :  { %3788 = vmax.xlane.f32.xlu0 %v3787_v42  ;;  %v8448_v18 = vpop.f32.mrf.mxu0 }
0x1576   :  { %3856 = vrot.lane.b32.xlu1 %v9972_v4, %s8980_s13 }
0x157f   :  { %3808 = vrot.lane.b32.xlu0 %v9968_v2, %s8980_s13 }
0x15ee   :  { %v3786_v48 = vpop.xlane.xlu1 %3785 }
0x15ef   :  { %v3790_v9 = vsub.f32 %v3782_v40, %v3786_v48 }
0x15f1   :  { %v3792_v16 = vmul.f32 1.442695, %v3790_v9 }
0x15f2   :  { %v3857_v49 = vpop.permute.xlu1 %3856  ;;  %v3789_v50 = vpop.xlane.xlu0 %3788 }
0x15f3   :  { %8917 = vpow2.f32 %v3792_v16  ;;  %v3862_v51 = vsel %vm424_vm6, %v3857_v49, 0  ;;  %v3791_v52 = vsub.f32 %v3783_v8, %v3789_v50 }
0x15f4   :  { %8456 = vmatpush3.bf16.msra.mxu0 %v3862_v51 }
0x15f5   :  { %v3794_v53 = vmul.f32 1.442695, %v3791_v52  ;;  %8467 = vmatprep.subr.bf16.mxu0 %v11355_v5 }
0x15f6   :  { %v3809_v54 = vpop.permute.xlu0 %3808 }
0x15f7   :  { %8919 = vpow2.f32 %v3794_v53  ;;  %v3814_v26 = vsel %vm424_vm6, %v3809_v54, 0 }
0x15f8   :  { %8450 = vmatpush3.bf16.msra.mxu1 %v3814_v26 }
0x15f9   :  { %8461 = vmatprep.subr.bf16.mxu1 %v11355_v5 }
0x1600   :  { %v8918_v29 = vpop.eup %8917 }
0x1601   :  { %v3796_v14 = vsel %vm295_vm5, %v8918_v29, 0.0 }
0x1602   :  { %3797 = vadd.xlane.f32.xlu0 %v3796_v14 }
0x1604   :  { %v8920_v55 = vpop.eup %8919 }
0x1605   :  { %v3799_v58 = vsel %vm295_vm5, %v8920_v55, 0.0 }
0x1606   :  { %3800 = vadd.xlane.f32.xlu1 %v3799_v58 }
0x1617   :  { %3906 = vrot.lane.b32.xlu1 %v9968_v2, %s8981_s14 }
0x1618   :  { %3956 = vrot.lane.b32.xlu0 %v9972_v4, %s8981_s14 }
0x161b   :  { %3904 = vrot.lane.b32.xlu1 %v9968_v2, %s8982_s15 }
0x161c   :  { %3954 = vrot.lane.b32.xlu0 %v9972_v4, %s8982_s15 }
0x168b   :  { %v3798_v59 = vpop.xlane.xlu0 %3797 }
0x168c   :  { %8921 = vrcp.f32 %v3798_v59 }
0x168f   :  { %v3801_v28 = vpop.xlane.xlu1 %3800  ;;  %v3957_v32 = vpop.permute.xlu0 %3956 }
0x1690   :  { %8923 = vrcp.f32 %v3801_v28  ;;  %v3962_v6 = vsel %vm295_vm5, %v3957_v32, 0 }
0x1693   :  { %v3907_v60 = vpop.permute.xlu1 %3906  ;;  %v3955_v20 = vpop.permute.xlu0 %3954 }
0x1694   :  { %v3912_v63 = vsel %vm295_vm5, %v3907_v60, 0 }
0x1697   :  { %v3905_v7 = vpop.permute.xlu1 %3904 }
0x1699   :  { %v8922_v36 = vpop.eup %8921 }
0x169a   :  { %v3803_v61 = vmul.f32 %v8922_v36, %v8918_v29 }
0x169c   :  { %v3806_v46 = vpack.c.bf16 %v3803_v61, %v3803_v61 }
0x169d   :  { %v8924_v1 = vpop.eup %8923 }
0x169e   :  { %8452 = vmatmul.mubr.msk.bf16.vlgmr.msra.gmra.mxu1 %vm295_vm5, %v3806_v46  ;;  %v3805_v47 = vmul.f32 %v8924_v1, %v8920_v55 }
0x169f   :  { %8462 = vmatpush3.bf16.xpose.msra.mxu1 %v3912_v63  ;;  %8463 = vmatprep.mubr.msk.bf16.mxu1 %vm8975_vm3, %v11355_v5 }
0x16a0   :  { %v3807_v34 = vpack.c.bf16 %v3805_v47, %v3805_v47  ;;  %8473 = vmatprep.subr.bf16.mxu1 %v11355_v5 }
0x16a2   :  { %8458 = vmatmul.mubr.msk.bf16.vlgmr.msra.gmra.mxu0 %vm295_vm5, %v3807_v34 }
0x16a3   :  { %8468 = vmatpush3.bf16.xpose.msra.mxu0 %v3962_v6  ;;  %8469 = vmatprep.mubr.msk.bf16.mxu0 %vm8975_vm3, %v11355_v5 }
0x16a4   :  { %8479 = vmatprep.subr.bf16.mxu0 %v11355_v5 }
0x16a6   :  { %8464 = vmatmul.mubr.msk.bf16.vlgmr.msra.gmra.mxu1 %vm295_vm5, %v3905_v7 }
0x16a7   :  { %8475 = vmatprep.mubr.msk.bf16.mxu1 %vm8975_vm3, %v11355_v5 }
0x16aa   :  { %8470 = vmatmul.mubr.msk.bf16.vlgmr.msra.gmra.mxu0 %vm295_vm5, %v3955_v20 }
0x16ab   :  { %8481 = vmatprep.mubr.msk.bf16.mxu0 %vm8975_vm3, %v11355_v5 }
0x175e   :  { %v10073_v27 = vpop.f32.mrf.mxu1 }
0x1760   :  { %v8453_v31 = vpop.f32.mrf.mxu1 }
0x1762   :  { %v3853_v30 = vpop.f32.mrf.mxu1  ;;  %v10075_v37 = vpop.f32.mrf.mxu0 }
0x1763   :  { %v8592_v39 = vpack.i.bf16 %v10075_v37, %v10073_v27 }
0x1764   :  { %v8454_v35 = vpop.f32.mrf.mxu1  ;;  %v8459_v40 = vpop.f32.mrf.mxu0 }
0x1766   :  { %v3901_v43 = vpop.f32.mrf.mxu0  ;;  %v3948_v44 = vpop.f32.mrf.mxu1 }
0x1767   :  { %v4004_v45 = vmul.f32 0.35355338, %v3948_v44 }
0x1768   :  { %v8460_v25 = vpop.f32.mrf.mxu0  ;;  %v8465_v13 = vpop.f32.mrf.mxu1 }
0x1769   :  { %v4006_v19 = vadd.f32 %v9991_v33, %v4004_v45 }
0x176a   :  { %v3951_v8 = vpop.f32.mrf.mxu1  ;;  %v3998_v11 = vpop.f32.mrf.mxu0 }
0x176b   :  { %v4005_v42 = vmul.f32 0.35355338, %v3998_v11  ;;  %v4008_v18 = vsel %vm295_vm5, %v4006_v19, -inf }
0x176c   :  { %4009 = vmax.xlane.f32.xlu1 %v4008_v18  ;;  %v8466_v48 = vpop.f32.mrf.mxu1  ;;  %v8471_v9 = vpop.f32.mrf.mxu0 }
0x176d   :  { %v4007_v16 = vadd.f32 %v9991_v33, %v4005_v42 }
0x176e   :  { %v4001_v49 = vpop.f32.mrf.mxu0 }
0x176f   :  { %v4011_v50 = vsel %vm295_vm5, %v4007_v16, -inf }
0x1770   :  { %4012 = vmax.xlane.f32.xlu0 %v4011_v50  ;;  %v8472_v51 = vpop.f32.mrf.mxu0 }
0x177d   :  { %4080 = vrot.lane.b32.xlu1 %v9972_v4, %s8983_s16 }
0x1786   :  { %4032 = vrot.lane.b32.xlu0 %v9968_v2, %s8983_s16 }
0x17f5   :  { %v4010_v52 = vpop.xlane.xlu1 %4009 }
0x17f6   :  { %v4014_v53 = vsub.f32 %v4006_v19, %v4010_v52 }
0x17f8   :  { %v4016_v54 = vmul.f32 1.442695, %v4014_v53 }
0x17f9   :  { %v4081_v26 = vpop.permute.xlu1 %4080  ;;  %v4013_v29 = vpop.xlane.xlu0 %4012 }
0x17fa   :  { %8925 = vpow2.f32 %v4016_v54  ;;  %v4086_v14 = vsel %vm424_vm6, %v4081_v26, 0  ;;  %v4015_v55 = vsub.f32 %v4007_v16, %v4013_v29 }
0x17fb   :  { %8480 = vmatpush3.bf16.msra.mxu0 %v4086_v14 }
0x17fc   :  { %v4018_v58 = vmul.f32 1.442695, %v4015_v55  ;;  %8491 = vmatprep.subr.bf16.mxu0 %v11355_v5 }
0x17fd   :  { %v4033_v59 = vpop.permute.xlu0 %4032 }
0x17fe   :  { %8927 = vpow2.f32 %v4018_v58  ;;  %v4038_v28 = vsel %vm424_vm6, %v4033_v59, 0 }
0x17ff   :  { %8474 = vmatpush3.bf16.msra.mxu1 %v4038_v28 }
0x1800   :  { %8485 = vmatprep.subr.bf16.mxu1 %v11355_v5 }
0x1807   :  { %v8926_v36 = vpop.eup %8925 }
0x1808   :  { %v4020_v61 = vsel %vm295_vm5, %v8926_v36, 0.0 }
0x1809   :  { %4021 = vadd.xlane.f32.xlu0 %v4020_v61 }
0x180b   :  { %v8928_v60 = vpop.eup %8927 }
0x180c   :  { %v4023_v46 = vsel %vm295_vm5, %v8928_v60, 0.0 }
0x180d   :  { %4024 = vadd.xlane.f32.xlu1 %v4023_v46 }
0x181e   :  { %4130 = vrot.lane.b32.xlu1 %v9968_v2, %s8984_s17 }
0x181f   :  { %4180 = vrot.lane.b32.xlu0 %v9972_v4, %s8984_s17 }
0x1822   :  { %4128 = vrot.lane.b32.xlu1 %v9968_v2, %s8985_s18 }
0x1823   :  { %4178 = vrot.lane.b32.xlu0 %v9972_v4, %s8985_s18 }
0x1892   :  { %v4022_v1 = vpop.xlane.xlu0 %4021 }
0x1893   :  { %8929 = vrcp.f32 %v4022_v1 }
0x1896   :  { %v4025_v63 = vpop.xlane.xlu1 %4024  ;;  %v4181_v30 = vpop.permute.xlu0 %4180 }
0x1897   :  { %8931 = vrcp.f32 %v4025_v63  ;;  %v4186_v40 = vsel %vm295_vm5, %v4181_v30, 0 }
0x189a   :  { %v4131_v34 = vpop.permute.xlu1 %4130  ;;  %v4179_v44 = vpop.permute.xlu0 %4178 }
0x189b   :  { %v4136_v20 = vsel %vm295_vm5, %v4131_v34, 0 }
0x189e   :  { %v4129_v43 = vpop.permute.xlu1 %4128 }
0x18a0   :  { %v8930_v47 = vpop.eup %8929 }
0x18a1   :  { %v4027_v32 = vmul.f32 %v8930_v47, %v8926_v36 }
0x18a3   :  { %v4030_v6 = vpack.c.bf16 %v4027_v32, %v4027_v32 }
0x18a4   :  { %v8932_v7 = vpop.eup %8931 }
0x18a5   :  { %8476 = vmatmul.mubr.msk.bf16.vlgmr.msra.gmra.mxu1 %vm295_vm5, %v4030_v6  ;;  %v4029_v31 = vmul.f32 %v8932_v7, %v8928_v60 }
0x18a6   :  { %8486 = vmatpush3.bf16.xpose.msra.mxu1 %v4136_v20  ;;  %8487 = vmatprep.mubr.msk.bf16.mxu1 %vm8975_vm3, %v11355_v5 }
0x18a7   :  { %v4031_v35 = vpack.c.bf16 %v4029_v31, %v4029_v31  ;;  %8497 = vmatprep.subr.bf16.mxu1 %v11355_v5 }
0x18a9   :  { %8482 = vmatmul.mubr.msk.bf16.vlgmr.msra.gmra.mxu0 %vm295_vm5, %v4031_v35 }
0x18aa   :  { %8492 = vmatpush3.bf16.xpose.msra.mxu0 %v4186_v40  ;;  %8493 = vmatprep.mubr.msk.bf16.mxu0 %vm8975_vm3, %v11355_v5 }
0x18ab   :  { %8503 = vmatprep.subr.bf16.mxu0 %v11355_v5 }
0x18ad   :  { %8488 = vmatmul.mubr.msk.bf16.vlgmr.msra.gmra.mxu1 %vm295_vm5, %v4129_v43 }
0x18ae   :  { %8499 = vmatprep.mubr.msk.bf16.mxu1 %vm8975_vm3, %v11355_v5 }
0x18b1   :  { %8494 = vmatmul.mubr.msk.bf16.vlgmr.msra.gmra.mxu0 %vm295_vm5, %v4179_v44 }
0x18b2   :  { %8505 = vmatprep.mubr.msk.bf16.mxu0 %vm8975_vm3, %v11355_v5 }
0x1965   :  { %v4074_v45 = vpop.f32.mrf.mxu1 }
0x1967   :  { %v8477_v25 = vpop.f32.mrf.mxu1 }
0x1969   :  { %v4077_v13 = vpop.f32.mrf.mxu1  ;;  %v4122_v19 = vpop.f32.mrf.mxu0 }
0x196a   :  { %v8597_v8 = vpack.i.bf16 %v4122_v19, %v4074_v45 }
0x196b   :  { %v8478_v11 = vpop.f32.mrf.mxu1  ;;  %v8483_v42 = vpop.f32.mrf.mxu0 }
0x196d   :  { %v4125_v18 = vpop.f32.mrf.mxu0  ;;  %v4172_v48 = vpop.f32.mrf.mxu1 }
0x196e   :  { %v4228_v9 = vmul.f32 0.35355338, %v4172_v48 }
0x196f   :  { %v8484_v16 = vpop.f32.mrf.mxu0  ;;  %v8489_v49 = vpop.f32.mrf.mxu1 }
0x1970   :  { %v4230_v50 = vadd.f32 %v9991_v33, %v4228_v9 }
0x1971   :  { %v4175_v51 = vpop.f32.mrf.mxu1  ;;  %v4222_v52 = vpop.f32.mrf.mxu0 }
0x1972   :  { %v4229_v53 = vmul.f32 0.35355338, %v4222_v52  ;;  %v4232_v54 = vsel %vm295_vm5, %v4230_v50, -inf }
0x1973   :  { %4233 = vmax.xlane.f32.xlu1 %v4232_v54  ;;  %v8490_v26 = vpop.f32.mrf.mxu1  ;;  %v8495_v29 = vpop.f32.mrf.mxu0 }
0x1974   :  { %v4231_v14 = vadd.f32 %v9991_v33, %v4229_v53 }
0x1975   :  { %v4225_v55 = vpop.f32.mrf.mxu0 }
0x1976   :  { %v4235_v58 = vsel %vm295_vm5, %v4231_v14, -inf }
0x1977   :  { %4236 = vmax.xlane.f32.xlu0 %v4235_v58  ;;  %v8496_v59 = vpop.f32.mrf.mxu0 }
0x19fc   :  { %v4234_v28 = vpop.xlane.xlu1 %4233 }
0x19fd   :  { %v4238_v36 = vsub.f32 %v4230_v50, %v4234_v28 }
0x19ff   :  { %v4240_v61 = vmul.f32 1.442695, %v4238_v36 }
0x1a00   :  { %v4237_v60 = vpop.xlane.xlu0 %4236 }
0x1a01   :  { %8933 = vpow2.f32 %v4240_v61  ;;  %v4239_v46 = vsub.f32 %v4231_v14, %v4237_v60 }
0x1a03   :  { %v4242_v1 = vmul.f32 1.442695, %v4239_v46 }
0x1a05   :  { %8935 = vpow2.f32 %v4242_v1 }
0x1a0e   :  { %v8934_v63 = vpop.eup %8933 }
0x1a0f   :  { %v4244_v47 = vsel %vm295_vm5, %v8934_v63, 0.0 }
0x1a10   :  { %4245 = vadd.xlane.f32.xlu0 %v4244_v47 }
0x1a12   :  { %v8936_v32 = vpop.eup %8935 }
0x1a13   :  { %v4247_v33 = vsel %vm295_vm5, %v8936_v32, 0.0 }
0x1a14   :  { %4248 = vadd.xlane.f32.xlu1 %v4247_v33  ;;  %v8741_v33 = vld [vmem:[%s11350_s8 + $0x78] sm:$0xff]  }
0x1a25   :  { %4304 = vrot.lane.b32.xlu1 %v9972_v4, %s8986_s0 }
0x1a26   :  { %4256 = vrot.lane.b32.xlu0 %v9968_v2, %s8986_s0 }
0x1a29   :  { %4389 = vrot.lane.b32.xlu1 %v9941_v38, %s8987_s19 }
0x1a2a   :  { %8593 = vrot.lane.b32.xlu0 %v8592_v39, %s11368_s1 }
0x1a2d   :  { %8598 = vrot.lane.b32.xlu1 %v8597_v8, %s11369_s10 }
0x1a31   :  { %4387 = vrot.lane.b32.xlu1 %v9947_v10, %s8987_s19 }
0x1a99   :  { %v4246_v34 = vpop.xlane.xlu0 %4245 }
0x1a9a   :  { %8937 = vrcp.f32 %v4246_v34  ;;  %v8744_v34 = vld [vmem:[%s11350_s8 + $0xb8] sm:$0xff]  }
0x1a9d   :  { %v4249_v6 = vpop.xlane.xlu1 %4248  ;;  %v4257_v4 = vpop.permute.xlu0 %4256 }
0x1a9e   :  { %8939 = vrcp.f32 %v4249_v6  ;;  %v4262_v2 = vsel %vm424_vm6, %v4257_v4, 0  ;;  %v8748_v6 = vld [vmem:[%s11350_s8 + $0xb0] sm:$0xff]   ;;  %v8750_v4 = vld [vmem:[%s11350_s8 + $0x28] sm:$0xff]  }
0x1a9f   :  { %8498 = vmatpush3.bf16.msra.mxu1 %v4262_v2  ;;  %v8752_v2 = vld [vmem:[%s11350_s8 + $0xa8] sm:$0xff]  }
0x1aa0   :  { %8509 = vmatprep.subr.bf16.mxu1 %v11355_v5 }
0x1aa1   :  { %v4305_v38 = vpop.permute.xlu1 %4304  ;;  %v8594_v18 = vpop.permute.xlu0 %8593 }
0x1aa2   :  { %v4310_v7 = vsel %vm424_vm6, %v4305_v38, 0  ;;  %v8596_v48 = vunpack.i.h.bf16 %v8594_v18  ;;  %v8595_v9 = vunpack.i.l.bf16 %v8594_v18  ;;  %v8754_v38 = vld [vmem:[%s11350_s8 + $0x20] sm:$0xff]  }
0x1aa3   :  { %8504 = vmatpush3.bf16.msra.mxu0 %v4310_v7  ;;  %v8756_v7 = vld [vmem:[%s11350_s8 + $0xa0] sm:$0xff]  }
0x1aa4   :  { %v4377_v51 = vsel %vm295_vm5, %v10033_v15, %v8596_v48  ;;  %v4376_v52 = vsel %vm295_vm5, %v10031_v3, %v8595_v9  ;;  %v10159_v15 = vld [vmem:[%s11347_s5 + $0x8] sm:$0x3f]  ;;  %v8770_v18 = vld [vmem:[%s11350_s8] sm:$0xff]   ;;  %v8747_v48 = vld [vmem:[%s11350_s8 + $0xf0] sm:$0xff]  }
0x1aa5   :  { %v4390_v31 = vpop.permute.xlu1 %4389  ;;  %v4386_v3 = vrot.slane %v10159_v15, %v9287_v21  ;;  %v8772_v9 = vld [vmem:[%s11350_s8 + $0x80] sm:$0xff]  }
0x1aa7   :  { %v8938_v27 = vpop.eup %8937 }
0x1aa8   :  { %v4251_v37 = vmul.f32 %v8938_v27, %v8934_v63  ;;  %v8758_v27 = vld [vmem:[%s11350_s8 + $0x18] sm:$0xff]  }
0x1aa9   :  { %v8599_v35 = vpop.permute.xlu1 %8598 }
0x1aaa   :  { %v4254_v39 = vpack.c.bf16 %v4251_v37, %v4251_v37  ;;  %v8601_v16 = vunpack.i.h.bf16 %v8599_v35  ;;  %v8600_v49 = vunpack.i.l.bf16 %v8599_v35  ;;  %v8760_v37 = vld [vmem:[%s11350_s8 + $0x98] sm:$0xff]  }
0x1aab   :  { %v8940_v20 = vpop.eup %8939 }
0x1aac   :  { %8500 = vmatmul.mubr.msk.bf16.vlgmr.msra.gmra.mxu1 %vm295_vm5, %v4254_v39  ;;  %v4253_v10 = vmul.f32 %v8940_v20, %v8936_v32  ;;  %v4378_v26 = vsel %vm137_vm2, %v4376_v52, %v8600_v49  ;;  %v4379_v29 = vsel %vm137_vm2, %v4377_v51, %v8601_v16  ;;  %v7629_v16 = vld [vmem:[%s11348_s6 + $0x180] sm:$0xff]  ;;  %v7630_v51 = vld [vmem:[%s11348_s6 + $0x188] sm:$0xff] }
0x1aad   :  { %8510 = vmatpush3.bf16.msra.mxu1 %v4390_v31  ;;  %8513 = vmatprep.mubr.msk.bf16.mxu1 %vm8975_vm3, %v11355_v5  ;;  %v4388_v40 = vpop.permute.xlu1 %4387  ;;  %v7637_v49 = vld [vmem:[%s11348_s6 + $0x1c0] sm:$0xff]  ;;  %v7638_v52 = vld [vmem:[%s11348_s6 + $0x1c8] sm:$0xff] }
0x1aae   :  { %v4255_v30 = vpack.c.bf16 %v4253_v10, %v4253_v10  ;;  %8511 = vmatprep.subr.bf16.mxu1 %v11355_v5 }
0x1ab0   :  { %8506 = vmatmul.mubr.msk.bf16.vlgmr.msra.gmra.mxu0 %vm295_vm5, %v4255_v30 }
0x1ab1   :  { %4792 = vmatprep.mubr.bf16.mxu0 %v8991_v62  ;;  %8512 = vmatpush3.bf16.msra.mxu1 %v4388_v40 }
0x1b6c   :  { %v4298_v43 = vpop.f32.mrf.mxu1 }
0x1b6e   :  { %v8501_v44 = vpop.f32.mrf.mxu1 }
0x1b70   :  { %v4301_v45 = vpop.f32.mrf.mxu1  ;;  %v4346_v25 = vpop.f32.mrf.mxu0 }
0x1b71   :  { %v8602_v13 = vpack.i.bf16 %v4346_v25, %v4298_v43  ;;  %v8762_v25 = vld [vmem:[%s11350_s8 + $0x10] sm:$0xff]  }
0x1b72   :  { %v8502_v19 = vpop.f32.mrf.mxu1  ;;  %v8507_v8 = vpop.f32.mrf.mxu0 }
0x1b73   :  { %8603 = vrot.lane.b32.xlu0 %v8602_v13, %s11370_s11  ;;  %v8764_v13 = vld [vmem:[%s11350_s8 + $0x90] sm:$0xff]   ;;  %v8766_v19 = vld [vmem:[%s11350_s8 + $0x8] sm:$0xff]   ;;  %v8743_v8 = vld [vmem:[%s11350_s8 + $0x38] sm:$0xff]  }
0x1b74   :  { %v4349_v11 = vpop.f32.mrf.mxu0 }
0x1b75   :  { %v8768_v11 = vld [vmem:[%s11350_s8 + $0x88] sm:$0xff]  }
0x1b76   :  { %v8508_v42 = vpop.f32.mrf.mxu0 }
0x1b77   :  { %v8745_v42 = vld [vmem:[%s11350_s8 + $0x70] sm:$0xff]  }
0x1be5   :  { %v8604_v50 = vpop.permute.xlu0 %8603 }
0x1be6   :  { %v8606_v53 = vunpack.i.h.bf16 %v8604_v50  ;;  %v8605_v54 = vunpack.i.l.bf16 %v8604_v50  ;;  %v7664_v50 = vcombine.high %v7629_v16, %v7637_v49 }
0x1be8   :  { %v4381_v14 = vsel %vm1216_vm7, %v4379_v29, %v8606_v53  ;;  %v4380_v55 = vsel %vm1216_vm7, %v4378_v26, %v8605_v54  ;;  %v7663_v53 = vcombine.low %v7629_v16, %v7637_v49  ;;  %v7665_v54 = vcombine.low %v7630_v51, %v7638_v52  ;;  %v8749_v29 = vld [vmem:[%s11350_s8 + $0x68] sm:$0xff]   ;;  %4772 = vmatprep.subr.bf16.mxu0 %v7664_v50  ;;  %v8775_v49 = vld [vmem:[%s11350_s8 + $0x1f8] sm:$0xff]  }
0x1be9   :  { %v4382_v58 = vpack.c.bf16 %v4381_v14, %v4380_v55  ;;  %v7666_v26 = vcombine.high %v7630_v51, %v7638_v52  ;;  %v8774_v14 = vld [vmem:[%s11350_s8 + $0x138] sm:$0xff]   ;;  %v7613_v55 = vld [vmem:[%s11348_s6 + $0x100] sm:$0xff]  ;;  %v8800_v16 = vld [vmem:[%s11350_s8 + $0x188] sm:$0xff]  }
0x1bea   :  { %4773 = vmatpush1.bf16.msra.mxu0 %v7663_v53  ;;  %v8802_v51 = vld [vmem:[%s11350_s8 + $0x100] sm:$0xff]   ;;  %v8777_v52 = vld [vmem:[%s11350_s8 + $0x170] sm:$0xff]  }
0x1beb   :  { %8514 = vmatmul.mubr.msk.bf16.vlgmr.msra.gmra.mxu1 %vm245_vm4, %v4382_v58  ;;  %4815 = vmatprep.subr.bf16.mxu1 %v7666_v26  ;;  %v7621_v58 = vld [vmem:[%s11348_s6 + $0x140] sm:$0xff]  ;;  %v8779_v26 = vld [vmem:[%s11350_s8 + $0x1f0] sm:$0xff]  }
0x1bec   :  { %4835 = vmatprep.mubr.bf16.mxu1 %v8991_v62  ;;  %4816 = vmatpush1.bf16.msra.mxu1 %v7665_v54  ;;  %v8804_v54 = vld [vmem:[%s11350_s8 + $0x180] sm:$0xff]  }
0x1cab   :  { %v4430_v59 = vpop.f32.mrf.mxu1 }
0x1cac   :  { %v4431_v28 = vadd.f32 %v4430_v59, %v4386_v3  ;;  %v7614_v59 = vld [vmem:[%s11348_s6 + $0x108] sm:$0xff] }
0x1cad   :  { %v8515_v36 = vpop.f32.mrf.mxu1 }
0x1cae   :  { %v4437_v61 = vadd.f32 %v4431_v28, %v9956_v41  ;;  %v8742_v41 = vld [vmem:[%s11350_s8 + $0xf8] sm:$0xff]   ;;  %v7622_v28 = vld [vmem:[%s11348_s6 + $0x148] sm:$0xff]  ;;  %v7647_v36 = vcombine.low %v7613_v55, %v7621_v58 }
0x1caf   :  { %v4433_v60 = vpop.f32.mrf.mxu1 }
0x1cb0   :  { %v4434_v46 = vadd.f32 %v4433_v60, %v4386_v3  ;;  %v4439_v1 = vsel %vm245_vm4, %v4437_v61, 0.0  ;;  %v7648_v3 = vcombine.high %v7613_v55, %v7621_v58  ;;  %v7650_v60 = vcombine.high %v7614_v59, %v7622_v28  ;;  %v8808_v58 = vld [vmem:[%s11350_s8 + $0x2b8] sm:$0xff]  }
0x1cb1   :  { %4440 = vadd.xlane.f32.xlu0 %v4439_v1  ;;  %v8516_v63 = vpop.f32.mrf.mxu1  ;;  %v8776_v1 = vld [vmem:[%s11350_s8 + $0x1b8] sm:$0xff]  }
0x1cb2   :  { %v4438_v47 = vadd.f32 %v4434_v46, %v9958_v0  ;;  %v8746_v0 = vld [vmem:[%s11350_s8 + $0x30] sm:$0xff]   ;;  %v8751_v46 = vld [vmem:[%s11350_s8 + $0xe8] sm:$0xff]   ;;  %4774 = vmatprep.subr.bf16.mxu0 %v7648_v3  ;;  %4817 = vmatprep.subr.bf16.mxu1 %v7650_v60  ;;  %v8787_v60 = vld [vmem:[%s11350_s8 + $0x1e0] sm:$0xff]  }
0x1cb3   :  { %4775 = vmatpush1.bf16.msra.mxu0 %v7647_v36  ;;  %v10298_v63 = vld [vmem:[%s11348_s6 + $0x190] sm:$0xff]  ;;  %v8783_v3 = vld [vmem:[%s11350_s8 + $0x1e8] sm:$0xff]   ;;  %v8785_v36 = vld [vmem:[%s11350_s8 + $0x160] sm:$0xff]  }
0x1cb4   :  { %v4442_v32 = vsel %vm245_vm4, %v4438_v47, 0.0 }
0x1cb5   :  { %4443 = vadd.xlane.f32.xlu1 %v4442_v32  ;;  %v10308_v32 = vld [vmem:[%s11348_s6 + $0x198] sm:$0xff] }
0x1cc6   :  { %6082 = vrot.lane.b32.xlu1 %v8741_v33, %s8976_s28 }
0x1cca   :  { %6114 = vrot.lane.b32.xlu1 %v8742_v41, %s8976_s28 }
0x1cce   :  { %6098 = vrot.lane.b32.xlu1 %v8744_v34, %s8976_s28  ;;  %v10317_v34 = vld [vmem:[%s11348_s6 + $0x1d8] sm:$0xff] }
0x1cd2   :  { %6064 = vrot.lane.b32.xlu1 %v8746_v0, %s8976_s28  ;;  %v7669_v0 = vcombine.low %v10308_v32, %v10317_v34 }
0x1cd6   :  { %6096 = vrot.lane.b32.xlu1 %v8748_v6, %s8976_s28  ;;  %v7670_v6 = vcombine.high %v10308_v32, %v10317_v34  ;;  %v7626_v32 = vld [vmem:[%s11348_s6 + $0x168] sm:$0xff] }
0x1cda   :  { %6062 = vrot.lane.b32.xlu1 %v8750_v4, %s8976_s28  ;;  %v8778_v4 = vld [vmem:[%s11350_s8 + $0x130] sm:$0xff]  }
0x1cde   :  { %6094 = vrot.lane.b32.xlu1 %v8752_v2, %s8976_s28  ;;  %v8753_v2 = vld [vmem:[%s11350_s8 + $0x60] sm:$0xff]  }
0x1ce2   :  { %6060 = vrot.lane.b32.xlu1 %v8754_v38, %s8976_s28  ;;  %v8780_v38 = vld [vmem:[%s11350_s8 + $0x1b0] sm:$0xff]  }
0x1ce6   :  { %6092 = vrot.lane.b32.xlu1 %v8756_v7, %s8976_s28  ;;  %v8755_v7 = vld [vmem:[%s11350_s8 + $0xe0] sm:$0xff]  }
0x1cea   :  { %6058 = vrot.lane.b32.xlu1 %v8758_v27, %s8976_s28  ;;  %v8782_v27 = vld [vmem:[%s11350_s8 + $0x128] sm:$0xff]  }
0x1cee   :  { %6090 = vrot.lane.b32.xlu1 %v8760_v37, %s8976_s28  ;;  %v8757_v37 = vld [vmem:[%s11350_s8 + $0x58] sm:$0xff]  }
0x1cf2   :  { %6056 = vrot.lane.b32.xlu1 %v8762_v25, %s8976_s28  ;;  %v8792_v25 = vld [vmem:[%s11350_s8 + $0x198] sm:$0xff]  }
0x1cf6   :  { %6088 = vrot.lane.b32.xlu1 %v8764_v13, %s8976_s28  ;;  %v8767_v13 = vld [vmem:[%s11350_s8 + $0xc8] sm:$0xff]  }
0x1cfa   :  { %6054 = vrot.lane.b32.xlu1 %v8766_v19, %s8976_s28  ;;  %v8794_v19 = vld [vmem:[%s11350_s8 + $0x110] sm:$0xff]  }
0x1cfe   :  { %6086 = vrot.lane.b32.xlu1 %v8768_v11, %s8976_s28  ;;  %v8796_v11 = vld [vmem:[%s11350_s8 + $0x190] sm:$0xff]  }
0x1d02   :  { %6052 = vrot.lane.b32.xlu1 %v8770_v18, %s8976_s28 }
0x1d06   :  { %6084 = vrot.lane.b32.xlu1 %v8772_v9, %s8976_s28  ;;  %v8773_v9 = vld [vmem:[%s11350_s8 + $0x178] sm:$0xff]  }
0x1d0a   :  { %6130 = vrot.lane.b32.xlu1 %v8774_v14, %s8976_s28  ;;  %v8781_v14 = vld [vmem:[%s11350_s8 + $0x168] sm:$0xff]  }
0x1d0e   :  { %6162 = vrot.lane.b32.xlu1 %v8776_v1, %s8976_s28  ;;  %v8814_v1 = vld [vmem:[%s11350_s8 + $0x228] sm:$0xff]  }
0x1d12   :  { %6128 = vrot.lane.b32.xlu1 %v8778_v4, %s8976_s28  ;;  %v8816_v4 = vld [vmem:[%s11350_s8 + $0x2a8] sm:$0xff]  }
0x1d16   :  { %6160 = vrot.lane.b32.xlu1 %v8780_v38, %s8976_s28  ;;  %v8818_v38 = vld [vmem:[%s11350_s8 + $0x220] sm:$0xff]  }
0x1d1a   :  { %6126 = vrot.lane.b32.xlu1 %v8782_v27, %s8976_s28 }
0x1d3a   :  { %v4441_v39 = vpop.xlane.xlu0 %4440 }
0x1d3b   :  { %v4445_v20 = vmul.f32 0.03125, %v4441_v39  ;;  %v8784_v39 = vld [vmem:[%s11350_s8 + $0x1a8] sm:$0xff]  }
0x1d3c   :  { %6158 = vrot.lane.b32.xlu1 %v8784_v39, %s8976_s28  ;;  %v8795_v39 = vld [vmem:[%s11350_s8 + $0x1d0] sm:$0xff]  }
0x1d3d   :  { %v10211_v31 = vsub.f32 %v4437_v61, %v4445_v20  ;;  %v7649_v61 = vcombine.low %v7614_v59, %v7622_v28  ;;  %v8759_v20 = vld [vmem:[%s11350_s8 + $0xd8] sm:$0xff]   ;;  %v8810_v28 = vld [vmem:[%s11350_s8 + $0x230] sm:$0xff]  }
0x1d3e   :  { %v4444_v10 = vpop.xlane.xlu1 %4443 }
0x1d3f   :  { %v4446_v30 = vmul.f32 0.03125, %v4444_v10  ;;  %v4449_v35 = vmul.f32 %v10211_v31, %v10211_v31  ;;  %4818 = vmatpush1.bf16.msra.mxu1 %v7649_v61  ;;  %v8786_v10 = vld [vmem:[%s11350_s8 + $0x120] sm:$0xff]   ;;  %v8812_v61 = vld [vmem:[%s11350_s8 + $0x2b0] sm:$0xff]  }
0x1d40   :  { %4901 = vmatprep.subr.bf16.mxu1 %v7670_v6  ;;  %6124 = vrot.lane.b32.xlu1 %v8786_v10, %s8976_s28  ;;  %v8822_v10 = vld [vmem:[%s11350_s8 + $0x218] sm:$0xff]  }
0x1d41   :  { %v10215_v40 = vsub.f32 %v4438_v47, %v4446_v30  ;;  %v4451_v43 = vsel %vm245_vm4, %v4449_v35, 0.0  ;;  %v10303_v47 = vld [vmem:[%s11348_s6 + $0x1d0] sm:$0xff]  ;;  %v8788_v35 = vld [vmem:[%s11350_s8 + $0x1a0] sm:$0xff]  }
0x1d42   :  { %4452 = vadd.xlane.f32.xlu0 %v4451_v43  ;;  %v7667_v33 = vcombine.low %v10298_v63, %v10303_v47  ;;  %v7668_v41 = vcombine.high %v10298_v63, %v10303_v47  ;;  %v8761_v30 = vld [vmem:[%s11350_s8 + $0x50] sm:$0xff]   ;;  %v10404_v18 = vpop.permute.xlu1 %6082  ;;  %v7625_v63 = vld [vmem:[%s11348_s6 + $0x160] sm:$0xff]  ;;  %v7618_v47 = vld [vmem:[%s11348_s6 + $0x128] sm:$0xff] }
0x1d43   :  { %v4450_v44 = vmul.f32 %v10215_v40, %v10215_v40  ;;  %v8763_v43 = vld [vmem:[%s11350_s8 + $0xd0] sm:$0xff]  }
0x1d44   :  { %4858 = vmatprep.subr.bf16.mxu0 %v7668_v41  ;;  %6156 = vrot.lane.b32.xlu1 %v8788_v35, %s8976_s28  ;;  %v8789_v41 = vld [vmem:[%s11350_s8 + $0x158] sm:$0xff]  }
0x1d45   :  { %v4454_v45 = vsel %vm245_vm4, %v4450_v44, 0.0  ;;  %v8790_v44 = vld [vmem:[%s11350_s8 + $0x118] sm:$0xff]  }
0x1d46   :  { %4455 = vadd.xlane.f32.xlu0 %v4454_v45  ;;  %v8765_v45 = vld [vmem:[%s11350_s8 + $0x48] sm:$0xff]   ;;  %v10421_v50 = vpop.permute.xlu1 %6114  ;;  %v8824_v35 = vld [vmem:[%s11350_s8 + $0x298] sm:$0xff]  }
0x1d48   :  { %6122 = vrot.lane.b32.xlu1 %v8790_v44, %s8976_s28 }
0x1d4a   :  { %v10431_v53 = vpop.permute.xlu1 %6098 }
0x1d4c   :  { %6154 = vrot.lane.b32.xlu1 %v8792_v25, %s8976_s28  ;;  %v8826_v25 = vld [vmem:[%s11350_s8 + $0x210] sm:$0xff]  }
0x1d4e   :  { %v10449_v55 = vpop.permute.xlu1 %6064 }
0x1d50   :  { %6120 = vrot.lane.b32.xlu1 %v8794_v19, %s8976_s28  ;;  %v8801_v19 = vld [vmem:[%s11350_s8 + $0x140] sm:$0xff]  }
0x1d52   :  { %v10459_v59 = vpop.permute.xlu1 %6096 }
0x1d54   :  { %6152 = vrot.lane.b32.xlu1 %v8796_v11, %s8976_s28 }
0x1d5c   :  { %6066 = vrot.lane.b32.xlu0 %v8743_v8, %s8976_s28  ;;  %v8769_v8 = vld [vmem:[%s11350_s8 + $0x40] sm:$0xff]  }
0x1d60   :  { %6080 = vrot.lane.b32.xlu0 %v8745_v42, %s8976_s28  ;;  %v8771_v42 = vld [vmem:[%s11350_s8 + $0xc0] sm:$0xff]  }
0x1d64   :  { %6112 = vrot.lane.b32.xlu0 %v8747_v48, %s8976_s28  ;;  %v8798_v48 = vld [vmem:[%s11350_s8 + $0x108] sm:$0xff]  }
0x1d65   :  { %6118 = vrot.lane.b32.xlu1 %v8798_v48, %s8976_s28  ;;  %v8828_v48 = vld [vmem:[%s11350_s8 + $0x290] sm:$0xff]  }
0x1d68   :  { %6078 = vrot.lane.b32.xlu0 %v8749_v29, %s8976_s28  ;;  %v8806_v29 = vld [vmem:[%s11350_s8 + $0x238] sm:$0xff]  }
0x1d69   :  { %6150 = vrot.lane.b32.xlu1 %v8800_v16, %s8976_s28  ;;  %v8803_v16 = vld [vmem:[%s11350_s8 + $0x1c0] sm:$0xff]  }
0x1d6c   :  { %6110 = vrot.lane.b32.xlu0 %v8751_v46, %s8976_s28  ;;  %v10477_v46 = vpop.permute.xlu1 %6062 }
0x1d6d   :  { %6116 = vrot.lane.b32.xlu1 %v8802_v51, %s8976_s28 }
0x1d70   :  { %6076 = vrot.lane.b32.xlu0 %v8753_v2, %s8976_s28  ;;  %v10487_v6 = vpop.permute.xlu1 %6094  ;;  %v8791_v2 = vld [vmem:[%s11350_s8 + $0x1d8] sm:$0xff]  }
0x1d71   :  { %6148 = vrot.lane.b32.xlu1 %v8804_v54, %s8976_s28  ;;  %v8805_v54 = vld [vmem:[%s11350_s8 + $0x278] sm:$0xff]  }
0x1d74   :  { %6108 = vrot.lane.b32.xlu0 %v8755_v7, %s8976_s28  ;;  %v8793_v7 = vld [vmem:[%s11350_s8 + $0x150] sm:$0xff]   ;;  %v10505_v27 = vpop.permute.xlu1 %6060 }
0x1d75   :  { %6194 = vrot.lane.b32.xlu1 %v8806_v29, %s8976_s28 }
0x1d78   :  { %6074 = vrot.lane.b32.xlu0 %v8757_v37, %s8976_s28  ;;  %v8820_v37 = vld [vmem:[%s11350_s8 + $0x2a0] sm:$0xff]  }
0x1d79   :  { %6226 = vrot.lane.b32.xlu1 %v8808_v58, %s8976_s28  ;;  %v8807_v58 = vld [vmem:[%s11350_s8 + $0x2f8] sm:$0xff]  }
0x1d7c   :  { %6106 = vrot.lane.b32.xlu0 %v8759_v20, %s8976_s28  ;;  %v10515_v20 = vpop.permute.xlu1 %6092 }
0x1d7d   :  { %6192 = vrot.lane.b32.xlu1 %v8810_v28, %s8976_s28 }
0x1d80   :  { %6072 = vrot.lane.b32.xlu0 %v8761_v30, %s8976_s28  ;;  %v8797_v30 = vld [vmem:[%s11350_s8 + $0x148] sm:$0xff]   ;;  %v10533_v44 = vpop.permute.xlu1 %6058 }
0x1d81   :  { %6224 = vrot.lane.b32.xlu1 %v8812_v61, %s8976_s28  ;;  %v8809_v61 = vld [vmem:[%s11350_s8 + $0x270] sm:$0xff]  }
0x1d84   :  { %6104 = vrot.lane.b32.xlu0 %v8763_v43, %s8976_s28  ;;  %v8799_v43 = vld [vmem:[%s11350_s8 + $0x1c8] sm:$0xff]  }
0x1d85   :  { %6190 = vrot.lane.b32.xlu1 %v8814_v1, %s8976_s28  ;;  %v4468_v1 = vrot.slane %v10159_v15, %v9343_v17 }
0x1d88   :  { %6070 = vrot.lane.b32.xlu0 %v8765_v45, %s8976_s28 }
0x1d89   :  { %6222 = vrot.lane.b32.xlu1 %v8816_v4, %s8976_s28 }
0x1d8c   :  { %6102 = vrot.lane.b32.xlu0 %v8767_v13, %s8976_s28 }
0x1d8d   :  { %6188 = vrot.lane.b32.xlu1 %v8818_v38, %s8976_s28  ;;  %v8811_v38 = vld [vmem:[%s11350_s8 + $0x2f0] sm:$0xff]  }
0x1d90   :  { %6068 = vrot.lane.b32.xlu0 %v8769_v8, %s8976_s28 }
0x1d91   :  { %6220 = vrot.lane.b32.xlu1 %v8820_v37, %s8976_s28 }
0x1d94   :  { %6100 = vrot.lane.b32.xlu0 %v8771_v42, %s8976_s28  ;;  %v10543_v42 = vpop.permute.xlu1 %6090 }
0x1d95   :  { %6186 = vrot.lane.b32.xlu1 %v8822_v10, %s8976_s28 }
0x1d98   :  { %6146 = vrot.lane.b32.xlu0 %v8773_v9, %s8976_s28 }
0x1d99   :  { %6218 = vrot.lane.b32.xlu1 %v8824_v35, %s8976_s28  ;;  %v8838_v35 = vld [vmem:[%s11350_s8 + $0x338] sm:$0xff]  }
0x1d9c   :  { %6178 = vrot.lane.b32.xlu0 %v8775_v49, %s8976_s28 }
0x1d9d   :  { %6184 = vrot.lane.b32.xlu1 %v8826_v25, %s8976_s28  ;;  %v7616_v25 = vld [vmem:[%s11348_s6 + $0x118] sm:$0xff] }
0x1da0   :  { %6144 = vrot.lane.b32.xlu0 %v8777_v52, %s8976_s28  ;;  %v8830_v52 = vld [vmem:[%s11350_s8 + $0x208] sm:$0xff]  }
0x1da1   :  { %6216 = vrot.lane.b32.xlu1 %v8828_v48, %s8976_s28 }
0x1da4   :  { %6176 = vrot.lane.b32.xlu0 %v8779_v26, %s8976_s28  ;;  %v10563_v26 = vpop.permute.xlu1 %6056 }
0x1da5   :  { %6182 = vrot.lane.b32.xlu1 %v8830_v52, %s8976_s28  ;;  %v7633_v52 = vld [vmem:[%s11348_s6 + $0x1a0] sm:$0xff] }
0x1da8   :  { %6142 = vrot.lane.b32.xlu0 %v8781_v14, %s8976_s28  ;;  %v8832_v14 = vld [vmem:[%s11350_s8 + $0x288] sm:$0xff]   ;;  %v10577_v28 = vpop.permute.xlu1 %6088 }
0x1da9   :  { %6214 = vrot.lane.b32.xlu1 %v8832_v14, %s8976_s28  ;;  %v7634_v14 = vld [vmem:[%s11348_s6 + $0x1a8] sm:$0xff] }
0x1dac   :  { %6174 = vrot.lane.b32.xlu0 %v8783_v3, %s8976_s28  ;;  %v10600_v37 = vpop.permute.xlu1 %6054 }
0x1db0   :  { %6140 = vrot.lane.b32.xlu0 %v8785_v36, %s8976_s28  ;;  %v8834_v36 = vld [vmem:[%s11350_s8 + $0x200] sm:$0xff]   ;;  %v10633_v48 = vpop.permute.xlu1 %6086 }
0x1db1   :  { %6180 = vrot.lane.b32.xlu1 %v8834_v36, %s8976_s28  ;;  %v8815_v36 = vld [vmem:[%s11350_s8 + $0x2e8] sm:$0xff]  }
0x1db4   :  { %6172 = vrot.lane.b32.xlu0 %v8787_v60, %s8976_s28 }
0x1db8   :  { %6138 = vrot.lane.b32.xlu0 %v8789_v41, %s8976_s28 }
0x1dbc   :  { %6170 = vrot.lane.b32.xlu0 %v8791_v2, %s8976_s28  ;;  %v8836_v2 = vld [vmem:[%s11350_s8 + $0x280] sm:$0xff]  }
0x1dbd   :  { %6212 = vrot.lane.b32.xlu1 %v8836_v2, %s8976_s28 }
0x1dc0   :  { %6136 = vrot.lane.b32.xlu0 %v8793_v7, %s8976_s28 }
0x1dc1   :  { %6258 = vrot.lane.b32.xlu1 %v8838_v35, %s8976_s28  ;;  %v7635_v35 = vld [vmem:[%s11348_s6 + $0x1b0] sm:$0xff] }
0x1dc4   :  { %6168 = vrot.lane.b32.xlu0 %v8795_v39, %s8976_s28 }
0x1dc8   :  { %6134 = vrot.lane.b32.xlu0 %v8797_v30, %s8976_s28 }
0x1dcb   :  { %v4453_v45 = vpop.xlane.xlu0 %4452 }
0x1dcc   :  { %v4457_v13 = vmul.f32 0.03125, %v4453_v45  ;;  %6166 = vrot.lane.b32.xlu0 %v8799_v43, %s8976_s28  ;;  %v7615_v45 = vld [vmem:[%s11348_s6 + $0x110] sm:$0xff] }
0x1dce   :  { %v4459_v8 = vadd.f32 1e-05, %v4457_v13  ;;  %v7624_v13 = vld [vmem:[%s11348_s6 + $0x158] sm:$0xff] }
0x1dcf   :  { %v4456_v11 = vpop.xlane.xlu0 %4455 }
0x1dd0   :  { %8941 = vrsqrt.f32 %v4459_v8  ;;  %v4458_v9 = vmul.f32 0.03125, %v4456_v11  ;;  %6132 = vrot.lane.b32.xlu0 %v8801_v19, %s8976_s28 }
0x1dd2   :  { %v4460_v49 = vadd.f32 1e-05, %v4458_v9 }
0x1dd3   :  { %v10553_v51 = vpop.permute.xlu0 %6066 }
0x1dd4   :  { %8943 = vrsqrt.f32 %v4460_v49  ;;  %6164 = vrot.lane.b32.xlu0 %v8803_v16, %s8976_s28  ;;  %v7654_v49 = vcombine.high %v7616_v25, %v7624_v13 }
0x1dd7   :  { %v10565_v29 = vpop.permute.xlu0 %6080 }
0x1dd8   :  { %6210 = vrot.lane.b32.xlu0 %v8805_v54, %s8976_s28  ;;  %v7641_v54 = vld [vmem:[%s11348_s6 + $0x1e0] sm:$0xff] }
0x1dd9   :  { %v7672_v2 = vcombine.high %v7633_v52, %v7641_v54  ;;  %v7671_v34 = vcombine.low %v7633_v52, %v7641_v54 }
0x1ddb   :  { %v10575_v3 = vpop.permute.xlu0 %6112 }
0x1ddc   :  { %6242 = vrot.lane.b32.xlu0 %v8807_v58, %s8976_s28  ;;  %v7642_v58 = vld [vmem:[%s11348_s6 + $0x1e8] sm:$0xff] }
0x1ddd   :  { %v8942_v60 = vpop.eup %8941 }
0x1dde   :  { %v4463_v41 = vmul.f32 %v8942_v60, %v10211_v31  ;;  %v4474_v31 = vrot.slane %v10159_v15, %v9348_v23  ;;  %v8813_v15 = vld [vmem:[%s11350_s8 + $0x268] sm:$0xff]  }
0x1ddf   :  { %v10590_v4 = vpop.permute.xlu0 %6078 }
0x1de0   :  { %6208 = vrot.lane.b32.xlu0 %v8809_v61, %s8976_s28  ;;  %v4469_v39 = vmul.f32 %v4468_v1, %v4463_v41  ;;  %v8840_v61 = vld [vmem:[%s11350_s8 + $0x3b8] sm:$0xff]  }
0x1de1   :  { %v8944_v7 = vpop.eup %8943  ;;  %6290 = vrot.lane.b32.xlu1 %v8840_v61, %s8976_s28  ;;  %v7620_v61 = vld [vmem:[%s11348_s6 + $0x138] sm:$0xff] }
0x1de2   :  { %v4464_v10 = vmul.f32 %v8944_v7, %v10215_v40  ;;  %v7623_v40 = vld [vmem:[%s11348_s6 + $0x150] sm:$0xff]  ;;  %v10627_v19 = vadd.f32 %v4474_v31, %v4469_v39  ;;  %v7617_v7 = vld [vmem:[%s11348_s6 + $0x120] sm:$0xff] }
0x1de3   :  { %v10605_v30 = vpop.permute.xlu0 %6110  ;;  %v7652_v16 = vcombine.high %v7615_v45, %v7623_v40  ;;  %v7651_v60 = vcombine.low %v7615_v45, %v7623_v40  ;;  %v7656_v39 = vcombine.high %v7617_v7, %v7625_v63  ;;  %v7636_v45 = vld [vmem:[%s11348_s6 + $0x1b8] sm:$0xff]  ;;  %v8817_v40 = vld [vmem:[%s11350_s8 + $0x260] sm:$0xff]  }
0x1de4   :  { %v4470_v43 = vmul.f32 %v4468_v1, %v4464_v10  ;;  %6240 = vrot.lane.b32.xlu0 %v8811_v38, %s8976_s28  ;;  %11371 = vst [vmem:[#allocation9_spill] sm:$0xff] %v10627_v19  ;;  %v7653_v1 = vcombine.low %v7616_v25, %v7624_v13  ;;  %v7674_v38 = vcombine.high %v7634_v14, %v7642_v58  ;;  %v8842_v25 = vld [vmem:[%s11350_s8 + $0x330] sm:$0xff]  }
0x1de5   :  { %v7658_v10 = vcombine.high %v7618_v47, %v7626_v32  ;;  %v7655_v13 = vcombine.low %v7617_v7, %v7625_v63  ;;  %6256 = vrot.lane.b32.xlu1 %v8842_v25, %s8976_s28 }
0x1de6   :  { %v10629_v8 = vadd.f32 %v4474_v31, %v4470_v43  ;;  %v7643_v43 = vld [vmem:[%s11348_s6 + $0x1f0] sm:$0xff] }
0x1de7   :  { %v10631_v11 = vpop.permute.xlu0 %6076  ;;  %v7676_v54 = vcombine.high %v7635_v35, %v7643_v43 }
0x1de8   :  { %11372 = vst [vmem:[#allocation10_spill] sm:$0xff] %v10629_v8  ;;  %v10638_v9 = vpack.c.bf16 %v10629_v8, %v10627_v19  ;;  %6206 = vrot.lane.b32.xlu0 %v8813_v15, %s8976_s28  ;;  %v7644_v15 = vld [vmem:[%s11348_s6 + $0x1f8] sm:$0xff] }
0x1dea   :  { %7679 = vmatmul.mubr.msk.bf16.vlgmr.msra.gmra.mxu0 %vm245_vm4, %v10638_v9  ;;  %7680 = vmatmul.mubr.msk.bf16.vlgmr.msra.gmra.mxu1 %vm245_vm4, %v10638_v9 }
0x1deb   :  { %4859 = vmatpush1.bf16.msra.mxu0 %v7667_v33  ;;  %4902 = vmatpush1.bf16.msra.mxu1 %v7669_v0  ;;  %v10669_v41 = vpop.permute.xlu0 %6108  ;;  %v10685_v33 = vpop.permute.xlu1 %6052  ;;  %v7673_v0 = vcombine.low %v7634_v14, %v7642_v58  ;;  %v7678_v14 = vcombine.high %v7636_v45, %v7644_v15  ;;  %v7619_v58 = vld [vmem:[%s11348_s6 + $0x130] sm:$0xff] }
0x1dec   :  { %4860 = vmatprep.subr.bf16.mxu0 %v7652_v16  ;;  %4903 = vmatprep.subr.bf16.mxu1 %v7654_v49  ;;  %v7657_v16 = vcombine.low %v7618_v47, %v7626_v32  ;;  %v8819_v32 = vld [vmem:[%s11350_s8 + $0x2e0] sm:$0xff]  }
0x1ded   :  { %4878 = vmatprep.mubr.bf16.mxu0 %v8991_v62  ;;  %4921 = vmatprep.mubr.bf16.mxu1 %v8991_v62 }
0x1dee   :  { %6238 = vrot.lane.b32.xlu0 %v8815_v36, %s8976_s28  ;;  %v7627_v36 = vld [vmem:[%s11348_s6 + $0x170] sm:$0xff] }
0x1def   :  { %4861 = vmatpush1.bf16.msra.mxu0 %v7651_v60  ;;  %4904 = vmatpush1.bf16.msra.mxu1 %v7653_v1  ;;  %v10689_v31 = vpop.permute.xlu0 %6074  ;;  %v10715_v52 = vpop.permute.xlu1 %6084  ;;  %v7628_v60 = vld [vmem:[%s11348_s6 + $0x178] sm:$0xff]  ;;  %v7675_v1 = vcombine.low %v7635_v35, %v7643_v43  ;;  %v7660_v7 = vcombine.high %v7619_v58, %v7627_v36 }
0x1df0   :  { %4944 = vmatprep.subr.bf16.mxu0 %v7672_v2  ;;  %4987 = vmatprep.subr.bf16.mxu1 %v7674_v38  ;;  %v7677_v2 = vcombine.low %v7636_v45, %v7644_v15  ;;  %v7662_v63 = vcombine.high %v7620_v61, %v7628_v60  ;;  %v8821_v45 = vld [vmem:[%s11350_s8 + $0x258] sm:$0xff]  }
0x1df2   :  { %7681 = vmatmul.mubr.msk.bf16.vlgmr.msra.gmra.mxu0 %vm245_vm4, %v10638_v9  ;;  %7682 = vmatmul.mubr.msk.bf16.vlgmr.msra.gmra.mxu1 %vm245_vm4, %v10638_v9 }
0x1df3   :  { %4945 = vmatpush1.bf16.msra.mxu0 %v7671_v34  ;;  %4988 = vmatpush1.bf16.msra.mxu1 %v7673_v0  ;;  %v10713_v49 = vpop.permute.xlu0 %6106  ;;  %v10735_v47 = vpop.permute.xlu1 %6130  ;;  %v8844_v34 = vld [vmem:[%s11350_s8 + $0x3b0] sm:$0xff]   ;;  %v7659_v0 = vcombine.low %v7619_v58, %v7627_v36 }
0x1df4   :  { %4946 = vmatprep.subr.bf16.mxu0 %v7656_v39  ;;  %4989 = vmatprep.subr.bf16.mxu1 %v7658_v10  ;;  %v7661_v39 = vcombine.low %v7620_v61, %v7628_v60  ;;  %v8841_v58 = vld [vmem:[%s11350_s8 + $0x370] sm:$0xff]   ;;  %v8866_v61 = vld [vmem:[%s11350_s8 + $0x300] sm:$0xff]  }
0x1df5   :  { %4964 = vmatprep.mubr.bf16.mxu0 %v8991_v62  ;;  %5007 = vmatprep.mubr.bf16.mxu1 %v8991_v62 }
0x1df6   :  { %6204 = vrot.lane.b32.xlu0 %v8817_v40, %s8976_s28  ;;  %6288 = vrot.lane.b32.xlu1 %v8844_v34, %s8976_s28  ;;  %v8835_v40 = vld [vmem:[%s11350_s8 + $0x2c0] sm:$0xff]   ;;  %v8847_v34 = vld [vmem:[%s11350_s8 + $0x3e8] sm:$0xff]  }
0x1df7   :  { %4947 = vmatpush1.bf16.msra.mxu0 %v7655_v13  ;;  %4990 = vmatpush1.bf16.msra.mxu1 %v7657_v16  ;;  %v10733_v38 = vpop.permute.xlu0 %6072  ;;  %v10751_v43 = vpop.permute.xlu1 %6162  ;;  %v8837_v13 = vld [vmem:[%s11350_s8 + $0x378] sm:$0xff]   ;;  %v8862_v16 = vld [vmem:[%s11350_s8 + $0x308] sm:$0xff]  }
0x1df8   :  { %5030 = vmatprep.subr.bf16.mxu0 %v7676_v54  ;;  %5073 = vmatprep.subr.bf16.mxu1 %v7678_v14  ;;  %v8864_v54 = vld [vmem:[%s11350_s8 + $0x388] sm:$0xff]  }
0x1dfa   :  { %7683 = vmatmul.mubr.msk.bf16.vlgmr.msra.gmra.mxu0 %vm245_vm4, %v10638_v9  ;;  %7684 = vmatmul.mubr.msk.bf16.vlgmr.msra.gmra.mxu1 %vm245_vm4, %v10638_v9 }
0x1dfb   :  { %5031 = vmatpush1.bf16.msra.mxu0 %v7675_v1  ;;  %5074 = vmatpush1.bf16.msra.mxu1 %v7677_v2  ;;  %v6105_v10 = vpop.permute.xlu0 %6104  ;;  %v10773_v15 = vpop.permute.xlu1 %6128  ;;  %v8843_v1 = vld [vmem:[%s11350_s8 + $0x3f0] sm:$0xff]   ;;  %v8868_v2 = vld [vmem:[%s11350_s8 + $0x380] sm:$0xff]  }
0x1dfc   :  { %5032 = vmatprep.subr.bf16.mxu0 %v7660_v7  ;;  %5075 = vmatprep.subr.bf16.mxu1 %v7662_v63  ;;  %v8845_v63 = vld [vmem:[%s11350_s8 + $0x368] sm:$0xff]  }
0x1dfd   :  { %5050 = vmatprep.mubr.bf16.mxu0 %v8991_v62  ;;  %5093 = vmatprep.mubr.bf16.mxu1 %v8991_v62  ;;  %v8846_v62 = vld [vmem:[%s11350_s8 + $0x328] sm:$0xff]  }
0x1dfe   :  { %6236 = vrot.lane.b32.xlu0 %v8819_v32, %s8976_s28  ;;  %6254 = vrot.lane.b32.xlu1 %v8846_v62, %s8976_s28  ;;  %v8851_v62 = vld [vmem:[%s11350_s8 + $0x3e0] sm:$0xff]  }
0x1dff   :  { %5033 = vmatpush1.bf16.msra.mxu0 %v7659_v0  ;;  %5076 = vmatpush1.bf16.msra.mxu1 %v7661_v39  ;;  %v6071_v35 = vpop.permute.xlu0 %6070 }
0x1e00   :  { %8087 = vmatprep.subr.bf16.mxu0 %v10404_v18  ;;  %8109 = vmatprep.subr.bf16.mxu1 %v10421_v50  ;;  %v8823_v50 = vld [vmem:[%s11350_s8 + $0x2d8] sm:$0xff]  }
0x1e02   :  { %7685 = vmatmul.mubr.msk.bf16.vlgmr.msra.gmra.mxu0 %vm245_vm4, %v10638_v9  ;;  %7686 = vmatmul.mubr.msk.bf16.vlgmr.msra.gmra.mxu1 %vm245_vm4, %v10638_v9  ;;  %v8831_v9 = vld [vmem:[%s11350_s8 + $0x2c8] sm:$0xff]  }
0x1e03   :  { %8088 = vmatpush3.bf16.msra.mxu0 %v10553_v51  ;;  %8110 = vmatpush3.bf16.msra.mxu1 %v10431_v53  ;;  %v6103_v18 = vpop.permute.xlu0 %6102  ;;  %v8848_v51 = vld [vmem:[%s11350_s8 + $0x3a8] sm:$0xff]  }
0x1e04   :  { %8089 = vmatprep.subr.bf16.mxu0 %v10565_v29  ;;  %8111 = vmatprep.subr.bf16.mxu1 %v10575_v3  ;;  %v8825_v29 = vld [vmem:[%s11350_s8 + $0x250] sm:$0xff]   ;;  %v8850_v3 = vld [vmem:[%s11350_s8 + $0x320] sm:$0xff]  }
0x1e05   :  { %6202 = vrot.lane.b32.xlu0 %v8821_v45, %s8976_s28  ;;  %6286 = vrot.lane.b32.xlu1 %v8848_v51, %s8976_s28 }
0x1e07   :  { %8090 = vmatpush3.bf16.msra.mxu0 %v10449_v55  ;;  %8112 = vmatpush3.bf16.msra.mxu1 %v10459_v59  ;;  %v6069_v53 = vpop.permute.xlu0 %6068  ;;  %v10793_v59 = vpop.permute.xlu1 %6160 }
0x1e08   :  { %8091 = vmatprep.subr.bf16.mxu0 %v10590_v4  ;;  %8113 = vmatprep.subr.bf16.mxu1 %v10605_v30  ;;  %v8827_v4 = vld [vmem:[%s11350_s8 + $0x2d0] sm:$0xff]   ;;  %v8829_v30 = vld [vmem:[%s11350_s8 + $0x248] sm:$0xff]  }
0x1e09   :  { %6234 = vrot.lane.b32.xlu0 %v8823_v50, %s8976_s28  ;;  %6252 = vrot.lane.b32.xlu1 %v8850_v3, %s8976_s28  ;;  %v8853_v50 = vld [vmem:[%s11350_s8 + $0x358] sm:$0xff]  }
0x1e0b   :  { %8092 = vmatpush3.bf16.msra.mxu0 %v10477_v46  ;;  %8114 = vmatpush3.bf16.msra.mxu1 %v10487_v6  ;;  %v6101_v55 = vpop.permute.xlu0 %6100  ;;  %v8852_v46 = vld [vmem:[%s11350_s8 + $0x3a0] sm:$0xff]  }
0x1e0c   :  { %8093 = vmatprep.subr.bf16.mxu0 %v10631_v11  ;;  %8115 = vmatprep.subr.bf16.mxu1 %v10669_v41  ;;  %v10813_v11 = vpop.permute.xlu1 %6126  ;;  %v8856_v41 = vld [vmem:[%s11350_s8 + $0x398] sm:$0xff]  }
0x1e0d   :  { %6200 = vrot.lane.b32.xlu0 %v8825_v29, %s8976_s28  ;;  %6284 = vrot.lane.b32.xlu1 %v8852_v46, %s8976_s28  ;;  %v8855_v29 = vld [vmem:[%s11350_s8 + $0x3d8] sm:$0xff]  }
0x1e0f   :  { %8094 = vmatpush3.bf16.msra.mxu0 %v10505_v27  ;;  %8116 = vmatpush3.bf16.msra.mxu1 %v10515_v20  ;;  %v6147_v6 = vpop.permute.xlu0 %6146  ;;  %v8854_v27 = vld [vmem:[%s11350_s8 + $0x318] sm:$0xff]  }
0x1e10   :  { %8095 = vmatprep.subr.bf16.mxu0 %v10689_v31  ;;  %8117 = vmatprep.subr.bf16.mxu1 %v10713_v49  ;;  %v8833_v31 = vld [vmem:[%s11350_s8 + $0x240] sm:$0xff]  }
0x1e11   :  { %6232 = vrot.lane.b32.xlu0 %v8827_v4, %s8976_s28  ;;  %6250 = vrot.lane.b32.xlu1 %v8854_v27, %s8976_s28  ;;  %v8861_v27 = vld [vmem:[%s11350_s8 + $0x348] sm:$0xff]  }
0x1e13   :  { %8096 = vmatpush3.bf16.msra.mxu0 %v10533_v44  ;;  %8118 = vmatpush3.bf16.msra.mxu1 %v10543_v42  ;;  %v6179_v20 = vpop.permute.xlu0 %6178  ;;  %v10834_v42 = vpop.permute.xlu1 %6158 }
0x1e14   :  { %8097 = vmatprep.subr.bf16.mxu0 %v10733_v38  ;;  %8119 = vmatprep.subr.bf16.mxu1 %v6105_v10  ;;  %v8849_v10 = vld [vmem:[%s11350_s8 + $0x360] sm:$0xff]  }
0x1e15   :  { %6198 = vrot.lane.b32.xlu0 %v8829_v30, %s8976_s28  ;;  %6282 = vrot.lane.b32.xlu1 %v8856_v41, %s8976_s28  ;;  %v8863_v41 = vld [vmem:[%s11350_s8 + $0x3c8] sm:$0xff]  }
0x1e17   :  { %8098 = vmatpush3.bf16.msra.mxu0 %v10563_v26  ;;  %8120 = vmatpush3.bf16.msra.mxu1 %v10577_v28  ;;  %v10832_v44 = vpop.permute.xlu0 %6144  ;;  %v8858_v26 = vld [vmem:[%s11350_s8 + $0x310] sm:$0xff]   ;;  %v10852_v25 = vpop.permute.xlu1 %6124 }
0x1e18   :  { %8099 = vmatprep.subr.bf16.mxu0 %v6071_v35  ;;  %8121 = vmatprep.subr.bf16.mxu1 %v6103_v18 }
0x1e19   :  { %6230 = vrot.lane.b32.xlu0 %v8831_v9, %s8976_s28  ;;  %6248 = vrot.lane.b32.xlu1 %v8858_v26, %s8976_s28  ;;  %v8865_v26 = vld [vmem:[%s11350_s8 + $0x340] sm:$0xff]  }
0x1e1b   :  { %8100 = vmatpush3.bf16.msra.mxu0 %v10600_v37  ;;  %8122 = vmatpush3.bf16.msra.mxu1 %v10633_v48  ;;  %v10846_v28 = vpop.permute.xlu0 %6176  ;;  %v8860_v37 = vld [vmem:[%s11350_s8 + $0x390] sm:$0xff]  }
0x1e1c   :  { %8101 = vmatprep.subr.bf16.mxu0 %v6069_v53  ;;  %8123 = vmatprep.subr.bf16.mxu1 %v6101_v55  ;;  %v8857_v55 = vld [vmem:[%s11350_s8 + $0x350] sm:$0xff]  }
0x1e1d   :  { %6196 = vrot.lane.b32.xlu0 %v8833_v31, %s8976_s28  ;;  %6280 = vrot.lane.b32.xlu1 %v8860_v37, %s8976_s28  ;;  %v8867_v37 = vld [vmem:[%s11350_s8 + $0x3c0] sm:$0xff]  }
0x1e1f   :  { %8102 = vmatpush3.bf16.msra.mxu0 %v10685_v33  ;;  %8124 = vmatpush3.bf16.msra.mxu1 %v10715_v52  ;;  %v10860_v48 = vpop.permute.xlu0 %6142  ;;  %v10872_v33 = vpop.permute.xlu1 %6156  ;;  %v8839_v52 = vld [vmem:[%s11350_s8 + $0x3f8] sm:$0xff]  }
0x1e20   :  { %8131 = vmatprep.subr.bf16.mxu0 %v6147_v6  ;;  %8153 = vmatprep.subr.bf16.mxu1 %v6179_v20  ;;  %v8859_v6 = vld [vmem:[%s11350_s8 + $0x3d0] sm:$0xff]  }
0x1e21   :  { %6228 = vrot.lane.b32.xlu0 %v8835_v40, %s8976_s28  ;;  %6246 = vrot.lane.b32.xlu1 %v8862_v16, %s8976_s28 }
0x1e23   :  { %v10870_v49 = vpop.permute.xlu0 %6174  ;;  %v10888_v36 = vpop.permute.xlu1 %6122 }
0x1e25   :  { %6274 = vrot.lane.b32.xlu0 %v8837_v13, %s8976_s28  ;;  %6278 = vrot.lane.b32.xlu1 %v8864_v54, %s8976_s28 }
0x1e27   :  { %v10882_v14 = vpop.permute.xlu0 %6140  ;;  %v10906_v7 = vpop.permute.xlu1 %6154 }
0x1e29   :  { %6306 = vrot.lane.b32.xlu0 %v8839_v52, %s8976_s28  ;;  %6244 = vrot.lane.b32.xlu1 %v8866_v61, %s8976_s28 }
0x1e2b   :  { %v10894_v60 = vpop.permute.xlu0 %6172  ;;  %v10919_v0 = vpop.permute.xlu1 %6120 }
0x1e2d   :  { %6272 = vrot.lane.b32.xlu0 %v8841_v58, %s8976_s28  ;;  %6276 = vrot.lane.b32.xlu1 %v8868_v2, %s8976_s28 }
0x1e2f   :  { %v10904_v38 = vpop.permute.xlu0 %6138  ;;  %v10929_v45 = vpop.permute.xlu1 %6152 }
0x1e31   :  { %6304 = vrot.lane.b32.xlu0 %v8843_v1, %s8976_s28 }
0x1e33   :  { %v10913_v32 = vpop.permute.xlu0 %6170  ;;  %v10941_v51 = vpop.permute.xlu1 %6118 }
0x1e35   :  { %6270 = vrot.lane.b32.xlu0 %v8845_v63, %s8976_s28 }
0x1e37   :  { %v10921_v39 = vpop.permute.xlu0 %6136  ;;  %v10949_v3 = vpop.permute.xlu1 %6150 }
0x1e39   :  { %6302 = vrot.lane.b32.xlu0 %v8847_v34, %s8976_s28 }
0x1e3b   :  { %v10927_v35 = vpop.permute.xlu0 %6168  ;;  %v10958_v46 = vpop.permute.xlu1 %6116 }
0x1e3d   :  { %6268 = vrot.lane.b32.xlu0 %v8849_v10, %s8976_s28 }
0x1e3f   :  { %v10935_v18 = vpop.permute.xlu0 %6134  ;;  %v10969_v20 = vpop.permute.xlu1 %6148 }
0x1e41   :  { %6300 = vrot.lane.b32.xlu0 %v8851_v62, %s8976_s28 }
0x1e43   :  { %v10943_v53 = vpop.permute.xlu0 %6166  ;;  %v10977_v31 = vpop.permute.xlu1 %6194 }
0x1e44   :  { %11374 = vst [vmem:[#allocation12_spill] sm:$0xff] %v10977_v31 }
0x1e45   :  { %6266 = vrot.lane.b32.xlu0 %v8853_v50, %s8976_s28 }
0x1e47   :  { %v10955_v4 = vpop.permute.xlu0 %6132  ;;  %v10989_v13 = vpop.permute.xlu1 %6226 }
0x1e48   :  { %11376 = vst [vmem:[#allocation14_spill] sm:$0xff] %v10989_v13 }
0x1e49   :  { %6298 = vrot.lane.b32.xlu0 %v8855_v29, %s8976_s28 }
0x1e4b   :  { %v10963_v30 = vpop.permute.xlu0 %6164  ;;  %v10994_v52 = vpop.permute.xlu1 %6192 }
0x1e4c   :  { %11378 = vst [vmem:[#allocation16_spill] sm:$0xff] %v10994_v52 }
0x1e4d   :  { %6264 = vrot.lane.b32.xlu0 %v8857_v55, %s8976_s28 }
0x1e4f   :  { %v10972_v9 = vpop.permute.xlu0 %6210  ;;  %v10998_v58 = vpop.permute.xlu1 %6224 }
0x1e50   :  { %11373 = vst [vmem:[#allocation11_spill] sm:$0xff] %v10972_v9  ;;  %11380 = vst [vmem:[#allocation18_spill] sm:$0xff] %v10998_v58 }
0x1e51   :  { %6296 = vrot.lane.b32.xlu0 %v8859_v6, %s8976_s28 }
0x1e53   :  { %v10983_v40 = vpop.permute.xlu0 %6242  ;;  %v11002_v1 = vpop.permute.xlu1 %6190 }
0x1e54   :  { %11375 = vst [vmem:[#allocation13_spill] sm:$0xff] %v10983_v40  ;;  %11382 = vst [vmem:[#allocation20_spill] sm:$0xff] %v11002_v1 }
0x1e55   :  { %6262 = vrot.lane.b32.xlu0 %v8861_v27, %s8976_s28 }
0x1e57   :  { %v10991_v16 = vpop.permute.xlu0 %6208  ;;  %v11006_v63 = vpop.permute.xlu1 %6222 }
0x1e58   :  { %11377 = vst [vmem:[#allocation15_spill] sm:$0xff] %v10991_v16  ;;  %11384 = vst [vmem:[#allocation22_spill] sm:$0xff] %v11006_v63 }
0x1e59   :  { %6294 = vrot.lane.b32.xlu0 %v8863_v41, %s8976_s28 }
0x1e5b   :  { %v10996_v54 = vpop.permute.xlu0 %6240  ;;  %v11010_v10 = vpop.permute.xlu1 %6188 }
0x1e5c   :  { %11379 = vst [vmem:[#allocation17_spill] sm:$0xff] %v10996_v54  ;;  %11386 = vst [vmem:[#allocation24_spill] sm:$0xff] %v11010_v10 }
0x1e5d   :  { %6260 = vrot.lane.b32.xlu0 %v8865_v26, %s8976_s28 }
0x1e5f   :  { %v11000_v61 = vpop.permute.xlu0 %6206  ;;  %v11014_v50 = vpop.permute.xlu1 %6220 }
0x1e60   :  { %11381 = vst [vmem:[#allocation19_spill] sm:$0xff] %v11000_v61  ;;  %11388 = vst [vmem:[#allocation26_spill] sm:$0xff] %v11014_v50 }
0x1e61   :  { %6292 = vrot.lane.b32.xlu0 %v8867_v37, %s8976_s28 }
0x1e63   :  { %v11004_v2 = vpop.permute.xlu0 %6238  ;;  %v11018_v55 = vpop.permute.xlu1 %6186 }
0x1e64   :  { %11383 = vst [vmem:[#allocation21_spill] sm:$0xff] %v11004_v2  ;;  %11390 = vst [vmem:[#allocation28_spill] sm:$0xff] %v11018_v55 }
0x1e67   :  { %v11022_v27 = vpop.permute.xlu1 %6218 }
0x1e68   :  { %v11008_v34 = vpop.permute.xlu0 %6204  ;;  %11392 = vst [vmem:[#allocation30_spill] sm:$0xff] %v11022_v27  ;;  %v11043_v27 = vld [vmem:[%s11349_s7 + $0x1] ss:$2 sm:$0xff] }
0x1e69   :  { %11385 = vst [vmem:[#allocation23_spill] sm:$0xff] %v11008_v34 }
0x1e6b   :  { %v11026_v26 = vpop.permute.xlu1 %6184 }
0x1e6c   :  { %11394 = vst [vmem:[#allocation32_spill] sm:$0xff] %v11026_v26 }
0x1e6f   :  { %v11030_v5 = vpop.permute.xlu1 %6216 }
0x1e70   :  { %v11012_v62 = vpop.permute.xlu0 %6236  ;;  %11396 = vst [vmem:[#allocation34_spill] sm:$0xff] %v11030_v5  ;;  %v4524_v5 = vrot.slane %v11043_v27, %v9343_v17 }
0x1e71   :  { %11387 = vst [vmem:[#allocation25_spill] sm:$0xff] %v11012_v62 }
0x1e73   :  { %v11034_v19 = vpop.permute.xlu1 %6182 }
0x1e74   :  { %11398 = vst [vmem:[#allocation36_spill] sm:$0xff] %v11034_v19  ;;  %v4520_v19 = vrot.slane %v11043_v27, %v9287_v21 }
0x1e77   :  { %v11016_v29 = vpop.permute.xlu0 %6202 }
0x1e78   :  { %11389 = vst [vmem:[#allocation27_spill] sm:$0xff] %v11016_v29  ;;  %v11038_v29 = vpop.permute.xlu1 %6214 }
0x1e79   :  { %11400 = vst [vmem:[#allocation38_spill] sm:$0xff] %v11038_v29  ;;  %v4528_v29 = vrot.slane %v11043_v27, %v9348_v23 }
0x1e7b   :  { %v11020_v6 = vpop.permute.xlu0 %6234 }
0x1e7c   :  { %11391 = vst [vmem:[#allocation29_spill] sm:$0xff] %v11020_v6  ;;  %v11055_v6 = vpop.permute.xlu1 %6180 }
0x1e7d   :  { %11402 = vst [vmem:[#allocation40_spill] sm:$0xff] %v11055_v6 }
0x1e7f   :  { %v11024_v41 = vpop.permute.xlu0 %6200 }
0x1e80   :  { %11393 = vst [vmem:[#allocation31_spill] sm:$0xff] %v11024_v41 }
0x1e83   :  { %v11028_v37 = vpop.permute.xlu0 %6232 }
0x1e84   :  { %11395 = vst [vmem:[#allocation33_spill] sm:$0xff] %v11028_v37 }
0x1e87   :  { %v11032_v8 = vpop.permute.xlu0 %6198 }
0x1e88   :  { %11397 = vst [vmem:[#allocation35_spill] sm:$0xff] %v11032_v8  ;;  %v4532_v8 = vrot.slane %v11043_v27, %v9545_v12 }
0x1e8b   :  { %v11036_v50 = vpop.permute.xlu0 %6230 }
0x1e8c   :  { %11399 = vst [vmem:[#allocation37_spill] sm:$0xff] %v11036_v50 }
0x1e8f   :  { %v11045_v41 = vpop.permute.xlu0 %6196 }
0x1e90   :  { %11401 = vst [vmem:[#allocation39_spill] sm:$0xff] %v11045_v41 }
0x1e93   :  { %v11057_v2 = vpop.permute.xlu0 %6228 }
0x1e94   :  { %11403 = vst [vmem:[#allocation41_spill] sm:$0xff] %v11057_v2 }
0x1eaa   :  { %v4794_v26 = vpop.f32.mrf.mxu0  ;;  %v4837_v55 = vpop.f32.mrf.mxu1 }
0x1eab   :  { %v4795_v61 = vadd.f32 %v4794_v26, %v4520_v19  ;;  %v4838_v58 = vadd.f32 %v4837_v55, %v4528_v29  ;;  %v11067_v55 = vpop.permute.xlu1 %6212  ;;  %v11069_v26 = vpop.permute.xlu0 %6274 }
0x1eac   :  { %v4796_v50 = vpop.f32.mrf.mxu0  ;;  %v4839_v37 = vpop.f32.mrf.mxu1 }
0x1ead   :  { %v4797_v62 = vadd.f32 %v4796_v50, %v4524_v5  ;;  %v4840_v34 = vadd.f32 %v4839_v37, %v4532_v8  ;;  %v4540_v50 = vrot.slane %v11043_v27, %v9561_v56 }
0x1eae   :  { %v4798_v10 = vpop.f32.mrf.mxu0  ;;  %v4841_v41 = vpop.f32.mrf.mxu1 }
0x1eaf   :  { %v4799_v63 = vadd.f32 %v4798_v10, %v4520_v19  ;;  %v4842_v1 = vadd.f32 %v4841_v41, %v4528_v29  ;;  %v4548_v10 = vrot.slane %v11043_v27, %v9564_v57  ;;  %v5105_v41 = vmax.f32 %v4797_v62, 0.0 }
0x1eb0   :  { %v4800_v52 = vpop.f32.mrf.mxu0  ;;  %v4843_v54 = vpop.f32.mrf.mxu1  ;;  %v5107_v37 = vmax.f32 %v4840_v34, 0.0 }
0x1eb1   :  { %v4801_v21 = vadd.f32 %v4800_v52, %v4524_v5  ;;  %v4844_v16 = vadd.f32 %v4843_v54, %v4532_v8  ;;  %v5120_v13 = vmax.f32 %v4799_v63, 0.0  ;;  %v5122_v23 = vmax.f32 %v4842_v1, 0.0  ;;  %v11075_v34 = vpop.permute.xlu1 %6258 }
0x1eb2   :  { %v11059_v31 = vpop.f32.mrf.mxu0  ;;  %v11061_v40 = vpop.f32.mrf.mxu1  ;;  %v5104_v5 = vmax.f32 %v4795_v61, 0.0  ;;  %v5106_v8 = vmax.f32 %v4838_v58, 0.0 }
0x1eb3   :  { %v5121_v19 = vmax.f32 %v4801_v21, 0.0  ;;  %v5123_v29 = vmax.f32 %v4844_v16, 0.0 }
0x1eb4   :  { %v4882_v52 = vpop.f32.mrf.mxu0  ;;  %v4925_v54 = vpop.f32.mrf.mxu1  ;;  %v5136_v6 = vpack.c.bf16 %v5120_v13, %v5104_v5  ;;  %v5138_v2 = vpack.c.bf16 %v5122_v23, %v5106_v8 }
0x1eb5   :  { %v5137_v1 = vpack.c.bf16 %v5121_v19, %v5105_v41  ;;  %v5139_v63 = vpack.c.bf16 %v5123_v29, %v5107_v37  ;;  %v4883_v57 = vadd.f32 %v4882_v52, %v4540_v50  ;;  %v4926_v62 = vadd.f32 %v4925_v54, %v4548_v10  ;;  %v11079_v19 = vpop.permute.xlu0 %6306  ;;  %v11404_v52 = vld [vmem:[#allocation11_spill] sm:$0xff]  ;;  %v11405_v54 = vld [vmem:[#allocation13_spill] sm:$0xff] }
0x1eb6   :  { %v4884_v56 = vpop.f32.mrf.mxu0  ;;  %v11071_v9 = vpop.f32.mrf.mxu1 }
0x1eb7   :  { %6468 = vmatprep.mubr.bf16.mxu0 %v5137_v1  ;;  %6509 = vmatprep.mubr.bf16.mxu1 %v5139_v63  ;;  %v5109_v23 = vmax.f32 %v4883_v57, 0.0  ;;  %v5111_v13 = vmax.f32 %v4926_v62, 0.0  ;;  %v11406_v62 = vld [vmem:[#allocation12_spill] sm:$0xff] }
0x1eb8   :  { %v4886_v21 = vpop.f32.mrf.mxu0  ;;  %v4929_v16 = vpop.f32.mrf.mxu1  ;;  %6469 = vmatmul.mubr.bf16.vlgmr.msra.gmra.mxu0 %v5136_v6  ;;  %6510 = vmatmul.mubr.bf16.vlgmr.msra.gmra.mxu1 %v5138_v2 }
0x1eb9   :  { %v4887_v58 = vadd.f32 %v4886_v21, %v4540_v50  ;;  %v4930_v61 = vadd.f32 %v4929_v16, %v4548_v10  ;;  %8132 = vmatpush3.bf16.msra.mxu0 %v10735_v47  ;;  %8154 = vmatpush3.bf16.msra.mxu1 %v10751_v43  ;;  %v11085_v47 = vpop.permute.xlu1 %6290  ;;  %v11409_v16 = vld [vmem:[#allocation17_spill] sm:$0xff] }
0x1eba   :  { %8133 = vmatprep.subr.bf16.mxu0 %v10832_v44  ;;  %8155 = vmatprep.subr.bf16.mxu1 %v10846_v28  ;;  %v11087_v57 = vpop.f32.mrf.mxu0  ;;  %v11090_v43 = vpop.f32.mrf.mxu1 }
0x1ebb   :  { %v5125_v41 = vmax.f32 %v4887_v58, 0.0  ;;  %v5127_v37 = vmax.f32 %v4930_v61, 0.0  ;;  %v11410_v58 = vld [vmem:[#allocation16_spill] sm:$0xff] }
0x1ebc   :  { %v5011_v28 = vpop.f32.mrf.mxu1 }
0x1ebd   :  { %v5141_v6 = vpack.c.bf16 %v5125_v41, %v5109_v23  ;;  %v5143_v2 = vpack.c.bf16 %v5127_v37, %v5111_v13  ;;  %8134 = vmatpush3.bf16.msra.mxu0 %v10773_v15  ;;  %8156 = vmatpush3.bf16.msra.mxu1 %v10793_v59  ;;  %v11094_v15 = vpop.permute.xlu0 %6272  ;;  %v4968_v59 = vpop.f32.mrf.mxu0  ;;  %v11411_v23 = vld [vmem:[#allocation18_spill] sm:$0xff]  ;;  %v11412_v13 = vld [vmem:[#allocation19_spill] sm:$0xff]  ;;  %v11413_v41 = vld [vmem:[#allocation21_spill] sm:$0xff] }
0x1ebe   :  { %8135 = vmatprep.subr.bf16.mxu0 %v10860_v48  ;;  %8157 = vmatprep.subr.bf16.mxu1 %v10870_v49  ;;  %v11098_v44 = vpop.permute.xlu1 %6256  ;;  %v11108_v48 = vpop.f32.mrf.mxu1  ;;  %v4536_v49 = vrot.slane %v11043_v27, %v9643_v22 }
0x1ebf   :  { %6550 = vmatprep.mubr.bf16.mxu0 %v5141_v6  ;;  %6591 = vmatprep.mubr.bf16.mxu1 %v5143_v2  ;;  %v11414_v2 = vld [vmem:[#allocation20_spill] sm:$0xff] }
0x1ec1   :  { %8136 = vmatpush3.bf16.msra.mxu0 %v10813_v11  ;;  %8158 = vmatpush3.bf16.msra.mxu1 %v10834_v42  ;;  %v11103_v11 = vpop.permute.xlu0 %6304  ;;  %v11105_v42 = vpop.f32.mrf.mxu0 }
0x1ec2   :  { %8137 = vmatprep.subr.bf16.mxu0 %v10882_v14  ;;  %8159 = vmatprep.subr.bf16.mxu1 %v10894_v60  ;;  %v11122_v14 = vld [vmem:[%s11349_s7 + $0x11] ss:$2 sm:$0xff]  ;;  %v4885_v60 = vadd.f32 %v4884_v56, %v4536_v49 }
0x1ec5   :  { %8138 = vmatpush3.bf16.msra.mxu0 %v10852_v25  ;;  %8160 = vmatpush3.bf16.msra.mxu1 %v10872_v33  ;;  %v11113_v25 = vpop.permute.xlu1 %6288  ;;  %v4544_v33 = vrot.slane %v11043_v27, %v9646_v24 }
0x1ec6   :  { %8139 = vmatprep.subr.bf16.mxu0 %v10904_v38  ;;  %8161 = vmatprep.subr.bf16.mxu1 %v10913_v32  ;;  %v4556_v38 = vrot.slane %v11122_v14, %v9343_v17  ;;  %v11129_v32 = vpop.permute.xlu0 %6270 }
0x1ec7   :  { %v4924_v27 = vadd.f32 %v11061_v40, %v4544_v33 }
0x1ec8   :  { %v4969_v50 = vadd.f32 %v4968_v59, %v4556_v38 }
0x1ec9   :  { %8140 = vmatpush3.bf16.msra.mxu0 %v10888_v36  ;;  %8162 = vmatpush3.bf16.msra.mxu1 %v10906_v7  ;;  %v4972_v36 = vpop.f32.mrf.mxu0  ;;  %v5015_v7 = vpop.f32.mrf.mxu1  ;;  %v5110_v40 = vmax.f32 %v4924_v27, 0.0 }
0x1eca   :  { %8141 = vmatprep.subr.bf16.mxu0 %v10921_v39  ;;  %8163 = vmatprep.subr.bf16.mxu1 %v10927_v35  ;;  %v4928_v39 = vadd.f32 %v11071_v9, %v4544_v33  ;;  %v4564_v35 = vrot.slane %v11122_v14, %v9545_v12  ;;  %v4973_v56 = vadd.f32 %v4972_v36, %v4556_v38  ;;  %v11143_v29 = vpop.permute.xlu0 %6302  ;;  %v5113_v8 = vmax.f32 %v4969_v50, 0.0  ;;  %v11417_v33 = vld [vmem:[#allocation25_spill] sm:$0xff]  ;;  %v11418_v38 = vld [vmem:[#allocation24_spill] sm:$0xff] }
0x1ecb   :  { %v11165_v6 = vpop.f32.mrf.mxu0  ;;  %v11168_v59 = vpop.f32.mrf.mxu1 }
0x1ecc   :  { %v5016_v17 = vadd.f32 %v5015_v7, %v4564_v35  ;;  %v5126_v9 = vmax.f32 %v4928_v39, 0.0  ;;  %v5012_v10 = vadd.f32 %v5011_v28, %v4564_v35  ;;  %v11415_v28 = vld [vmem:[#allocation22_spill] sm:$0xff]  ;;  %v11420_v35 = vld [vmem:[#allocation27_spill] sm:$0xff] }
0x1ecd   :  { %8142 = vmatpush3.bf16.msra.mxu0 %v10919_v0  ;;  %8164 = vmatpush3.bf16.msra.mxu1 %v10929_v45  ;;  %v4881_v0 = vadd.f32 %v11059_v31, %v4536_v49  ;;  %v11138_v45 = vpop.permute.xlu1 %6254  ;;  %v5129_v31 = vmax.f32 %v4973_v56, 0.0  ;;  %v11416_v49 = vld [vmem:[#allocation23_spill] sm:$0xff]  ;;  %v5097_v7 = vpop.f32.mrf.mxu1  ;;  %v11419_v39 = vld [vmem:[#allocation26_spill] sm:$0xff]  ;;  %v11421_v56 = vld [vmem:[#allocation29_spill] sm:$0xff] }
0x1ece   :  { %8143 = vmatprep.subr.bf16.mxu0 %v10935_v18  ;;  %8165 = vmatprep.subr.bf16.mxu1 %v10943_v53  ;;  %v5124_v18 = vmax.f32 %v4885_v60, 0.0  ;;  %v5131_v5 = vmax.f32 %v5016_v17, 0.0  ;;  %v11153_v21 = vpop.permute.xlu0 %6268  ;;  %v5054_v60 = vpop.f32.mrf.mxu0  ;;  %v11422_v17 = vld [vmem:[#allocation28_spill] sm:$0xff] }
0x1ecf   :  { %v5108_v53 = vmax.f32 %v4881_v0, 0.0  ;;  %v11186_v50 = vpop.f32.mrf.mxu1 }
0x1ed0   :  { %v11181_v27 = vpop.f32.mrf.mxu0 }
0x1ed1   :  { %8144 = vmatpush3.bf16.msra.mxu0 %v10941_v51  ;;  %8166 = vmatpush3.bf16.msra.mxu1 %v10949_v3  ;;  %v5140_v51 = vpack.c.bf16 %v5124_v18, %v5108_v53  ;;  %v5142_v3 = vpack.c.bf16 %v5126_v9, %v5110_v40  ;;  %v11149_v1 = vpop.permute.xlu1 %6286  ;;  %v11423_v9 = vld [vmem:[#allocation30_spill] sm:$0xff]  ;;  %v11425_v53 = vld [vmem:[#allocation33_spill] sm:$0xff] }
0x1ed2   :  { %8145 = vmatprep.subr.bf16.mxu0 %v10955_v4  ;;  %8167 = vmatprep.subr.bf16.mxu1 %v10963_v30  ;;  %v5115_v4 = vmax.f32 %v5012_v10, 0.0  ;;  %v5145_v30 = vpack.c.bf16 %v5129_v31, %v5113_v8  ;;  %v11163_v37 = vpop.permute.xlu0 %6300  ;;  %v11424_v10 = vld [vmem:[#allocation31_spill] sm:$0xff]  ;;  %v11426_v31 = vld [vmem:[#allocation5_spill] sm:$0xff] }
0x1ed3   :  { %v4552_v40 = vrot.slane %v11122_v14, %v11426_v31 }
0x1ed4   :  { %v5147_v63 = vpack.c.bf16 %v5131_v5, %v5115_v4 }
0x1ed5   :  { %8146 = vmatpush3.bf16.msra.mxu0 %v10958_v46  ;;  %8168 = vmatpush3.bf16.msra.mxu1 %v10969_v20  ;;  %v11407_v46 = vld [vmem:[#allocation14_spill] sm:$0xff]  ;;  %v11408_v20 = vld [vmem:[#allocation15_spill] sm:$0xff]  ;;  %v11158_v61 = vpop.permute.xlu1 %6252  ;;  %v4971_v4 = vadd.f32 %v11105_v42, %v4552_v40 }
0x1ed6   :  { %8175 = vmatprep.subr.bf16.mxu0 %v11404_v52  ;;  %8197 = vmatprep.subr.bf16.mxu1 %v11405_v54  ;;  %v11178_v0 = vpop.permute.xlu0 %6266  ;;  %v5058_v52 = vpop.f32.mrf.mxu0  ;;  %v11429_v54 = vld [vmem:[#allocation7_spill] sm:$0xff] }
0x1ed8   :  { %6551 = vmatmul.mubr.bf16.vlgmr.msra.gmra.mxu0 %v5140_v51  ;;  %6592 = vmatmul.mubr.bf16.vlgmr.msra.gmra.mxu1 %v5142_v3  ;;  %v11427_v51 = vld [vmem:[#allocation6_spill] sm:$0xff]  ;;  %v11428_v3 = vld [vmem:[#allocation32_spill] sm:$0xff] }
0x1ed9   :  { %8176 = vmatpush3.bf16.msra.mxu0 %v11406_v62  ;;  %6632 = vmatprep.mubr.bf16.mxu0 %v5145_v30  ;;  %v11173_v36 = vpop.permute.xlu1 %6284  ;;  %v4560_v8 = vrot.slane %v11122_v14, %v11427_v51  ;;  %v4572_v30 = vrot.slane %v11122_v14, %v11429_v54  ;;  %v11430_v62 = vld [vmem:[#allocation34_spill] sm:$0xff] }
0x1eda   :  { %8198 = vmatpush3.bf16.msra.mxu1 %v11407_v46  ;;  %6673 = vmatprep.mubr.bf16.mxu1 %v5147_v63  ;;  %v11193_v5 = vpop.permute.xlu0 %6298  ;;  %v5101_v63 = vpop.f32.mrf.mxu1  ;;  %v11431_v46 = vld [vmem:[#allocation35_spill] sm:$0xff] }
0x1edb   :  { %8177 = vmatprep.subr.bf16.mxu0 %v11408_v20  ;;  %8199 = vmatprep.subr.bf16.mxu1 %v11409_v16  ;;  %v5014_v20 = vadd.f32 %v11108_v48, %v4560_v8  ;;  %v11432_v16 = vld [vmem:[#allocation8_spill] sm:$0xff]  ;;  %v5010_v42 = vadd.f32 %v11090_v43, %v4560_v8 }
0x1edd   :  { %8178 = vmatpush3.bf16.msra.mxu0 %v11410_v58  ;;  %v11184_v18 = vpop.permute.xlu1 %6250  ;;  %v4580_v58 = vrot.slane %v11122_v14, %v11432_v16 }
0x1ede   :  { %8200 = vmatpush3.bf16.msra.mxu1 %v11411_v23  ;;  %8179 = vmatprep.subr.bf16.mxu0 %v11412_v13  ;;  %v11433_v23 = vld [vmem:[#allocation37_spill] sm:$0xff]  ;;  %v6265_v48 = vpop.permute.xlu0 %6264 }
0x1edf   :  { %8201 = vmatprep.subr.bf16.mxu1 %v11413_v41  ;;  %v4967_v41 = vadd.f32 %v11087_v57, %v4552_v40  ;;  %v5114_v57 = vmax.f32 %v5010_v42, 0.0  ;;  %v11438_v40 = vld [vmem:[#allocation40_spill] sm:$0xff]  ;;  %v11248_v42 = vld [vmem:[%s11347_s5 + $0x8] sm:$0x3f] }
0x1ee1   :  { %8180 = vmatpush3.bf16.msra.mxu0 %v11414_v2  ;;  %v6283_v13 = vpop.permute.xlu1 %6282  ;;  %v5059_v2 = vadd.f32 %v5058_v52, %v4572_v30 }
0x1ee2   :  { %8202 = vmatpush3.bf16.msra.mxu1 %v11415_v28  ;;  %8181 = vmatprep.subr.bf16.mxu0 %v11416_v49  ;;  %v5102_v28 = vadd.f32 %v5101_v63, %v4580_v58  ;;  %v11434_v49 = vld [vmem:[#allocation36_spill] sm:$0xff] }
0x1ee3   :  { %8203 = vmatprep.subr.bf16.mxu1 %v11417_v33  ;;  %v5128_v33 = vmax.f32 %v4971_v4, 0.0 }
0x1ee4   :  { %v5135_v31 = vmax.f32 %v5102_v28, 0.0  ;;  %v5411_v28 = vrot.slane %v11248_v42, %v9545_v12 }
0x1ee5   :  { %8182 = vmatpush3.bf16.msra.mxu0 %v11418_v38  ;;  %v5055_v38 = vadd.f32 %v5054_v60, %v4572_v30  ;;  %v6249_v43 = vpop.permute.xlu1 %6248 }
0x1ee6   :  { %8204 = vmatpush3.bf16.msra.mxu1 %v11419_v39  ;;  %8183 = vmatprep.subr.bf16.mxu0 %v11420_v35  ;;  %v11435_v39 = vld [vmem:[#allocation38_spill] sm:$0xff]  ;;  %v11436_v35 = vld [vmem:[#allocation39_spill] sm:$0xff] }
0x1ee7   :  { %8205 = vmatprep.subr.bf16.mxu1 %v11421_v56  ;;  %v5130_v56 = vmax.f32 %v5014_v20, 0.0  ;;  %v5117_v8 = vmax.f32 %v5055_v38, 0.0 }
0x1ee9   :  { %8184 = vmatpush3.bf16.msra.mxu0 %v11422_v17  ;;  %v5098_v17 = vadd.f32 %v5097_v7, %v4580_v58  ;;  %v5146_v60 = vpack.c.bf16 %v5130_v56, %v5114_v57 }
0x1eea   :  { %8206 = vmatpush3.bf16.msra.mxu1 %v11423_v9  ;;  %8185 = vmatprep.subr.bf16.mxu0 %v11424_v10  ;;  %v11437_v9 = vld [vmem:[#allocation41_spill] sm:$0xff]  ;;  %v5112_v10 = vmax.f32 %v4967_v41, 0.0 }
0x1eeb   :  { %8207 = vmatprep.subr.bf16.mxu1 %v11425_v53  ;;  %v5133_v53 = vmax.f32 %v5059_v2, 0.0  ;;  %v5119_v52 = vmax.f32 %v5098_v17, 0.0 }
0x1eec   :  { %v5144_v51 = vpack.c.bf16 %v5128_v33, %v5112_v10 }
0x1eed   :  { %8186 = vmatpush3.bf16.msra.mxu0 %v11428_v3  ;;  %v5149_v7 = vpack.c.bf16 %v5133_v53, %v5117_v8  ;;  %v6297_v3 = vpop.permute.xlu0 %6296  ;;  %v5151_v4 = vpack.c.bf16 %v5135_v31, %v5119_v52 }
0x1eee   :  { %8208 = vmatpush3.bf16.msra.mxu1 %v11430_v62  ;;  %8187 = vmatprep.subr.bf16.mxu0 %v11431_v46 }
0x1eef   :  { %8209 = vmatprep.subr.bf16.mxu1 %v11433_v23 }
0x1ef1   :  { %8188 = vmatpush3.bf16.msra.mxu0 %v11434_v49 }
0x1ef2   :  { %8210 = vmatpush3.bf16.msra.mxu1 %v11435_v39  ;;  %8189 = vmatprep.subr.bf16.mxu0 %v11436_v35 }
0x1ef3   :  { %8211 = vmatprep.subr.bf16.mxu1 %v11437_v9 }
0x1ef5   :  { %8190 = vmatpush3.bf16.msra.mxu0 %v11438_v40 }
0x1ef6   :  { %8212 = vmatpush3.bf16.msra.mxu1 %v11067_v55  ;;  %8219 = vmatprep.subr.bf16.mxu0 %v11069_v26  ;;  %v6281_v55 = vpop.permute.xlu1 %6280  ;;  %v6263_v26 = vpop.permute.xlu0 %6262 }
0x1ef7   :  { %8241 = vmatprep.subr.bf16.mxu1 %v11079_v19 }
0x1ef8   :  { %6633 = vmatmul.mubr.bf16.vlgmr.msra.gmra.mxu0 %v5144_v51 }
0x1ef9   :  { %6674 = vmatmul.mubr.bf16.vlgmr.msra.gmra.mxu1 %v5146_v60  ;;  %8220 = vmatpush3.bf16.msra.mxu0 %v11075_v34 }
0x1efa   :  { %6714 = vmatprep.mubr.bf16.mxu0 %v5149_v7  ;;  %8242 = vmatpush3.bf16.msra.mxu1 %v11085_v47  ;;  %v6247_v34 = vpop.permute.xlu1 %6246  ;;  %v6295_v19 = vpop.permute.xlu0 %6294 }
0x1efb   :  { %6755 = vmatprep.mubr.bf16.mxu1 %v5151_v4  ;;  %8221 = vmatprep.subr.bf16.mxu0 %v11094_v15 }
0x1efc   :  { %8243 = vmatprep.subr.bf16.mxu1 %v11103_v11  ;;  %v4576_v11 = vrot.slane %v11122_v14, %v9646_v24 }
0x1efd   :  { %8222 = vmatpush3.bf16.msra.mxu0 %v11098_v44  ;;  %v4568_v44 = vrot.slane %v11122_v14, %v9643_v22 }
0x1efe   :  { %8244 = vmatpush3.bf16.msra.mxu1 %v11113_v25  ;;  %8223 = vmatprep.subr.bf16.mxu0 %v11129_v32  ;;  %v6279_v47 = vpop.permute.xlu1 %6278  ;;  %v6261_v15 = vpop.permute.xlu0 %6260 }
0x1eff   :  { %8245 = vmatprep.subr.bf16.mxu1 %v11143_v29  ;;  %v5057_v32 = vadd.f32 %v11181_v27, %v4568_v44  ;;  %v5053_v29 = vadd.f32 %v11165_v6, %v4568_v44 }
0x1f01   :  { %8224 = vmatpush3.bf16.msra.mxu0 %v11138_v45  ;;  %v5100_v45 = vadd.f32 %v11186_v50, %v4576_v11  ;;  %v5116_v14 = vmax.f32 %v5053_v29, 0.0 }
0x1f02   :  { %8246 = vmatpush3.bf16.msra.mxu1 %v11149_v1  ;;  %8225 = vmatprep.subr.bf16.mxu0 %v11153_v21  ;;  %v6245_v25 = vpop.permute.xlu1 %6244  ;;  %v6293_v1 = vpop.permute.xlu0 %6292  ;;  %v5096_v21 = vadd.f32 %v11168_v59, %v4576_v11 }
0x1f03   :  { %8247 = vmatprep.subr.bf16.mxu1 %v11163_v37  ;;  %v5134_v37 = vmax.f32 %v5100_v45, 0.0 }
0x1f05   :  { %8226 = vmatpush3.bf16.msra.mxu0 %v11158_v61  ;;  %v5132_v61 = vmax.f32 %v5057_v32, 0.0 }
0x1f06   :  { %8248 = vmatpush3.bf16.msra.mxu1 %v11173_v36  ;;  %8227 = vmatprep.subr.bf16.mxu0 %v11178_v0  ;;  %v6277_v24 = vpop.permute.xlu1 %6276  ;;  %v5118_v36 = vmax.f32 %v5096_v21, 0.0 }
0x1f07   :  { %8249 = vmatprep.subr.bf16.mxu1 %v11193_v5  ;;  %v5148_v0 = vpack.c.bf16 %v5132_v61, %v5116_v14 }
0x1f08   :  { %v5150_v27 = vpack.c.bf16 %v5134_v37, %v5118_v36 }
0x1f09   :  { %8228 = vmatpush3.bf16.msra.mxu0 %v11184_v18  ;;  %v11439_v18 = vmov 0.0  }
0x1f0a   :  { %8250 = vmatpush3.bf16.msra.mxu1 %v6283_v13  ;;  %8229 = vmatprep.subr.bf16.mxu0 %v6265_v48 }
0x1f0b   :  { %8251 = vmatprep.subr.bf16.mxu1 %v6297_v3 }
0x1f0d   :  { %8230 = vmatpush3.bf16.msra.mxu0 %v6249_v43 }
0x1f0e   :  { %8252 = vmatpush3.bf16.msra.mxu1 %v6281_v55  ;;  %8231 = vmatprep.subr.bf16.mxu0 %v6263_v26 }
0x1f0f   :  { %8253 = vmatprep.subr.bf16.mxu1 %v6295_v19 }
0x1f11   :  { %8232 = vmatpush3.bf16.msra.mxu0 %v6247_v34 }
0x1f12   :  { %8254 = vmatpush3.bf16.msra.mxu1 %v6279_v47  ;;  %8233 = vmatprep.subr.bf16.mxu0 %v6261_v15 }
0x1f13   :  { %8255 = vmatprep.subr.bf16.mxu1 %v6293_v1 }
0x1f15   :  { %8234 = vmatpush3.bf16.msra.mxu0 %v6245_v25 }
0x1f16   :  { %8256 = vmatpush3.bf16.msra.mxu1 %v6277_v24 }
0x1f17   :  { %8528 = vmatprep.subr.mxu1 %v11439_v18 }
0x1f18   :  { %6715 = vmatmul.mubr.bf16.vlgmr.msra.gmra.mxu0 %v5148_v0 }
0x1f19   :  { %6756 = vmatmul.mubr.bf16.vlgmr.msra.gmra.mxu1 %v5150_v27 }
0x1f1a   :  { %8530 = vmatprep.mubr.msk.f32.mxu1 %vm8975_vm3, %v11439_v18 }
0x1f78   :  { %v8103_v6 = vpop.f32.mrf.mxu0  ;;  %v8125_v59 = vpop.f32.mrf.mxu1 }
0x1f7a   :  { %v8104_v50 = vpop.f32.mrf.mxu0  ;;  %v8126_v5 = vpop.f32.mrf.mxu1 }
0x1f7b   :  { %v8105_v49 = vadd.f32 %v8104_v50, %v8103_v6  ;;  %v8127_v17 = vadd.f32 %v8126_v5, %v8125_v59 }
0x1f7c   :  { %v8106_v30 = vpop.f32.mrf.mxu0  ;;  %v8128_v63 = vpop.f32.mrf.mxu1 }
0x1f7d   :  { %v6471_v39 = vadd.f32 %v8105_v49, %v5411_v28 }
0x1f7e   :  { %v8107_v62 = vpop.f32.mrf.mxu0  ;;  %v8129_v20 = vpop.f32.mrf.mxu1 }
0x1f7f   :  { %v8108_v35 = vadd.f32 %v8107_v62, %v8106_v30  ;;  %v6512_v10 = vadd.f32 %v8127_v17, %v6471_v39  ;;  %v8130_v40 = vadd.f32 %v8129_v20, %v8128_v63  ;;  %v11440_v30 = vld [vmem:[#allocation9_spill] sm:$0xff]  ;;  %v11441_v20 = vld [vmem:[#allocation10_spill] sm:$0xff] }
0x1f80   :  { %v6805_v17 = vld [vmem:[%s11344_s2 + $0x1f] sm:$0xff] }
0x1f81   :  { %v6474_v53 = vadd.f32 %v8108_v35, %v5411_v28 }
0x1f83   :  { %v6515_v8 = vadd.f32 %v8130_v40, %v6474_v53 }
0x1f98   :  { %v8147_v46 = vpop.f32.mrf.mxu0  ;;  %v8169_v16 = vpop.f32.mrf.mxu1 }
0x1f9a   :  { %v8148_v58 = vpop.f32.mrf.mxu0  ;;  %v8170_v23 = vpop.f32.mrf.mxu1 }
0x1f9b   :  { %v8149_v9 = vadd.f32 %v8148_v58, %v8147_v46  ;;  %v8171_v60 = vadd.f32 %v8170_v23, %v8169_v16 }
0x1f9c   :  { %v8150_v13 = vpop.f32.mrf.mxu0  ;;  %v8172_v41 = vpop.f32.mrf.mxu1 }
0x1f9d   :  { %v6553_v43 = vadd.f32 %v8149_v9, %v6512_v10  ;;  %v6804_v9 = vld [vmem:[%s11344_s2 + $0x17] sm:$0xff] }
0x1f9e   :  { %v8151_v2 = vpop.f32.mrf.mxu0  ;;  %v8173_v38 = vpop.f32.mrf.mxu1 }
0x1f9f   :  { %v8152_v51 = vadd.f32 %v8151_v2, %v8150_v13  ;;  %v6594_v3 = vadd.f32 %v8171_v60, %v6553_v43  ;;  %v8174_v55 = vadd.f32 %v8173_v38, %v8172_v41 }
0x1fa1   :  { %v6556_v4 = vadd.f32 %v8152_v51, %v6515_v8  ;;  %v6795_v51 = vrot.slane %v11248_v42, %v9643_v22  ;;  %v6897_v22 = vld [vmem:[%s11344_s2 + $0x39] sm:$0x1] }
0x1fa3   :  { %v6597_v15 = vadd.f32 %v8174_v55, %v6556_v4 }
0x1fb8   :  { %v8191_v33 = vpop.f32.mrf.mxu0 }
0x1fb9   :  { %v8213_v48 = vpop.f32.mrf.mxu1 }
0x1fba   :  { %v8192_v56 = vpop.f32.mrf.mxu0 }
0x1fbb   :  { %v8214_v57 = vpop.f32.mrf.mxu1  ;;  %v8193_v52 = vadd.f32 %v8192_v56, %v8191_v33  ;;  %v6806_v56 = vld [vmem:[%s11344_s2 + $0x27] sm:$0xff] }
0x1fbc   :  { %v8194_v31 = vpop.f32.mrf.mxu0  ;;  %v8215_v44 = vadd.f32 %v8214_v57, %v8213_v48  ;;  %v6807_v48 = vld [vmem:[%s11344_s2 + $0x2f] sm:$0xff] }
0x1fbd   :  { %v8216_v12 = vpop.f32.mrf.mxu1  ;;  %v6635_v26 = vadd.f32 %v8193_v52, %v6594_v3  ;;  %8517 = vmatprep.subr.mxu0 %v6807_v48  ;;  %v6801_v52 = vrot.slane %v11248_v42, %v11429_v54  ;;  %v7815_v54 = vld [vmem:[%s11344_s2 + $0x37] ss:$0 sm:$0xff] }
0x1fbe   :  { %v8195_v7 = vpop.f32.mrf.mxu0  ;;  %8518 = vmatpush3.msra.mxu0 %v6807_v48 }
0x1fbf   :  { %v8196_v34 = vadd.f32 %v8195_v7, %v8194_v31  ;;  %v8217_v19 = vpop.f32.mrf.mxu1  ;;  %v6676_v32 = vadd.f32 %v8215_v44, %v6635_v26  ;;  %8519 = vmatprep.subr.mxu0 %v6806_v56  ;;  %v6896_v44 = vld [vmem:[%s11344_s2 + $0x38] sm:$0x1] }
0x1fc0   :  { %v8218_v61 = vadd.f32 %v8217_v19, %v8216_v12  ;;  %8520 = vmatpush3.msra.mxu0 %v6806_v56 }
0x1fc1   :  { %v6638_v45 = vadd.f32 %v8196_v34, %v6597_v15  ;;  %8521 = vmatprep.subr.mxu0 %v6805_v17 }
0x1fc2   :  { %8522 = vmatpush3.msra.mxu0 %v6805_v17 }
0x1fc3   :  { %v6679_v0 = vadd.f32 %v8218_v61, %v6638_v45  ;;  %8523 = vmatprep.subr.mxu0 %v6804_v9  ;;  %v7137_v61 = vld [vmem:[%s11344_s2 + $0x38] sm:$0x1] }
0x1fc4   :  { %8524 = vmatpush3.msra.mxu0 %v6804_v9 }
0x1fc5   :  { %8533 = vmatprep.subr.mxu0 %v11439_v18 }
0x1fd8   :  { %v8235_v47 = vpop.f32.mrf.mxu0 }
0x1fd9   :  { %v8257_v11 = vpop.f32.mrf.mxu1 }
0x1fda   :  { %v8236_v25 = vpop.f32.mrf.mxu0 }
0x1fdb   :  { %v8237_v29 = vadd.f32 %v8236_v25, %v8235_v47  ;;  %v8258_v1 = vpop.f32.mrf.mxu1  ;;  %v7138_v25 = vld [vmem:[%s11344_s2 + $0x39] sm:$0x1] }
0x1fdc   :  { %v8238_v21 = vpop.f32.mrf.mxu0  ;;  %v8259_v24 = vadd.f32 %v8258_v1, %v8257_v11  ;;  %v6979_v11 = vld [vmem:[%s11344_s2 + $0x3a] sm:$0xff] }
0x1fdd   :  { %v6717_v37 = vadd.f32 %v8237_v29, %v6676_v32  ;;  %v8260_v14 = vpop.f32.mrf.mxu1 }
0x1fde   :  { %v8239_v36 = vpop.f32.mrf.mxu0 }
0x1fdf   :  { %v6758_v27 = vadd.f32 %v8259_v24, %v6717_v37  ;;  %v8240_v6 = vadd.f32 %v8239_v36, %v8238_v21  ;;  %v8261_v59 = vpop.f32.mrf.mxu1  ;;  %v7055_v37 = vld [vmem:[%s11344_s2 + $0x43] sm:$0x3f]  ;;  %v6980_v24 = vld [vmem:[%s11344_s2 + $0x42] sm:$0x1] }
0x1fe0   :  { %v8262_v5 = vadd.f32 %v8261_v59, %v8260_v14 }
0x1fe1   :  { %v6720_v50 = vadd.f32 %v8240_v6, %v6679_v0  ;;  %v6764_v63 = vadd.f32 %v6758_v27, %v11440_v30  ;;  %v7296_v30 = vld [vmem:[%s11344_s2 + $0x43] sm:$0x3f] }
0x1fe3   :  { %v6761_v62 = vadd.f32 %v8262_v5, %v6720_v50  ;;  %v6766_v46 = vsel %vm245_vm4, %v6764_v63, 0.0 }
0x1fe4   :  { %6767 = vadd.xlane.f32.xlu0 %v6766_v46 }
0x1fe5   :  { %v6765_v16 = vadd.f32 %v6761_v62, %v11441_v20 }
0x1fe7   :  { %v6769_v58 = vsel %vm245_vm4, %v6765_v16, 0.0 }
0x1fe8   :  { %6770 = vadd.xlane.f32.xlu1 %v6769_v58 }
0x1ff9   :  { %6900 = vperm.xlu1 %8607, %v6897_v22  }
0x206d   :  { %v6768_v23 = vpop.xlane.xlu0 %6767 }
0x206e   :  { %v6772_v13 = vmul.f32 0.03125, %v6768_v23 }
0x2070   :  { %v6774_v41 = vsub.f32 %v6764_v63, %v6772_v13  ;;  %v7056_v63 = vld [vmem:[%s11344_s2 + $0x49] sm:$0x1] }
0x2071   :  { %v6771_v2 = vpop.xlane.xlu1 %6770 }
0x2072   :  { %v6773_v28 = vmul.f32 0.03125, %v6771_v2  ;;  %v6776_v49 = vmul.f32 %v6774_v41, %v6774_v41 }
0x2074   :  { %v6775_v33 = vsub.f32 %v6765_v16, %v6773_v28  ;;  %v6778_v38 = vsel %vm245_vm4, %v6776_v49, 0.0 }
0x2075   :  { %6779 = vadd.xlane.f32.xlu0 %v6778_v38  ;;  %v6901_v32 = vpop.permute.xlu1 %6900 }
0x2076   :  { %v6777_v39 = vmul.f32 %v6775_v33, %v6775_v33 }
0x2078   :  { %v6781_v35 = vsel %vm245_vm4, %v6777_v39, 0.0 }
0x2079   :  { %6782 = vadd.xlane.f32.xlu0 %v6781_v35 }
0x208f   :  { %7141 = vperm.xlu0 %8608, %v7138_v25  }
0x20fe   :  { %v6780_v10 = vpop.xlane.xlu0 %6779 }
0x20ff   :  { %v6784_v53 = vmul.f32 0.03125, %v6780_v10 }
0x2101   :  { %v6786_v57 = vadd.f32 1e-05, %v6784_v53 }
0x2102   :  { %v6783_v31 = vpop.xlane.xlu0 %6782 }
0x2103   :  { %8945 = vrsqrt.f32 %v6786_v57  ;;  %v6785_v40 = vmul.f32 0.03125, %v6783_v31 }
0x2105   :  { %v6787_v43 = vadd.f32 1e-05, %v6785_v40 }
0x2107   :  { %8947 = vrsqrt.f32 %v6787_v43 }
0x210a   :  { %v7142_v27 = vpop.permute.xlu0 %7141 }
0x2110   :  { %v8946_v8 = vpop.eup %8945 }
0x2111   :  { %v6790_v60 = vmul.f32 %v8946_v8, %v6774_v41  ;;  %v7297_v41 = vld [vmem:[%s11344_s2 + $0x49] sm:$0x1] }
0x2113   :  { %v6796_v12 = vmul.f32 %v6795_v51, %v6790_v60 }
0x2114   :  { %v8948_v7 = vpop.eup %8947 }
0x2115   :  { %v6791_v3 = vmul.f32 %v8948_v7, %v6775_v33  ;;  %v6802_v4 = vadd.f32 %v6801_v52, %v6796_v12 }
0x2117   :  { %v6797_v55 = vmul.f32 %v6795_v51, %v6791_v3  ;;  %8525 = vmatprep.mubr.msk.f32.mxu0 %vm245_vm4, %v6802_v4 }
0x2119   :  { %v6803_v26 = vadd.f32 %v6801_v52, %v6797_v55 }
0x211b   :  { %8526 = vmatmul.mubr.msk.f32.vlgmr.msra.gmra.mxu0 %vm245_vm4, %v6803_v26 }
0x211c   :  { %8535 = vmatprep.mubr.msk.f32.mxu0 %vm8975_vm3, %v11439_v18  ;;  %8534 = vmatpush3.msra.mxu0 %v6979_v11 }
0x211d   :  { %8543 = vmatprep.subr.mxu0 %v11439_v18 }
0x21db   :  { %v8527_v42 = vpop.f32.mrf.mxu0 }
0x21dc   :  { %v6891_v34 = vadd.f32 %v8527_v42, %v7815_v54 }
0x21dd   :  { %v6885_v19 = vpop.f32.mrf.mxu0 }
0x21de   :  { %v6886_v47 = vadd.f32 %v7815_v54, %v6885_v19  ;;  %v6895_v1 = vmax.f32 %v6891_v34, 0.0 }
0x21e0   :  { %v6894_v15 = vmax.f32 %v6886_v47, 0.0 }
0x21e2   :  { %8529 = vmatpush3.xpose.msk.msra.mxu1 %vm137_vm2, %v6894_v15 }
0x21e3   :  { %8538 = vmatprep.subr.mxu1 %v11439_v18 }
0x21e5   :  { %8531 = vmatmul.mubr.msk.f32.vlgmr.msra.gmra.mxu1 %vm137_vm2, %v6896_v44 }
0x21e6   :  { %8540 = vmatprep.mubr.msk.f32.mxu1 %vm8975_vm3, %v11439_v18  ;;  %8539 = vmatpush3.msk.msra.mxu1 %vm7061_vm8, %v7055_v37 }
0x21e7   :  { %8548 = vmatprep.subr.mxu1 %v11439_v18 }
0x22a5   :  { %v6975_v45 = vpop.f32.mrf.mxu1 }
0x22a6   :  { %v6976_v29 = vadd.f32 %v6975_v45, %v6901_v32 }
0x22a7   :  { %v8532_v21 = vpop.f32.mrf.mxu1 }
0x22a8   :  { %8536 = vmatmul.mubr.msk.f32.vlgmr.msra.gmra.mxu0 %vm295_vm5, %v6976_v29 }
0x22a9   :  { %8544 = vmatpush3.xpose.msk.msra.mxu0 %vm137_vm2, %v6895_v1  ;;  %8545 = vmatprep.mubr.msk.f32.mxu0 %vm8975_vm3, %v11439_v18 }
0x22aa   :  { %8553 = vmatprep.subr.mxu0 %v11439_v18 }
0x22ac   :  { %8546 = vmatmul.mubr.msk.f32.vlgmr.msra.gmra.mxu0 %vm137_vm2, %v7137_v61 }
0x22ad   :  { %8555 = vmatprep.mubr.msk.f32.mxu0 %vm8975_vm3, %v11439_v18  ;;  %8554 = vmatpush3.msk.msra.mxu0 %vm7061_vm8, %v7296_v30 }
0x2368   :  { %v7050_v14 = vpop.f32.mrf.mxu0 }
0x2369   :  { %v7051_v36 = vadd.f32 %v7050_v14, %v6980_v24 }
0x236a   :  { %v8537_v0 = vpop.f32.mrf.mxu0 }
0x236b   :  { %v7054_v6 = vmax.f32 %v7051_v36, 0.0 }
0x236c   :  { %v7216_v59 = vpop.f32.mrf.mxu0 }
0x236d   :  { %8541 = vmatmul.mubr.msk.f32.vlgmr.msra.gmra.mxu1 %vm7057_vm9, %v7054_v6  ;;  %v7217_v50 = vadd.f32 %v7216_v59, %v7142_v27 }
0x236e   :  { %8549 = vmatpush3.msra.mxu1 %v6979_v11  ;;  %v8547_v5 = vpop.f32.mrf.mxu0  ;;  %8550 = vmatprep.mubr.msk.f32.mxu1 %vm8975_vm3, %v11439_v18  ;;  %v7221_v18 = vld [vmem:[%s11344_s2 + $0x42] sm:$0x1] }
0x2371   :  { %8551 = vmatmul.mubr.msk.f32.vlgmr.msra.gmra.mxu1 %vm295_vm5, %v7217_v50 }
0x242d   :  { %v7131_v62 = vpop.f32.mrf.mxu1 }
0x242e   :  { %v7132_v46 = vadd.f32 %v7131_v62, %v7056_v63 }
0x242f   :  { %v8542_v20 = vpop.f32.mrf.mxu1 }
0x2430   :  { %7136 = vst.msk [vmem:[#allocation2] sm:$0x1] %vm7135_vm10, %v7132_v46 }
0x2431   :  { %v7291_v16 = vpop.f32.mrf.mxu1 }
0x2432   :  { %v7292_v58 = vadd.f32 %v7291_v16, %v7221_v18 }
0x2433   :  { %v8552_v23 = vpop.f32.mrf.mxu1 }
0x2434   :  { %v7295_v13 = vmax.f32 %v7292_v58, 0.0 }
0x2436   :  { %8556 = vmatmul.mubr.msk.f32.vlgmr.msra.gmra.mxu0 %vm7057_vm9, %v7295_v13 }
0x24f6   :  { %v7370_v2 = vpop.f32.mrf.mxu0 }
0x24f7   :  { %v7371_v28 = vadd.f32 %v7370_v2, %v7297_v41 }
0x24f8   :  { %v8557_v49 = vpop.f32.mrf.mxu0 }
0x24f9   :  { %7374 = vst.msk [vmem:[#allocation2 + $0x1] sm:$0x1] %vm7135_vm10, %v7371_v28 }
0x24fa   :  { %8963 = shalt.err (!%p8960_p4)
}
0x24fb   :  { %7384 = dma.vmem_to_hbm [thread:$0]  %s7382_s21, 32, %s11351_s9, [#allocation3]  }
0x24fc   :  { %8972 = dma.done.wait [#allocation3], 32  }
0x24fd   :  { %8973 = vsyncadd [#allocation3], 4294967264 }
0x24fe   :  { %7388 = vsyncpa [#allocation3], 1 }

</bundles_post_ra>
